<compile_context>
chip_gen: v5e
topology: v5e:2x2
jax: 0.10.0
libtpu: 0.0.40
codegen_flags: <defaults>
</compile_context>

<pallas_src>
import numpy as np
import jax
import jax.numpy as jnp
from jax import lax
from jax.experimental import pallas as pl
from jax.experimental.pallas import tpu as pltpu

_PI = float(np.pi)
_INV_PI = float(1.0 / np.pi)
_PI_HI = 3.140625                       # exact in a few mantissa bits
_PI_LO = float(np.pi - 3.140625)        # Cody-Waite low word


def get_frequency_modes(seq_len, modes=64, mode_select_method='random'):
    """Same semantics as the PyTorch helper (uses np.random for 'random')."""
    modes = min(modes, seq_len // 2)
    if mode_select_method == 'random':
        index = list(range(0, seq_len // 2))
        np.random.shuffle(index)
        index = index[:modes]
    else:
        index = list(range(0, modes))
    index.sort()
    return index


def _sincos(x):
    """sin(x), cos(x) from mul/add/floor only (Cody-Waite reduction + Taylor)."""
    k = jnp.floor(x * _INV_PI + 0.5)                 # nearest integer multiple of pi
    r = (x - k * _PI_HI) - k * _PI_LO                # r in [-pi/2, pi/2]
    parity = k - 2.0 * jnp.floor(k * 0.5)            # 0.0 or 1.0
    sign = 1.0 - 2.0 * parity                        # (-1)^k
    r2 = r * r
    s = r * (1.0 + r2 * (-1.0 / 6 + r2 * (1.0 / 120 + r2 * (-1.0 / 5040
            + r2 * (1.0 / 362880 + r2 * (-1.0 / 39916800))))))
    c = 1.0 + r2 * (-0.5 + r2 * (1.0 / 24 + r2 * (-1.0 / 720
            + r2 * (1.0 / 40320 + r2 * (-1.0 / 3628800 + r2 * (1.0 / 479001600))))))
    return sign * s, sign * c


# --------------------- device-aware configuration helpers ---------------------

def _device_kind():
    try:
        return jax.devices()[0].device_kind.lower()
    except Exception:
        return ""


def _tpu_flags():
    kind = _device_kind()
    is_v7x = ("v7" in kind) or ("7x" in kind)
    is_v6 = "v6" in kind
    is_v5e = ("v5e" in kind) or ("v5 lite" in kind) or ("v5litepod" in kind)
    return is_v7x, is_v6, is_v5e


def _vmem_capacity_bytes(is_v7x):
    try:
        return int(pltpu.get_tpu_info().vmem_capacity_bytes)
    except Exception:
        return (64 << 20) if is_v7x else (128 << 20)


def _pick_head_block(H, Dh, M, budget_bytes, w_buffers, prefer_split=False):
    """Largest head-fusion factor whose fused lane width is 128-aligned (or covers
    all heads) and whose buffered packed-weight slab fits the budget."""
    legal = [hb for hb in range(1, H + 1)
             if H % hb == 0 and (hb == H or (hb * Dh) % 128 == 0)]

    def w_slab(hb):  # two packed f32 weight tensors (hb, Dh, M, 2*Dh), w_buffers deep
        return 2 * hb * Dh * M * (2 * Dh) * 4 * w_buffers

    fitting = [hb for hb in legal if w_slab(hb) <= budget_bytes]
    if not fitting:
        return min(legal)
    if prefer_split:                         # v7x: keep >=2 head groups for 2 TCs
        split = [hb for hb in fitting if H // hb >= 2]
        if split:
            return max(split)
    return max(fitting)


def _vmem_bytes_estimate(t, dh, G, M, w_heads, const_buf, w_buf, io_buf=2):
    """IO blocks + constants + weights + kernel intermediates + scratch (bytes)."""
    bf, f4 = 2, 4
    gd = G * dh
    io = io_buf * (3 * t * gd * bf + t * gd * f4)            # q/k/v bf16 in + f32 out
    consts = const_buf * (2 * (2 * M) * t + t * (2 * M)) * bf  # fqt, fkvt, ir (bf16)
    weights = w_buf * 2 * w_heads * dh * M * (2 * dh) * f4     # packed W1, W2 (f32)
    interm = 3 * (2 * M) * gd * f4                             # Q / K / V spectra
    interm += (2 * M) * gd * f4                                # Yri scratch
    interm += t * gd * f4                                      # irfft result temp
    per_g = ((2 * M) * (2 * dh) + M * (2 * dh) + (2 * M) * M + 8 * M * M
             + (2 * M) * (2 * M) + (2 * M) * dh + 2 * M * (2 * dh)) * f4
    interm += 2 * per_g                                        # compiler-temp slack
    return io + consts + weights + interm


# --------------------------------- kernel ---------------------------------

def _make_feaf_kernel(num_modes, head_dim, num_groups, weight_heads, bf16_attn=False):
    M, dh, G = num_modes, head_dim, num_groups
    f32 = jnp.float32
    mxu_dt = jnp.bfloat16 if bf16_attn else jnp.float32

    def kernel(xq_ref, xk_ref, xv_ref, fqt_ref, fkvt_ref, ir_ref,
               w1_ref, w2_ref, o_ref, yri_ref):
        # rfft + mode selection for every fused (batch, head) column group in one
        # bf16 MXU matmul per tensor (f32 accumulation). Rows [0:M] real, [M:2M] imag.
        Q = jnp.dot(fqt_ref[...], xq_ref[...], preferred_element_type=f32)   # (2M, G*dh)
        K = jnp.dot(fkvt_ref[...], xk_ref[...], preferred_element_type=f32)
        V = jnp.dot(fkvt_ref[...], xv_ref[...], preferred_element_type=f32)

        for g in range(G):                       # static, small
            h = g % weight_heads                 # weight head for this column group
            lo = g * dh
            Qri = Q[:, lo:lo + dh]               # (2M, dh)  [Qr; Qi]
            Kri = K[:, lo:lo + dh]
            Vri = V[:, lo:lo + dh]
            Qr, Qi = Qri[:M], Qri[M:]
            Kr, Ki = Kri[:M], Kri[M:]

            # Stacked complex Q.K^T (no conjugation): one (2M,2dh) x (M,2dh) dot_general
            # contracting axis 1 of BOTH operands (no explicit K transpose).
            #   rows [0:M]  -> Re(s) = Qr.Kr - Qi.Ki
            #   rows [M:2M] -> Im(s) = Qi.Kr + Qr.Ki
            AB = jnp.concatenate(
                [jnp.concatenate([Qr, -Qi], axis=1),
                 jnp.concatenate([Qi, Qr], axis=1)], axis=0)          # (2M, 2dh)
            Kc = jnp.concatenate([Kr, Ki], axis=1)                    # (M, 2dh)
            srsi = lax.dot_general(AB.astype(mxu_dt), Kc.astype(mxu_dt),
                                   (((1,), (1,)), ((), ())),
                                   preferred_element_type=f32)        # (2M, M)
            sr, si = srsi[:M], srsi[M:]

            # complex tanh: tanh(a+ib) = (sinh 2a + i sin 2b) / (cosh 2a + cos 2b)
            a2 = jnp.clip(2.0 * sr, -50.0, 50.0)     # tanh saturated far before clip
            b2 = 2.0 * si
            sin2b, cos2b = _sincos(b2)
            ea, ena = jnp.exp(a2), jnp.exp(-a2)
            inv_den = pl.reciprocal(ea + ena + 2.0 * cos2b, approx=True)
            tr = (ea - ena) * inv_den
            ti = (2.0 * sin2b) * inv_den                              # (M, M)

            # Stacked tanh(s) @ V: one (2M, 2M) x (2M, dh) dot -> [Rr; Ri].
            T12 = jnp.concatenate(
                [jnp.concatenate([tr, -ti], axis=1),
                 jnp.concatenate([ti, tr], axis=1)], axis=0)          # (2M, 2M)
            RrRi = jnp.dot(T12.astype(mxu_dt), Vri.astype(mxu_dt),
                           preferred_element_type=f32)                # (2M, dh)
            Rr, Ri = RrRi[:M], RrRi[M:]

            # Per-mode channel mixing on full-width (M, 2dh) vregs with lane-packed
            # weights W1 = [wr | wi], W2 = [-wi | wr]: accumulator Y = [yr | yi].
            # Weight tiles are read from VMEM per step to keep vreg pressure low.
            Y = jnp.zeros((M, 2 * dh), f32)
            for d in range(dh):                  # static
                Y = Y + Rr[:, d:d + 1] * w1_ref[h, d] + Ri[:, d:d + 1] * w2_ref[h, d]

            # Deposit this group's spectrum into the shared VMEM scratch slab
            # (re on rows [0:M], im on rows [M:2M]) -- no Python-list accumulators.
            yri_ref[:, lo:lo + dh] = jnp.concatenate([Y[:, :dh], Y[:, dh:]], axis=0)

        # Sparse irfft for all groups in one lane-dense matmul (module scale folded in).
        o_ref[...] = jnp.dot(ir_ref[...], yri_ref[...].astype(jnp.bfloat16),
                             preferred_element_type=f32)              # (T, G*dh)

    return kernel


# -------------------------------- wrapper ---------------------------------

class FEAfPallas:
    """FEAf with the FFT / attention / inverse-FFT hot path in one Pallas kernel."""

    def __init__(self, d_model, seq_len, num_heads, num_modes=0,
                 mode_select_method='random', activation='tanh', key=None,
                 bf16_attention=False):
        if activation != 'tanh':
            # TODO(synk): 'softmax' activation branch not implemented (default is 'tanh').
            raise NotImplementedError(activation)
        self.seq_len = seq_len
        self.num_heads = num_heads
        self.head_dim = d_model // num_heads
        self.bf16_attention = bf16_attention
        self.index_q = get_frequency_modes(seq_len, modes=num_modes,
                                           mode_select_method=mode_select_method)
        self.index_kv = get_frequency_modes(seq_len, modes=num_modes,
                                            mode_select_method=mode_select_method)
        self.scale = 1.0 / (num_heads * d_model * num_heads * d_model)
        M = len(self.index_q)
        self.num_modes = M
        H, Dh, T = num_heads, self.head_dim, seq_len

        # ----- generation-aware tiling / VMEM budgets -----
        self.is_v7x, self.is_v6, self.is_v5e = _tpu_flags()
        vmem_cap = _vmem_capacity_bytes(self.is_v7x)
        if self.is_v7x:
            # 64 MiB VMEM/TC: small weight budget, single-buffered invariants,
            # head-axis sharding across the 2 TensorCores.
            w_budget, self.w_buffers, self.const_buffers = 10 << 20, 1, 1
            self.vmem_cap = min(int(0.6 * vmem_cap), 40 << 20)
            self.dim_semantics = ("parallel", "arbitrary")
        elif self.is_v6:
            w_budget, self.w_buffers, self.const_buffers = 40 << 20, 2, 2
            self.vmem_cap = min(vmem_cap // 2, 64 << 20)
            self.dim_semantics = ("parallel", "parallel")
        else:  # v5e / unknown
            w_budget, self.w_buffers, self.const_buffers = 16 << 20, 2, 2
            self.vmem_cap = min(vmem_cap // 2, 48 << 20)
            self.dim_semantics = ("parallel", "parallel")

        self.hblk = _pick_head_block(H, Dh, M, w_budget, self.w_buffers,
                                     prefer_split=self.is_v7x)

        # weights1 = scale * torch.rand(H, Dh, Dh, M, dtype=cfloat): U[0,1) re & im
        # (torch layout (h, d_in, d_out, m)); kept for the reference implementation.
        kr_, ki_ = jax.random.split(key)
        shape = (H, Dh, Dh, M)
        self.w_real = (self.scale * jax.random.uniform(kr_, shape)).astype(jnp.float32)
        self.w_imag = (self.scale * jax.random.uniform(ki_, shape)).astype(jnp.float32)
        # Lane-packed kernel layout: per (h, d_in) an (M, 2*Dh_out) tile,
        #   W1 = [wr | wi],  W2 = [-wi | wr]  (complex multiply = 2 full-width FMAs).
        wr_t = jnp.transpose(self.w_real, (0, 1, 3, 2))   # (H, Dh_in, M, Dh_out)
        wi_t = jnp.transpose(self.w_imag, (0, 1, 3, 2))
        self.w1 = jnp.concatenate([wr_t, wi_t], axis=-1)  # (H, Dh, M, 2*Dh) f32
        self.w2 = jnp.concatenate([-wi_t, wr_t], axis=-1)

        # Forward DFT rows for the selected modes, stacked [Re; Im] (2M, T), bf16:
        #   Re X[m] = sum_t cos(2*pi*t*j_m/T) x[t],  Im X[m] = -sum_t sin(...) x[t]
        t = np.arange(T, dtype=np.float64)
        jq = np.asarray(self.index_q, dtype=np.float64)
        jkv = np.asarray(self.index_kv, dtype=np.float64)
        ang_q = 2.0 * np.pi * np.outer(jq, t) / T      # (M, T)
        ang_kv = 2.0 * np.pi * np.outer(jkv, t) / T
        self.fqt = jnp.asarray(np.concatenate(
            [np.cos(ang_q), -np.sin(ang_q)], axis=0).astype(np.float32)
        ).astype(jnp.bfloat16)                                            # (2M, T)
        self.fkvt = jnp.asarray(np.concatenate(
            [np.cos(ang_kv), -np.sin(ang_kv)], axis=0).astype(np.float32)
        ).astype(jnp.bfloat16)                                            # (2M, T)

        # Sparse irfft, concatenated [cos | -sin] (T, 2M), bf16; weight 2 for interior
        # modes, 1 for DC/Nyquist; the module's `out_ft * scale` folded in.
        jq_i = np.asarray(self.index_q)
        wfac = np.where((jq_i == 0) | (jq_i == T // 2), 1.0, 2.0)
        ang_i = 2.0 * np.pi * np.outer(t, jq) / T      # (T, M)
        ic = wfac[None, :] * np.cos(ang_i) / T * self.scale
        is_ = -wfac[None, :] * np.sin(ang_i) / T * self.scale
        self.ir = jnp.asarray(np.concatenate([ic, is_], axis=1).astype(np.float32)
                              ).astype(jnp.bfloat16)                      # (T, 2M)

    def __call__(self, q, k, v):
        b, t, h, d = q.shape
        assert t == self.seq_len and h == self.num_heads and d == self.head_dim
        M = self.num_modes
        hd = h * d
        hblk = self.hblk
        bf16 = jnp.bfloat16

        # Small-model fallback: if the fused head block is narrower than 128 lanes,
        # fuse batch rows into the lane dimension (single small wrapper relayout) so
        # the DFT matmuls and output stores get (closer to) lane-dense.
        bblk = 1
        if hblk == h and hblk * d < 128 and b > 1:
            divs = [x for x in range(1, b + 1) if b % x == 0]
            wide = [x for x in divs if x * hd >= 128]
            bblk = min(wide) if wide else max(divs)

        if bblk > 1:
            bo = b // bblk

            def relayout(x):
                x = x.reshape(bo, bblk, t, hd)
                x = jnp.transpose(x, (0, 2, 1, 3))
                return x.reshape(bo, t, bblk * hd).astype(bf16)

            xq, xk, xv = relayout(q), relayout(k), relayout(v)
            n_b, lanes = bo, bblk * hd
            num_groups, weight_heads = bblk * h, h
            n_hgrid, w_block_heads = 1, h
        else:
            # Native (B, T, H, Dh) layout consumed directly; only a free reshape + cast.
            xq = q.reshape(b, t, hd).astype(bf16)
            xk = k.reshape(b, t, hd).astype(bf16)
            xv = v.reshape(b, t, hd).astype(bf16)
            n_b, lanes = b, hblk * d
            num_groups, weight_heads = hblk, hblk
            n_hgrid, w_block_heads = h // hblk, hblk

        kernel = _make_feaf_kernel(M, d, num_groups, weight_heads,
                                   bf16_attn=self.bf16_attention)

        # v7x only: single-buffer the batch-invariant blocks to reclaim VMEM.
        const_mode = pl.Buffered(1) if (self.is_v7x and self.const_buffers == 1) else None
        w_mode = pl.Buffered(1) if (self.is_v7x and self.w_buffers == 1) else None

        def _spec(shape, imap, mode=None):
            if mode is None:
                return pl.BlockSpec(shape, imap)
            return pl.BlockSpec(shape, imap, pipeline_mode=mode)

        x_spec = pl.BlockSpec((None, t, lanes), lambda hi, bi: (bi, 0, hi))
        fq_spec = _spec((2 * M, t), lambda hi, bi: (0, 0), const_mode)
        fkv_spec = _spec((2 * M, t), lambda hi, bi: (0, 0), const_mode)
        ir_spec = _spec((t, 2 * M), lambda hi, bi: (0, 0), const_mode)
        w_spec = _spec((w_block_heads, d, M, 2 * d), lambda hi, bi: (hi, 0, 0, 0), w_mode)
        o_spec = pl.BlockSpec((None, t, lanes), lambda hi, bi: (bi, 0, hi))

        est = _vmem_bytes_estimate(t, d, num_groups, M, w_block_heads,
                                   const_buf=self.const_buffers, w_buf=self.w_buffers)
        vmem_limit = int(min(self.vmem_cap, max(int(1.3 * est), 16 << 20)))

        out = pl.pallas_call(
            kernel,
            out_shape=jax.ShapeDtypeStruct((n_b, t, lanes), jnp.float32),
            # Heads OUTER, batch INNER: the per-head-group weight block index is
            # invariant over the inner batch loop, so weights stay VMEM-resident.
            grid=(n_hgrid, n_b),
            in_specs=[x_spec, x_spec, x_spec,
                      fq_spec, fkv_spec, ir_spec,
                      w_spec, w_spec],
            out_specs=o_spec,
            scratch_shapes=[pltpu.VMEM((2 * M, num_groups * d), jnp.float32)],
            compiler_params=pltpu.CompilerParams(
                dimension_semantics=self.dim_semantics,
                vmem_limit_bytes=vmem_limit),
        )(xq, xk, xv, self.fqt, self.fkvt, self.ir, self.w1, self.w2)

        if bblk > 1:
            out = out.reshape(b // bblk, t, bblk, hd)
            out = jnp.transpose(out, (0, 2, 1, 3)).reshape(b, t, h, d)
        else:
            out = out.reshape(b, t, h, d)
        return out                               # (B, T, H, Dh)


def feaf_reference_np(mod, q, k, v):
    """Pure numpy (complex128) reference — literal translation of the torch forward."""
    q64 = np.asarray(q, np.float64)
    k64 = np.asarray(k, np.float64)
    v64 = np.asarray(v, np.float64)
    b, t, h, d = q64.shape
    xq = q64.transpose(0, 2, 3, 1)
    xk = k64.transpose(0, 2, 3, 1)
    xv = v64.transpose(0, 2, 3, 1)
    iq = np.asarray(mod.index_q)
    ikv = np.asarray(mod.index_kv)
    xq_ft = np.fft.rfft(xq, axis=-1)[..., iq]
    xk_ft = np.fft.rfft(xk, axis=-1)[..., ikv]
    xv_ft = np.fft.rfft(xv, axis=-1)[..., ikv]
    s = np.einsum('bhdx,bhdy->bhxy', xq_ft, xk_ft)
    s = np.tanh(s)                                   # complex tanh (torch .tanh())
    r = np.einsum('bhxy,bhdy->bhdx', s, xv_ft)
    w = np.asarray(mod.w_real, np.float64) + 1j * np.asarray(mod.w_imag, np.float64)
    y = np.einsum('bhdx,hdox->bhox', r, w)
    out_ft = np.zeros((b, h, d, t // 2 + 1), np.complex128)
    out_ft[..., iq] = y
    out = np.fft.irfft(out_ft * mod.scale, n=t, axis=-1)
    return out.transpose(0, 3, 1, 2)


if __name__ == "__main__":
    np.random.seed(0)   # deterministic 'random' frequency-mode selection
    B, SEQ_LEN, NUM_HEADS, D_MODEL, NUM_MODES = 2, 16, 4, 32, 4
    HEAD_DIM = D_MODEL // NUM_HEADS

    key = jax.random.PRNGKey(0)
    kq, kk, kv, kw = jax.random.split(key, 4)
    q = 0.15 * jax.random.normal(kq, (B, SEQ_LEN, NUM_HEADS, HEAD_DIM), jnp.float32)
    k = 0.15 * jax.random.normal(kk, (B, SEQ_LEN, NUM_HEADS, HEAD_DIM), jnp.float32)
    v = 0.15 * jax.random.normal(kv, (B, SEQ_LEN, NUM_HEADS, HEAD_DIM), jnp.float32)

    mod = FEAfPallas(D_MODEL, SEQ_LEN, NUM_HEADS, num_modes=NUM_MODES,
                     mode_select_method='random', activation='tanh', key=kw)

    out = jax.block_until_ready(mod(q, k, v))
    assert out.shape == (B, SEQ_LEN, NUM_HEADS, HEAD_DIM), out.shape

    ref = feaf_reference_np(mod, q, k, v)
    rel_err = float(np.max(np.abs(np.asarray(out, np.float64) - ref))
                    / (np.max(np.abs(ref)) + 1e-30))
    if not np.isfinite(rel_err) or rel_err > 5e-2:
        raise AssertionError(f"Pallas FEAf mismatch vs numpy reference: rel_err={rel_err:.3e}")
    print("KERNEL_OK")
</pallas_src>

<mosaic_0001>
module attributes {stable_mosaic.version = 11 : i64} {
  func.func @kernel(%arg0: i32, %arg1: i32, %arg2: memref<1x16x64xbf16, #tpu.memory_space<vmem>>, %arg3: memref<1x16x64xbf16, #tpu.memory_space<vmem>>, %arg4: memref<1x16x64xbf16, #tpu.memory_space<vmem>>, %arg5: memref<8x16xbf16, #tpu.memory_space<vmem>>, %arg6: memref<8x16xbf16, #tpu.memory_space<vmem>>, %arg7: memref<16x8xbf16, #tpu.memory_space<vmem>>, %arg8: memref<4x8x4x16xf32, #tpu.memory_space<vmem>>, %arg9: memref<4x8x4x16xf32, #tpu.memory_space<vmem>>, %arg10: memref<1x16x64xf32, #tpu.memory_space<vmem>>, %arg11: memref<8x64xf32, #tpu.memory_space<vmem>>) attributes {dimension_semantics = [#tpu.dimension_semantics<parallel>, #tpu.dimension_semantics<parallel>], iteration_bounds = array<i64: 1, 1>, scalar_prefetch = 0 : i64, scratch_operands = 1 : i64, tpu.core_type = #tpu.core_type<tc>, window_params = [{transform_indices = @transform_0, window_bounds = array<i64: 1, 16, 64>}, {transform_indices = @transform_1, window_bounds = array<i64: 1, 16, 64>}, {transform_indices = @transform_2, window_bounds = array<i64: 1, 16, 64>}, {pipeline_mode = #tpu.pipeline_mode<synchronous>, transform_indices = @transform_3, window_bounds = array<i64: 8, 16>}, {pipeline_mode = #tpu.pipeline_mode<synchronous>, transform_indices = @transform_4, window_bounds = array<i64: 8, 16>}, {pipeline_mode = #tpu.pipeline_mode<synchronous>, transform_indices = @transform_5, window_bounds = array<i64: 16, 8>}, {transform_indices = @transform_6, window_bounds = array<i64: 4, 8, 4, 16>}, {transform_indices = @transform_7, window_bounds = array<i64: 4, 8, 4, 16>}, {transform_indices = @transform_8, window_bounds = array<i64: 1, 16, 64>}]} {
    %c0 = arith.constant 0 : index
    %c0_0 = arith.constant 0 : index
    %0 = vector.load %arg5[%c0, %c0_0] : memref<8x16xbf16, #tpu.memory_space<vmem>>, vector<8x16xbf16>
    %c0_1 = arith.constant 0 : index
    %c0_2 = arith.constant 0 : index
    %c0_3 = arith.constant 0 : index
    %1 = vector.load %arg2[%c0_1, %c0_2, %c0_3] : memref<1x16x64xbf16, #tpu.memory_space<vmem>>, vector<1x16x64xbf16>
    %2 = vector.shape_cast %1 : vector<1x16x64xbf16> to vector<16x64xbf16>
    %cst = arith.constant dense<0.000000e+00> : vector<8x64xf32>
    %3 = tpu.matmul %0, %2, %cst {dimension_numbers = #tpu.dot_dimension_numbers<[1], [0], [0], [1], [0, 0, 1, 1], [], []>} : vector<8x16xbf16>, vector<16x64xbf16>, vector<8x64xf32> -> vector<8x64xf32>
    %c0_4 = arith.constant 0 : index
    %c0_5 = arith.constant 0 : index
    %4 = vector.load %arg6[%c0_4, %c0_5] : memref<8x16xbf16, #tpu.memory_space<vmem>>, vector<8x16xbf16>
    %c0_6 = arith.constant 0 : index
    %c0_7 = arith.constant 0 : index
    %c0_8 = arith.constant 0 : index
    %5 = vector.load %arg3[%c0_6, %c0_7, %c0_8] : memref<1x16x64xbf16, #tpu.memory_space<vmem>>, vector<1x16x64xbf16>
    %6 = vector.shape_cast %5 : vector<1x16x64xbf16> to vector<16x64xbf16>
    %cst_9 = arith.constant dense<0.000000e+00> : vector<8x64xf32>
    %7 = tpu.matmul %4, %6, %cst_9 {dimension_numbers = #tpu.dot_dimension_numbers<[1], [0], [0], [1], [0, 0, 1, 1], [], []>} : vector<8x16xbf16>, vector<16x64xbf16>, vector<8x64xf32> -> vector<8x64xf32>
    %c0_10 = arith.constant 0 : index
    %c0_11 = arith.constant 0 : index
    %8 = vector.load %arg6[%c0_10, %c0_11] : memref<8x16xbf16, #tpu.memory_space<vmem>>, vector<8x16xbf16>
    %c0_12 = arith.constant 0 : index
    %c0_13 = arith.constant 0 : index
    %c0_14 = arith.constant 0 : index
    %9 = vector.load %arg4[%c0_12, %c0_13, %c0_14] : memref<1x16x64xbf16, #tpu.memory_space<vmem>>, vector<1x16x64xbf16>
    %10 = vector.shape_cast %9 : vector<1x16x64xbf16> to vector<16x64xbf16>
    %cst_15 = arith.constant dense<0.000000e+00> : vector<8x64xf32>
    %11 = tpu.matmul %8, %10, %cst_15 {dimension_numbers = #tpu.dot_dimension_numbers<[1], [0], [0], [1], [0, 0, 1, 1], [], []>} : vector<8x16xbf16>, vector<16x64xbf16>, vector<8x64xf32> -> vector<8x64xf32>
    %12 = vector.extract_strided_slice %3 {offsets = [0, 0], sizes = [8, 8], strides = [1, 1]} : vector<8x64xf32> to vector<8x8xf32>
    %13 = vector.extract_strided_slice %7 {offsets = [0, 0], sizes = [8, 8], strides = [1, 1]} : vector<8x64xf32> to vector<8x8xf32>
    %14 = vector.extract_strided_slice %11 {offsets = [0, 0], sizes = [8, 8], strides = [1, 1]} : vector<8x64xf32> to vector<8x8xf32>
    %15 = vector.extract_strided_slice %12 {offsets = [0, 0], sizes = [4, 8], strides = [1, 1]} : vector<8x8xf32> to vector<4x8xf32>
    %16 = vector.extract_strided_slice %12 {offsets = [4, 0], sizes = [4, 8], strides = [1, 1]} : vector<8x8xf32> to vector<4x8xf32>
    %17 = vector.extract_strided_slice %13 {offsets = [0, 0], sizes = [4, 8], strides = [1, 1]} : vector<8x8xf32> to vector<4x8xf32>
    %18 = vector.extract_strided_slice %13 {offsets = [4, 0], sizes = [4, 8], strides = [1, 1]} : vector<8x8xf32> to vector<4x8xf32>
    %cst_16 = arith.constant 0.000000e+00 : f32
    %19 = vector.broadcast %cst_16 : f32 to vector<4x8xf32>
    %20 = arith.subf %19, %16 : vector<4x8xf32>
    %21 = tpu.concatenate %15, %20 in 1 : vector<4x8xf32>, vector<4x8xf32> -> vector<4x16xf32>
    %22 = tpu.concatenate %16, %15 in 1 : vector<4x8xf32>, vector<4x8xf32> -> vector<4x16xf32>
    %23 = tpu.concatenate %21, %22 in 0 : vector<4x16xf32>, vector<4x16xf32> -> vector<8x16xf32>
    %24 = tpu.concatenate %17, %18 in 1 : vector<4x8xf32>, vector<4x8xf32> -> vector<4x16xf32>
    %cst_17 = arith.constant dense<0.000000e+00> : vector<8x4xf32>
    %25 = tpu.matmul %23, %24, %cst_17 {dimension_numbers = #tpu.dot_dimension_numbers<[1], [1], [0], [0], [0, 0, 1, 0], [], []>} : vector<8x16xf32>, vector<4x16xf32>, vector<8x4xf32> -> vector<8x4xf32>
    %26 = vector.extract_strided_slice %25 {offsets = [0, 0], sizes = [4, 4], strides = [1, 1]} : vector<8x4xf32> to vector<4x4xf32>
    %27 = vector.extract_strided_slice %25 {offsets = [4, 0], sizes = [4, 4], strides = [1, 1]} : vector<8x4xf32> to vector<4x4xf32>
    %cst_18 = arith.constant 2.000000e+00 : f32
    %28 = vector.broadcast %cst_18 : f32 to vector<4x4xf32>
    %29 = arith.mulf %28, %26 : vector<4x4xf32>
    %cst_19 = arith.constant -5.000000e+01 : f32
    %cst_20 = arith.constant 5.000000e+01 : f32
    %30 = vector.broadcast %cst_19 : f32 to vector<4x4xf32>
    %31 = arith.maximumf %30, %29 : vector<4x4xf32>
    %32 = vector.broadcast %cst_20 : f32 to vector<4x4xf32>
    %33 = arith.minimumf %32, %31 : vector<4x4xf32>
    %cst_21 = arith.constant 2.000000e+00 : f32
    %34 = vector.broadcast %cst_21 : f32 to vector<4x4xf32>
    %35 = arith.mulf %34, %27 : vector<4x4xf32>
    %cst_22 = arith.constant 0.318309873 : f32
    %36 = vector.broadcast %cst_22 : f32 to vector<4x4xf32>
    %37 = arith.mulf %35, %36 : vector<4x4xf32>
    %cst_23 = arith.constant 5.000000e-01 : f32
    %38 = vector.broadcast %cst_23 : f32 to vector<4x4xf32>
    %39 = arith.addf %37, %38 : vector<4x4xf32>
    %40 = math.floor %39 : vector<4x4xf32>
    %cst_24 = arith.constant 3.140625 : f32
    %41 = vector.broadcast %cst_24 : f32 to vector<4x4xf32>
    %42 = arith.mulf %40, %41 : vector<4x4xf32>
    %43 = arith.subf %35, %42 : vector<4x4xf32>
    %cst_25 = arith.constant 9.67653584E-4 : f32
    %44 = vector.broadcast %cst_25 : f32 to vector<4x4xf32>
    %45 = arith.mulf %40, %44 : vector<4x4xf32>
    %46 = arith.subf %43, %45 : vector<4x4xf32>
    %cst_26 = arith.constant 5.000000e-01 : f32
    %47 = vector.broadcast %cst_26 : f32 to vector<4x4xf32>
    %48 = arith.mulf %40, %47 : vector<4x4xf32>
    %49 = math.floor %48 : vector<4x4xf32>
    %cst_27 = arith.constant 2.000000e+00 : f32
    %50 = vector.broadcast %cst_27 : f32 to vector<4x4xf32>
    %51 = arith.mulf %50, %49 : vector<4x4xf32>
    %52 = arith.subf %40, %51 : vector<4x4xf32>
    %cst_28 = arith.constant 2.000000e+00 : f32
    %53 = vector.broadcast %cst_28 : f32 to vector<4x4xf32>
    %54 = arith.mulf %53, %52 : vector<4x4xf32>
    %cst_29 = arith.constant 1.000000e+00 : f32
    %55 = vector.broadcast %cst_29 : f32 to vector<4x4xf32>
    %56 = arith.subf %55, %54 : vector<4x4xf32>
    %57 = arith.mulf %46, %46 : vector<4x4xf32>
    %cst_30 = arith.constant -2.50521079E-8 : f32
    %58 = vector.broadcast %cst_30 : f32 to vector<4x4xf32>
    %59 = arith.mulf %57, %58 : vector<4x4xf32>
    %cst_31 = arith.constant 2.75573188E-6 : f32
    %60 = vector.broadcast %cst_31 : f32 to vector<4x4xf32>
    %61 = arith.addf %60, %59 : vector<4x4xf32>
    %62 = arith.mulf %57, %61 : vector<4x4xf32>
    %cst_32 = arith.constant -1.98412701E-4 : f32
    %63 = vector.broadcast %cst_32 : f32 to vector<4x4xf32>
    %64 = arith.addf %63, %62 : vector<4x4xf32>
    %65 = arith.mulf %57, %64 : vector<4x4xf32>
    %cst_33 = arith.constant 0.00833333377 : f32
    %66 = vector.broadcast %cst_33 : f32 to vector<4x4xf32>
    %67 = arith.addf %66, %65 : vector<4x4xf32>
    %68 = arith.mulf %57, %67 : vector<4x4xf32>
    %cst_34 = arith.constant -0.166666672 : f32
    %69 = vector.broadcast %cst_34 : f32 to vector<4x4xf32>
    %70 = arith.addf %69, %68 : vector<4x4xf32>
    %71 = arith.mulf %57, %70 : vector<4x4xf32>
    %cst_35 = arith.constant 1.000000e+00 : f32
    %72 = vector.broadcast %cst_35 : f32 to vector<4x4xf32>
    %73 = arith.addf %72, %71 : vector<4x4xf32>
    %74 = arith.mulf %46, %73 : vector<4x4xf32>
    %cst_36 = arith.constant 2.08767559E-9 : f32
    %75 = vector.broadcast %cst_36 : f32 to vector<4x4xf32>
    %76 = arith.mulf %57, %75 : vector<4x4xf32>
    %cst_37 = arith.constant -2.755732E-7 : f32
    %77 = vector.broadcast %cst_37 : f32 to vector<4x4xf32>
    %78 = arith.addf %77, %76 : vector<4x4xf32>
    %79 = arith.mulf %57, %78 : vector<4x4xf32>
    %cst_38 = arith.constant 2.48015876E-5 : f32
    %80 = vector.broadcast %cst_38 : f32 to vector<4x4xf32>
    %81 = arith.addf %80, %79 : vector<4x4xf32>
    %82 = arith.mulf %57, %81 : vector<4x4xf32>
    %cst_39 = arith.constant -0.00138888892 : f32
    %83 = vector.broadcast %cst_39 : f32 to vector<4x4xf32>
    %84 = arith.addf %83, %82 : vector<4x4xf32>
    %85 = arith.mulf %57, %84 : vector<4x4xf32>
    %cst_40 = arith.constant 0.0416666679 : f32
    %86 = vector.broadcast %cst_40 : f32 to vector<4x4xf32>
    %87 = arith.addf %86, %85 : vector<4x4xf32>
    %88 = arith.mulf %57, %87 : vector<4x4xf32>
    %cst_41 = arith.constant -5.000000e-01 : f32
    %89 = vector.broadcast %cst_41 : f32 to vector<4x4xf32>
    %90 = arith.addf %89, %88 : vector<4x4xf32>
    %91 = arith.mulf %57, %90 : vector<4x4xf32>
    %cst_42 = arith.constant 1.000000e+00 : f32
    %92 = vector.broadcast %cst_42 : f32 to vector<4x4xf32>
    %93 = arith.addf %92, %91 : vector<4x4xf32>
    %94 = arith.mulf %56, %74 : vector<4x4xf32>
    %95 = arith.mulf %56, %93 : vector<4x4xf32>
    %96 = math.exp %33 : vector<4x4xf32>
    %cst_43 = arith.constant 0.000000e+00 : f32
    %97 = vector.broadcast %cst_43 : f32 to vector<4x4xf32>
    %98 = arith.subf %97, %33 : vector<4x4xf32>
    %99 = math.exp %98 : vector<4x4xf32>
    %100 = arith.addf %96, %99 : vector<4x4xf32>
    %cst_44 = arith.constant 2.000000e+00 : f32
    %101 = vector.broadcast %cst_44 : f32 to vector<4x4xf32>
    %102 = arith.mulf %101, %95 : vector<4x4xf32>
    %103 = arith.addf %100, %102 : vector<4x4xf32>
    %104 = tpu.reciprocal %103 {approx = true} : vector<4x4xf32> -> vector<4x4xf32>
    %105 = arith.subf %96, %99 : vector<4x4xf32>
    %106 = arith.mulf %105, %104 : vector<4x4xf32>
    %cst_45 = arith.constant 2.000000e+00 : f32
    %107 = vector.broadcast %cst_45 : f32 to vector<4x4xf32>
    %108 = arith.mulf %107, %94 : vector<4x4xf32>
    %109 = arith.mulf %108, %104 : vector<4x4xf32>
    %cst_46 = arith.constant 0.000000e+00 : f32
    %110 = vector.broadcast %cst_46 : f32 to vector<4x4xf32>
    %111 = arith.subf %110, %109 : vector<4x4xf32>
    %112 = tpu.concatenate %106, %111 in 1 : vector<4x4xf32>, vector<4x4xf32> -> vector<4x8xf32>
    %113 = tpu.concatenate %109, %106 in 1 : vector<4x4xf32>, vector<4x4xf32> -> vector<4x8xf32>
    %114 = tpu.concatenate %112, %113 in 0 : vector<4x8xf32>, vector<4x8xf32> -> vector<8x8xf32>
    %cst_47 = arith.constant dense<0.000000e+00> : vector<8x8xf32>
    %115 = tpu.matmul %114, %14, %cst_47 {dimension_numbers = #tpu.dot_dimension_numbers<[1], [0], [0], [1], [0, 0, 1, 1], [], []>} : vector<8x8xf32>, vector<8x8xf32>, vector<8x8xf32> -> vector<8x8xf32>
    %116 = vector.extract_strided_slice %115 {offsets = [0, 0], sizes = [4, 8], strides = [1, 1]} : vector<8x8xf32> to vector<4x8xf32>
    %117 = vector.extract_strided_slice %115 {offsets = [4, 0], sizes = [4, 8], strides = [1, 1]} : vector<8x8xf32> to vector<4x8xf32>
    %cst_48 = arith.constant 0.000000e+00 : f32
    %118 = vector.broadcast %cst_48 : f32 to vector<4x16xf32>
    %119 = vector.extract_strided_slice %116 {offsets = [0, 0], sizes = [4, 1], strides = [1, 1]} : vector<4x8xf32> to vector<4x1xf32>
    %c0_49 = arith.constant 0 : index
    %c0_50 = arith.constant 0 : index
    %c0_51 = arith.constant 0 : index
    %c0_52 = arith.constant 0 : index
    %120 = vector.load %arg8[%c0_49, %c0_50, %c0_51, %c0_52] : memref<4x8x4x16xf32, #tpu.memory_space<vmem>>, vector<1x1x4x16xf32>
    %121 = vector.shape_cast %120 : vector<1x1x4x16xf32> to vector<4x16xf32>
    %122 = vector.broadcast %119 : vector<4x1xf32> to vector<4x16xf32>
    %123 = arith.mulf %122, %121 : vector<4x16xf32>
    %124 = arith.addf %118, %123 : vector<4x16xf32>
    %125 = vector.extract_strided_slice %117 {offsets = [0, 0], sizes = [4, 1], strides = [1, 1]} : vector<4x8xf32> to vector<4x1xf32>
    %c0_53 = arith.constant 0 : index
    %c0_54 = arith.constant 0 : index
    %c0_55 = arith.constant 0 : index
    %c0_56 = arith.constant 0 : index
    %126 = vector.load %arg9[%c0_53, %c0_54, %c0_55, %c0_56] : memref<4x8x4x16xf32, #tpu.memory_space<vmem>>, vector<1x1x4x16xf32>
    %127 = vector.shape_cast %126 : vector<1x1x4x16xf32> to vector<4x16xf32>
    %128 = vector.broadcast %125 : vector<4x1xf32> to vector<4x16xf32>
    %129 = arith.mulf %128, %127 : vector<4x16xf32>
    %130 = arith.addf %124, %129 : vector<4x16xf32>
    %131 = vector.extract_strided_slice %116 {offsets = [0, 1], sizes = [4, 1], strides = [1, 1]} : vector<4x8xf32> to vector<4x1xf32>
    %c0_57 = arith.constant 0 : index
    %c1 = arith.constant 1 : index
    %c0_58 = arith.constant 0 : index
    %c0_59 = arith.constant 0 : index
    %132 = vector.load %arg8[%c0_57, %c1, %c0_58, %c0_59] : memref<4x8x4x16xf32, #tpu.memory_space<vmem>>, vector<1x1x4x16xf32>
    %133 = vector.shape_cast %132 : vector<1x1x4x16xf32> to vector<4x16xf32>
    %134 = vector.broadcast %131 : vector<4x1xf32> to vector<4x16xf32>
    %135 = arith.mulf %134, %133 : vector<4x16xf32>
    %136 = arith.addf %130, %135 : vector<4x16xf32>
    %137 = vector.extract_strided_slice %117 {offsets = [0, 1], sizes = [4, 1], strides = [1, 1]} : vector<4x8xf32> to vector<4x1xf32>
    %c0_60 = arith.constant 0 : index
    %c1_61 = arith.constant 1 : index
    %c0_62 = arith.constant 0 : index
    %c0_63 = arith.constant 0 : index
    %138 = vector.load %arg9[%c0_60, %c1_61, %c0_62, %c0_63] : memref<4x8x4x16xf32, #tpu.memory_space<vmem>>, vector<1x1x4x16xf32>
    %139 = vector.shape_cast %138 : vector<1x1x4x16xf32> to vector<4x16xf32>
    %140 = vector.broadcast %137 : vector<4x1xf32> to vector<4x16xf32>
    %141 = arith.mulf %140, %139 : vector<4x16xf32>
    %142 = arith.addf %136, %141 : vector<4x16xf32>
    %143 = vector.extract_strided_slice %116 {offsets = [0, 2], sizes = [4, 1], strides = [1, 1]} : vector<4x8xf32> to vector<4x1xf32>
    %c0_64 = arith.constant 0 : index
    %c2 = arith.constant 2 : index
    %c0_65 = arith.constant 0 : index
    %c0_66 = arith.constant 0 : index
    %144 = vector.load %arg8[%c0_64, %c2, %c0_65, %c0_66] : memref<4x8x4x16xf32, #tpu.memory_space<vmem>>, vector<1x1x4x16xf32>
    %145 = vector.shape_cast %144 : vector<1x1x4x16xf32> to vector<4x16xf32>
    %146 = vector.broadcast %143 : vector<4x1xf32> to vector<4x16xf32>
    %147 = arith.mulf %146, %145 : vector<4x16xf32>
    %148 = arith.addf %142, %147 : vector<4x16xf32>
    %149 = vector.extract_strided_slice %117 {offsets = [0, 2], sizes = [4, 1], strides = [1, 1]} : vector<4x8xf32> to vector<4x1xf32>
    %c0_67 = arith.constant 0 : index
    %c2_68 = arith.constant 2 : index
    %c0_69 = arith.constant 0 : index
    %c0_70 = arith.constant 0 : index
    %150 = vector.load %arg9[%c0_67, %c2_68, %c0_69, %c0_70] : memref<4x8x4x16xf32, #tpu.memory_space<vmem>>, vector<1x1x4x16xf32>
    %151 = vector.shape_cast %150 : vector<1x1x4x16xf32> to vector<4x16xf32>
    %152 = vector.broadcast %149 : vector<4x1xf32> to vector<4x16xf32>
    %153 = arith.mulf %152, %151 : vector<4x16xf32>
    %154 = arith.addf %148, %153 : vector<4x16xf32>
    %155 = vector.extract_strided_slice %116 {offsets = [0, 3], sizes = [4, 1], strides = [1, 1]} : vector<4x8xf32> to vector<4x1xf32>
    %c0_71 = arith.constant 0 : index
    %c3 = arith.constant 3 : index
    %c0_72 = arith.constant 0 : index
    %c0_73 = arith.constant 0 : index
    %156 = vector.load %arg8[%c0_71, %c3, %c0_72, %c0_73] : memref<4x8x4x16xf32, #tpu.memory_space<vmem>>, vector<1x1x4x16xf32>
    %157 = vector.shape_cast %156 : vector<1x1x4x16xf32> to vector<4x16xf32>
    %158 = vector.broadcast %155 : vector<4x1xf32> to vector<4x16xf32>
    %159 = arith.mulf %158, %157 : vector<4x16xf32>
    %160 = arith.addf %154, %159 : vector<4x16xf32>
    %161 = vector.extract_strided_slice %117 {offsets = [0, 3], sizes = [4, 1], strides = [1, 1]} : vector<4x8xf32> to vector<4x1xf32>
    %c0_74 = arith.constant 0 : index
    %c3_75 = arith.constant 3 : index
    %c0_76 = arith.constant 0 : index
    %c0_77 = arith.constant 0 : index
    %162 = vector.load %arg9[%c0_74, %c3_75, %c0_76, %c0_77] : memref<4x8x4x16xf32, #tpu.memory_space<vmem>>, vector<1x1x4x16xf32>
    %163 = vector.shape_cast %162 : vector<1x1x4x16xf32> to vector<4x16xf32>
    %164 = vector.broadcast %161 : vector<4x1xf32> to vector<4x16xf32>
    %165 = arith.mulf %164, %163 : vector<4x16xf32>
    %166 = arith.addf %160, %165 : vector<4x16xf32>
    %167 = vector.extract_strided_slice %116 {offsets = [0, 4], sizes = [4, 1], strides = [1, 1]} : vector<4x8xf32> to vector<4x1xf32>
    %c0_78 = arith.constant 0 : index
    %c4 = arith.constant 4 : index
    %c0_79 = arith.constant 0 : index
    %c0_80 = arith.constant 0 : index
    %168 = vector.load %arg8[%c0_78, %c4, %c0_79, %c0_80] : memref<4x8x4x16xf32, #tpu.memory_space<vmem>>, vector<1x1x4x16xf32>
    %169 = vector.shape_cast %168 : vector<1x1x4x16xf32> to vector<4x16xf32>
    %170 = vector.broadcast %167 : vector<4x1xf32> to vector<4x16xf32>
    %171 = arith.mulf %170, %169 : vector<4x16xf32>
    %172 = arith.addf %166, %171 : vector<4x16xf32>
    %173 = vector.extract_strided_slice %117 {offsets = [0, 4], sizes = [4, 1], strides = [1, 1]} : vector<4x8xf32> to vector<4x1xf32>
    %c0_81 = arith.constant 0 : index
    %c4_82 = arith.constant 4 : index
    %c0_83 = arith.constant 0 : index
    %c0_84 = arith.constant 0 : index
    %174 = vector.load %arg9[%c0_81, %c4_82, %c0_83, %c0_84] : memref<4x8x4x16xf32, #tpu.memory_space<vmem>>, vector<1x1x4x16xf32>
    %175 = vector.shape_cast %174 : vector<1x1x4x16xf32> to vector<4x16xf32>
    %176 = vector.broadcast %173 : vector<4x1xf32> to vector<4x16xf32>
    %177 = arith.mulf %176, %175 : vector<4x16xf32>
    %178 = arith.addf %172, %177 : vector<4x16xf32>
    %179 = vector.extract_strided_slice %116 {offsets = [0, 5], sizes = [4, 1], strides = [1, 1]} : vector<4x8xf32> to vector<4x1xf32>
    %c0_85 = arith.constant 0 : index
    %c5 = arith.constant 5 : index
    %c0_86 = arith.constant 0 : index
    %c0_87 = arith.constant 0 : index
    %180 = vector.load %arg8[%c0_85, %c5, %c0_86, %c0_87] : memref<4x8x4x16xf32, #tpu.memory_space<vmem>>, vector<1x1x4x16xf32>
    %181 = vector.shape_cast %180 : vector<1x1x4x16xf32> to vector<4x16xf32>
    %182 = vector.broadcast %179 : vector<4x1xf32> to vector<4x16xf32>
    %183 = arith.mulf %182, %181 : vector<4x16xf32>
    %184 = arith.addf %178, %183 : vector<4x16xf32>
    %185 = vector.extract_strided_slice %117 {offsets = [0, 5], sizes = [4, 1], strides = [1, 1]} : vector<4x8xf32> to vector<4x1xf32>
    %c0_88 = arith.constant 0 : index
    %c5_89 = arith.constant 5 : index
    %c0_90 = arith.constant 0 : index
    %c0_91 = arith.constant 0 : index
    %186 = vector.load %arg9[%c0_88, %c5_89, %c0_90, %c0_91] : memref<4x8x4x16xf32, #tpu.memory_space<vmem>>, vector<1x1x4x16xf32>
    %187 = vector.shape_cast %186 : vector<1x1x4x16xf32> to vector<4x16xf32>
    %188 = vector.broadcast %185 : vector<4x1xf32> to vector<4x16xf32>
    %189 = arith.mulf %188, %187 : vector<4x16xf32>
    %190 = arith.addf %184, %189 : vector<4x16xf32>
    %191 = vector.extract_strided_slice %116 {offsets = [0, 6], sizes = [4, 1], strides = [1, 1]} : vector<4x8xf32> to vector<4x1xf32>
    %c0_92 = arith.constant 0 : index
    %c6 = arith.constant 6 : index
    %c0_93 = arith.constant 0 : index
    %c0_94 = arith.constant 0 : index
    %192 = vector.load %arg8[%c0_92, %c6, %c0_93, %c0_94] : memref<4x8x4x16xf32, #tpu.memory_space<vmem>>, vector<1x1x4x16xf32>
    %193 = vector.shape_cast %192 : vector<1x1x4x16xf32> to vector<4x16xf32>
    %194 = vector.broadcast %191 : vector<4x1xf32> to vector<4x16xf32>
    %195 = arith.mulf %194, %193 : vector<4x16xf32>
    %196 = arith.addf %190, %195 : vector<4x16xf32>
    %197 = vector.extract_strided_slice %117 {offsets = [0, 6], sizes = [4, 1], strides = [1, 1]} : vector<4x8xf32> to vector<4x1xf32>
    %c0_95 = arith.constant 0 : index
    %c6_96 = arith.constant 6 : index
    %c0_97 = arith.constant 0 : index
    %c0_98 = arith.constant 0 : index
    %198 = vector.load %arg9[%c0_95, %c6_96, %c0_97, %c0_98] : memref<4x8x4x16xf32, #tpu.memory_space<vmem>>, vector<1x1x4x16xf32>
    %199 = vector.shape_cast %198 : vector<1x1x4x16xf32> to vector<4x16xf32>
    %200 = vector.broadcast %197 : vector<4x1xf32> to vector<4x16xf32>
    %201 = arith.mulf %200, %199 : vector<4x16xf32>
    %202 = arith.addf %196, %201 : vector<4x16xf32>
    %203 = vector.extract_strided_slice %116 {offsets = [0, 7], sizes = [4, 1], strides = [1, 1]} : vector<4x8xf32> to vector<4x1xf32>
    %c0_99 = arith.constant 0 : index
    %c7 = arith.constant 7 : index
    %c0_100 = arith.constant 0 : index
    %c0_101 = arith.constant 0 : index
    %204 = vector.load %arg8[%c0_99, %c7, %c0_100, %c0_101] : memref<4x8x4x16xf32, #tpu.memory_space<vmem>>, vector<1x1x4x16xf32>
    %205 = vector.shape_cast %204 : vector<1x1x4x16xf32> to vector<4x16xf32>
    %206 = vector.broadcast %203 : vector<4x1xf32> to vector<4x16xf32>
    %207 = arith.mulf %206, %205 : vector<4x16xf32>
    %208 = arith.addf %202, %207 : vector<4x16xf32>
    %209 = vector.extract_strided_slice %117 {offsets = [0, 7], sizes = [4, 1], strides = [1, 1]} : vector<4x8xf32> to vector<4x1xf32>
    %c0_102 = arith.constant 0 : index
    %c7_103 = arith.constant 7 : index
    %c0_104 = arith.constant 0 : index
    %c0_105 = arith.constant 0 : index
    %210 = vector.load %arg9[%c0_102, %c7_103, %c0_104, %c0_105] : memref<4x8x4x16xf32, #tpu.memory_space<vmem>>, vector<1x1x4x16xf32>
    %211 = vector.shape_cast %210 : vector<1x1x4x16xf32> to vector<4x16xf32>
    %212 = vector.broadcast %209 : vector<4x1xf32> to vector<4x16xf32>
    %213 = arith.mulf %212, %211 : vector<4x16xf32>
    %214 = arith.addf %208, %213 : vector<4x16xf32>
    %215 = vector.extract_strided_slice %214 {offsets = [0, 0], sizes = [4, 8], strides = [1, 1]} : vector<4x16xf32> to vector<4x8xf32>
    %216 = vector.extract_strided_slice %214 {offsets = [0, 8], sizes = [4, 8], strides = [1, 1]} : vector<4x16xf32> to vector<4x8xf32>
    %217 = tpu.concatenate %215, %216 in 0 : vector<4x8xf32>, vector<4x8xf32> -> vector<8x8xf32>
    %c0_106 = arith.constant 0 : index
    %c0_107 = arith.constant 0 : index
    %218 = vector.load %arg11[%c0_106, %c0_107] : memref<8x64xf32, #tpu.memory_space<vmem>>, vector<8x8xf32>
    tpu.vector_store %arg11[%c0_106, %c0_107], %217 {strides = array<i32>} : memref<8x64xf32, #tpu.memory_space<vmem>>, vector<8x8xf32>,
    %219 = vector.extract_strided_slice %3 {offsets = [0, 8], sizes = [8, 8], strides = [1, 1]} : vector<8x64xf32> to vector<8x8xf32>
    %220 = vector.extract_strided_slice %7 {offsets = [0, 8], sizes = [8, 8], strides = [1, 1]} : vector<8x64xf32> to vector<8x8xf32>
    %221 = vector.extract_strided_slice %11 {offsets = [0, 8], sizes = [8, 8], strides = [1, 1]} : vector<8x64xf32> to vector<8x8xf32>
    %222 = vector.extract_strided_slice %219 {offsets = [0, 0], sizes = [4, 8], strides = [1, 1]} : vector<8x8xf32> to vector<4x8xf32>
    %223 = vector.extract_strided_slice %219 {offsets = [4, 0], sizes = [4, 8], strides = [1, 1]} : vector<8x8xf32> to vector<4x8xf32>
    %224 = vector.extract_strided_slice %220 {offsets = [0, 0], sizes = [4, 8], strides = [1, 1]} : vector<8x8xf32> to vector<4x8xf32>
    %225 = vector.extract_strided_slice %220 {offsets = [4, 0], sizes = [4, 8], strides = [1, 1]} : vector<8x8xf32> to vector<4x8xf32>
    %cst_108 = arith.constant 0.000000e+00 : f32
    %226 = vector.broadcast %cst_108 : f32 to vector<4x8xf32>
    %227 = arith.subf %226, %223 : vector<4x8xf32>
    %228 = tpu.concatenate %222, %227 in 1 : vector<4x8xf32>, vector<4x8xf32> -> vector<4x16xf32>
    %229 = tpu.concatenate %223, %222 in 1 : vector<4x8xf32>, vector<4x8xf32> -> vector<4x16xf32>
    %230 = tpu.concatenate %228, %229 in 0 : vector<4x16xf32>, vector<4x16xf32> -> vector<8x16xf32>
    %231 = tpu.concatenate %224, %225 in 1 : vector<4x8xf32>, vector<4x8xf32> -> vector<4x16xf32>
    %cst_109 = arith.constant dense<0.000000e+00> : vector<8x4xf32>
    %232 = tpu.matmul %230, %231, %cst_109 {dimension_numbers = #tpu.dot_dimension_numbers<[1], [1], [0], [0], [0, 0, 1, 0], [], []>} : vector<8x16xf32>, vector<4x16xf32>, vector<8x4xf32> -> vector<8x4xf32>
    %233 = vector.extract_strided_slice %232 {offsets = [0, 0], sizes = [4, 4], strides = [1, 1]} : vector<8x4xf32> to vector<4x4xf32>
    %234 = vector.extract_strided_slice %232 {offsets = [4, 0], sizes = [4, 4], strides = [1, 1]} : vector<8x4xf32> to vector<4x4xf32>
    %cst_110 = arith.constant 2.000000e+00 : f32
    %235 = vector.broadcast %cst_110 : f32 to vector<4x4xf32>
    %236 = arith.mulf %235, %233 : vector<4x4xf32>
    %cst_111 = arith.constant -5.000000e+01 : f32
    %cst_112 = arith.constant 5.000000e+01 : f32
    %237 = vector.broadcast %cst_111 : f32 to vector<4x4xf32>
    %238 = arith.maximumf %237, %236 : vector<4x4xf32>
    %239 = vector.broadcast %cst_112 : f32 to vector<4x4xf32>
    %240 = arith.minimumf %239, %238 : vector<4x4xf32>
    %cst_113 = arith.constant 2.000000e+00 : f32
    %241 = vector.broadcast %cst_113 : f32 to vector<4x4xf32>
    %242 = arith.mulf %241, %234 : vector<4x4xf32>
    %cst_114 = arith.constant 0.318309873 : f32
    %243 = vector.broadcast %cst_114 : f32 to vector<4x4xf32>
    %244 = arith.mulf %242, %243 : vector<4x4xf32>
    %cst_115 = arith.constant 5.000000e-01 : f32
    %245 = vector.broadcast %cst_115 : f32 to vector<4x4xf32>
    %246 = arith.addf %244, %245 : vector<4x4xf32>
    %247 = math.floor %246 : vector<4x4xf32>
    %cst_116 = arith.constant 3.140625 : f32
    %248 = vector.broadcast %cst_116 : f32 to vector<4x4xf32>
    %249 = arith.mulf %247, %248 : vector<4x4xf32>
    %250 = arith.subf %242, %249 : vector<4x4xf32>
    %cst_117 = arith.constant 9.67653584E-4 : f32
    %251 = vector.broadcast %cst_117 : f32 to vector<4x4xf32>
    %252 = arith.mulf %247, %251 : vector<4x4xf32>
    %253 = arith.subf %250, %252 : vector<4x4xf32>
    %cst_118 = arith.constant 5.000000e-01 : f32
    %254 = vector.broadcast %cst_118 : f32 to vector<4x4xf32>
    %255 = arith.mulf %247, %254 : vector<4x4xf32>
    %256 = math.floor %255 : vector<4x4xf32>
    %cst_119 = arith.constant 2.000000e+00 : f32
    %257 = vector.broadcast %cst_119 : f32 to vector<4x4xf32>
    %258 = arith.mulf %257, %256 : vector<4x4xf32>
    %259 = arith.subf %247, %258 : vector<4x4xf32>
    %cst_120 = arith.constant 2.000000e+00 : f32
    %260 = vector.broadcast %cst_120 : f32 to vector<4x4xf32>
    %261 = arith.mulf %260, %259 : vector<4x4xf32>
    %cst_121 = arith.constant 1.000000e+00 : f32
    %262 = vector.broadcast %cst_121 : f32 to vector<4x4xf32>
    %263 = arith.subf %262, %261 : vector<4x4xf32>
    %264 = arith.mulf %253, %253 : vector<4x4xf32>
    %cst_122 = arith.constant -2.50521079E-8 : f32
    %265 = vector.broadcast %cst_122 : f32 to vector<4x4xf32>
    %266 = arith.mulf %264, %265 : vector<4x4xf32>
    %cst_123 = arith.constant 2.75573188E-6 : f32
    %267 = vector.broadcast %cst_123 : f32 to vector<4x4xf32>
    %268 = arith.addf %267, %266 : vector<4x4xf32>
    %269 = arith.mulf %264, %268 : vector<4x4xf32>
    %cst_124 = arith.constant -1.98412701E-4 : f32
    %270 = vector.broadcast %cst_124 : f32 to vector<4x4xf32>
    %271 = arith.addf %270, %269 : vector<4x4xf32>
    %272 = arith.mulf %264, %271 : vector<4x4xf32>
    %cst_125 = arith.constant 0.00833333377 : f32
    %273 = vector.broadcast %cst_125 : f32 to vector<4x4xf32>
    %274 = arith.addf %273, %272 : vector<4x4xf32>
    %275 = arith.mulf %264, %274 : vector<4x4xf32>
    %cst_126 = arith.constant -0.166666672 : f32
    %276 = vector.broadcast %cst_126 : f32 to vector<4x4xf32>
    %277 = arith.addf %276, %275 : vector<4x4xf32>
    %278 = arith.mulf %264, %277 : vector<4x4xf32>
    %cst_127 = arith.constant 1.000000e+00 : f32
    %279 = vector.broadcast %cst_127 : f32 to vector<4x4xf32>
    %280 = arith.addf %279, %278 : vector<4x4xf32>
    %281 = arith.mulf %253, %280 : vector<4x4xf32>
    %cst_128 = arith.constant 2.08767559E-9 : f32
    %282 = vector.broadcast %cst_128 : f32 to vector<4x4xf32>
    %283 = arith.mulf %264, %282 : vector<4x4xf32>
    %cst_129 = arith.constant -2.755732E-7 : f32
    %284 = vector.broadcast %cst_129 : f32 to vector<4x4xf32>
    %285 = arith.addf %284, %283 : vector<4x4xf32>
    %286 = arith.mulf %264, %285 : vector<4x4xf32>
    %cst_130 = arith.constant 2.48015876E-5 : f32
    %287 = vector.broadcast %cst_130 : f32 to vector<4x4xf32>
    %288 = arith.addf %287, %286 : vector<4x4xf32>
    %289 = arith.mulf %264, %288 : vector<4x4xf32>
    %cst_131 = arith.constant -0.00138888892 : f32
    %290 = vector.broadcast %cst_131 : f32 to vector<4x4xf32>
    %291 = arith.addf %290, %289 : vector<4x4xf32>
    %292 = arith.mulf %264, %291 : vector<4x4xf32>
    %cst_132 = arith.constant 0.0416666679 : f32
    %293 = vector.broadcast %cst_132 : f32 to vector<4x4xf32>
    %294 = arith.addf %293, %292 : vector<4x4xf32>
    %295 = arith.mulf %264, %294 : vector<4x4xf32>
    %cst_133 = arith.constant -5.000000e-01 : f32
    %296 = vector.broadcast %cst_133 : f32 to vector<4x4xf32>
    %297 = arith.addf %296, %295 : vector<4x4xf32>
    %298 = arith.mulf %264, %297 : vector<4x4xf32>
    %cst_134 = arith.constant 1.000000e+00 : f32
    %299 = vector.broadcast %cst_134 : f32 to vector<4x4xf32>
    %300 = arith.addf %299, %298 : vector<4x4xf32>
    %301 = arith.mulf %263, %281 : vector<4x4xf32>
    %302 = arith.mulf %263, %300 : vector<4x4xf32>
    %303 = math.exp %240 : vector<4x4xf32>
    %cst_135 = arith.constant 0.000000e+00 : f32
    %304 = vector.broadcast %cst_135 : f32 to vector<4x4xf32>
    %305 = arith.subf %304, %240 : vector<4x4xf32>
    %306 = math.exp %305 : vector<4x4xf32>
    %307 = arith.addf %303, %306 : vector<4x4xf32>
    %cst_136 = arith.constant 2.000000e+00 : f32
    %308 = vector.broadcast %cst_136 : f32 to vector<4x4xf32>
    %309 = arith.mulf %308, %302 : vector<4x4xf32>
    %310 = arith.addf %307, %309 : vector<4x4xf32>
    %311 = tpu.reciprocal %310 {approx = true} : vector<4x4xf32> -> vector<4x4xf32>
    %312 = arith.subf %303, %306 : vector<4x4xf32>
    %313 = arith.mulf %312, %311 : vector<4x4xf32>
    %cst_137 = arith.constant 2.000000e+00 : f32
    %314 = vector.broadcast %cst_137 : f32 to vector<4x4xf32>
    %315 = arith.mulf %314, %301 : vector<4x4xf32>
    %316 = arith.mulf %315, %311 : vector<4x4xf32>
    %cst_138 = arith.constant 0.000000e+00 : f32
    %317 = vector.broadcast %cst_138 : f32 to vector<4x4xf32>
    %318 = arith.subf %317, %316 : vector<4x4xf32>
    %319 = tpu.concatenate %313, %318 in 1 : vector<4x4xf32>, vector<4x4xf32> -> vector<4x8xf32>
    %320 = tpu.concatenate %316, %313 in 1 : vector<4x4xf32>, vector<4x4xf32> -> vector<4x8xf32>
    %321 = tpu.concatenate %319, %320 in 0 : vector<4x8xf32>, vector<4x8xf32> -> vector<8x8xf32>
    %cst_139 = arith.constant dense<0.000000e+00> : vector<8x8xf32>
    %322 = tpu.matmul %321, %221, %cst_139 {dimension_numbers = #tpu.dot_dimension_numbers<[1], [0], [0], [1], [0, 0, 1, 1], [], []>} : vector<8x8xf32>, vector<8x8xf32>, vector<8x8xf32> -> vector<8x8xf32>
    %323 = vector.extract_strided_slice %322 {offsets = [0, 0], sizes = [4, 8], strides = [1, 1]} : vector<8x8xf32> to vector<4x8xf32>
    %324 = vector.extract_strided_slice %322 {offsets = [4, 0], sizes = [4, 8], strides = [1, 1]} : vector<8x8xf32> to vector<4x8xf32>
    %cst_140 = arith.constant 0.000000e+00 : f32
    %325 = vector.broadcast %cst_140 : f32 to vector<4x16xf32>
    %326 = vector.extract_strided_slice %323 {offsets = [0, 0], sizes = [4, 1], strides = [1, 1]} : vector<4x8xf32> to vector<4x1xf32>
    %c1_141 = arith.constant 1 : index
    %c0_142 = arith.constant 0 : index
    %c0_143 = arith.constant 0 : index
    %c0_144 = arith.constant 0 : index
    %327 = vector.load %arg8[%c1_141, %c0_142, %c0_143, %c0_144] : memref<4x8x4x16xf32, #tpu.memory_space<vmem>>, vector<1x1x4x16xf32>
    %328 = vector.shape_cast %327 : vector<1x1x4x16xf32> to vector<4x16xf32>
    %329 = vector.broadcast %326 : vector<4x1xf32> to vector<4x16xf32>
    %330 = arith.mulf %329, %328 : vector<4x16xf32>
    %331 = arith.addf %325, %330 : vector<4x16xf32>
    %332 = vector.extract_strided_slice %324 {offsets = [0, 0], sizes = [4, 1], strides = [1, 1]} : vector<4x8xf32> to vector<4x1xf32>
    %c1_145 = arith.constant 1 : index
    %c0_146 = arith.constant 0 : index
    %c0_147 = arith.constant 0 : index
    %c0_148 = arith.constant 0 : index
    %333 = vector.load %arg9[%c1_145, %c0_146, %c0_147, %c0_148] : memref<4x8x4x16xf32, #tpu.memory_space<vmem>>, vector<1x1x4x16xf32>
    %334 = vector.shape_cast %333 : vector<1x1x4x16xf32> to vector<4x16xf32>
    %335 = vector.broadcast %332 : vector<4x1xf32> to vector<4x16xf32>
    %336 = arith.mulf %335, %334 : vector<4x16xf32>
    %337 = arith.addf %331, %336 : vector<4x16xf32>
    %338 = vector.extract_strided_slice %323 {offsets = [0, 1], sizes = [4, 1], strides = [1, 1]} : vector<4x8xf32> to vector<4x1xf32>
    %c1_149 = arith.constant 1 : index
    %c1_150 = arith.constant 1 : index
    %c0_151 = arith.constant 0 : index
    %c0_152 = arith.constant 0 : index
    %339 = vector.load %arg8[%c1_149, %c1_150, %c0_151, %c0_152] : memref<4x8x4x16xf32, #tpu.memory_space<vmem>>, vector<1x1x4x16xf32>
    %340 = vector.shape_cast %339 : vector<1x1x4x16xf32> to vector<4x16xf32>
    %341 = vector.broadcast %338 : vector<4x1xf32> to vector<4x16xf32>
    %342 = arith.mulf %341, %340 : vector<4x16xf32>
    %343 = arith.addf %337, %342 : vector<4x16xf32>
    %344 = vector.extract_strided_slice %324 {offsets = [0, 1], sizes = [4, 1], strides = [1, 1]} : vector<4x8xf32> to vector<4x1xf32>
    %c1_153 = arith.constant 1 : index
    %c1_154 = arith.constant 1 : index
    %c0_155 = arith.constant 0 : index
    %c0_156 = arith.constant 0 : index
    %345 = vector.load %arg9[%c1_153, %c1_154, %c0_155, %c0_156] : memref<4x8x4x16xf32, #tpu.memory_space<vmem>>, vector<1x1x4x16xf32>
    %346 = vector.shape_cast %345 : vector<1x1x4x16xf32> to vector<4x16xf32>
    %347 = vector.broadcast %344 : vector<4x1xf32> to vector<4x16xf32>
    %348 = arith.mulf %347, %346 : vector<4x16xf32>
    %349 = arith.addf %343, %348 : vector<4x16xf32>
    %350 = vector.extract_strided_slice %323 {offsets = [0, 2], sizes = [4, 1], strides = [1, 1]} : vector<4x8xf32> to vector<4x1xf32>
    %c1_157 = arith.constant 1 : index
    %c2_158 = arith.constant 2 : index
    %c0_159 = arith.constant 0 : index
    %c0_160 = arith.constant 0 : index
    %351 = vector.load %arg8[%c1_157, %c2_158, %c0_159, %c0_160] : memref<4x8x4x16xf32, #tpu.memory_space<vmem>>, vector<1x1x4x16xf32>
    %352 = vector.shape_cast %351 : vector<1x1x4x16xf32> to vector<4x16xf32>
    %353 = vector.broadcast %350 : vector<4x1xf32> to vector<4x16xf32>
    %354 = arith.mulf %353, %352 : vector<4x16xf32>
    %355 = arith.addf %349, %354 : vector<4x16xf32>
    %356 = vector.extract_strided_slice %324 {offsets = [0, 2], sizes = [4, 1], strides = [1, 1]} : vector<4x8xf32> to vector<4x1xf32>
    %c1_161 = arith.constant 1 : index
    %c2_162 = arith.constant 2 : index
    %c0_163 = arith.constant 0 : index
    %c0_164 = arith.constant 0 : index
    %357 = vector.load %arg9[%c1_161, %c2_162, %c0_163, %c0_164] : memref<4x8x4x16xf32, #tpu.memory_space<vmem>>, vector<1x1x4x16xf32>
    %358 = vector.shape_cast %357 : vector<1x1x4x16xf32> to vector<4x16xf32>
    %359 = vector.broadcast %356 : vector<4x1xf32> to vector<4x16xf32>
    %360 = arith.mulf %359, %358 : vector<4x16xf32>
    %361 = arith.addf %355, %360 : vector<4x16xf32>
    %362 = vector.extract_strided_slice %323 {offsets = [0, 3], sizes = [4, 1], strides = [1, 1]} : vector<4x8xf32> to vector<4x1xf32>
    %c1_165 = arith.constant 1 : index
    %c3_166 = arith.constant 3 : index
    %c0_167 = arith.constant 0 : index
    %c0_168 = arith.constant 0 : index
    %363 = vector.load %arg8[%c1_165, %c3_166, %c0_167, %c0_168] : memref<4x8x4x16xf32, #tpu.memory_space<vmem>>, vector<1x1x4x16xf32>
    %364 = vector.shape_cast %363 : vector<1x1x4x16xf32> to vector<4x16xf32>
    %365 = vector.broadcast %362 : vector<4x1xf32> to vector<4x16xf32>
    %366 = arith.mulf %365, %364 : vector<4x16xf32>
    %367 = arith.addf %361, %366 : vector<4x16xf32>
    %368 = vector.extract_strided_slice %324 {offsets = [0, 3], sizes = [4, 1], strides = [1, 1]} : vector<4x8xf32> to vector<4x1xf32>
    %c1_169 = arith.constant 1 : index
    %c3_170 = arith.constant 3 : index
    %c0_171 = arith.constant 0 : index
    %c0_172 = arith.constant 0 : index
    %369 = vector.load %arg9[%c1_169, %c3_170, %c0_171, %c0_172] : memref<4x8x4x16xf32, #tpu.memory_space<vmem>>, vector<1x1x4x16xf32>
    %370 = vector.shape_cast %369 : vector<1x1x4x16xf32> to vector<4x16xf32>
    %371 = vector.broadcast %368 : vector<4x1xf32> to vector<4x16xf32>
    %372 = arith.mulf %371, %370 : vector<4x16xf32>
    %373 = arith.addf %367, %372 : vector<4x16xf32>
    %374 = vector.extract_strided_slice %323 {offsets = [0, 4], sizes = [4, 1], strides = [1, 1]} : vector<4x8xf32> to vector<4x1xf32>
    %c1_173 = arith.constant 1 : index
    %c4_174 = arith.constant 4 : index
    %c0_175 = arith.constant 0 : index
    %c0_176 = arith.constant 0 : index
    %375 = vector.load %arg8[%c1_173, %c4_174, %c0_175, %c0_176] : memref<4x8x4x16xf32, #tpu.memory_space<vmem>>, vector<1x1x4x16xf32>
    %376 = vector.shape_cast %375 : vector<1x1x4x16xf32> to vector<4x16xf32>
    %377 = vector.broadcast %374 : vector<4x1xf32> to vector<4x16xf32>
    %378 = arith.mulf %377, %376 : vector<4x16xf32>
    %379 = arith.addf %373, %378 : vector<4x16xf32>
    %380 = vector.extract_strided_slice %324 {offsets = [0, 4], sizes = [4, 1], strides = [1, 1]} : vector<4x8xf32> to vector<4x1xf32>
    %c1_177 = arith.constant 1 : index
    %c4_178 = arith.constant 4 : index
    %c0_179 = arith.constant 0 : index
    %c0_180 = arith.constant 0 : index
    %381 = vector.load %arg9[%c1_177, %c4_178, %c0_179, %c0_180] : memref<4x8x4x16xf32, #tpu.memory_space<vmem>>, vector<1x1x4x16xf32>
    %382 = vector.shape_cast %381 : vector<1x1x4x16xf32> to vector<4x16xf32>
    %383 = vector.broadcast %380 : vector<4x1xf32> to vector<4x16xf32>
    %384 = arith.mulf %383, %382 : vector<4x16xf32>
    %385 = arith.addf %379, %384 : vector<4x16xf32>
    %386 = vector.extract_strided_slice %323 {offsets = [0, 5], sizes = [4, 1], strides = [1, 1]} : vector<4x8xf32> to vector<4x1xf32>
    %c1_181 = arith.constant 1 : index
    %c5_182 = arith.constant 5 : index
    %c0_183 = arith.constant 0 : index
    %c0_184 = arith.constant 0 : index
    %387 = vector.load %arg8[%c1_181, %c5_182, %c0_183, %c0_184] : memref<4x8x4x16xf32, #tpu.memory_space<vmem>>, vector<1x1x4x16xf32>
    %388 = vector.shape_cast %387 : vector<1x1x4x16xf32> to vector<4x16xf32>
    %389 = vector.broadcast %386 : vector<4x1xf32> to vector<4x16xf32>
    %390 = arith.mulf %389, %388 : vector<4x16xf32>
    %391 = arith.addf %385, %390 : vector<4x16xf32>
    %392 = vector.extract_strided_slice %324 {offsets = [0, 5], sizes = [4, 1], strides = [1, 1]} : vector<4x8xf32> to vector<4x1xf32>
    %c1_185 = arith.constant 1 : index
    %c5_186 = arith.constant 5 : index
    %c0_187 = arith.constant 0 : index
    %c0_188 = arith.constant 0 : index
    %393 = vector.load %arg9[%c1_185, %c5_186, %c0_187, %c0_188] : memref<4x8x4x16xf32, #tpu.memory_space<vmem>>, vector<1x1x4x16xf32>
    %394 = vector.shape_cast %393 : vector<1x1x4x16xf32> to vector<4x16xf32>
    %395 = vector.broadcast %392 : vector<4x1xf32> to vector<4x16xf32>
    %396 = arith.mulf %395, %394 : vector<4x16xf32>
    %397 = arith.addf %391, %396 : vector<4x16xf32>
    %398 = vector.extract_strided_slice %323 {offsets = [0, 6], sizes = [4, 1], strides = [1, 1]} : vector<4x8xf32> to vector<4x1xf32>
    %c1_189 = arith.constant 1 : index
    %c6_190 = arith.constant 6 : index
    %c0_191 = arith.constant 0 : index
    %c0_192 = arith.constant 0 : index
    %399 = vector.load %arg8[%c1_189, %c6_190, %c0_191, %c0_192] : memref<4x8x4x16xf32, #tpu.memory_space<vmem>>, vector<1x1x4x16xf32>
    %400 = vector.shape_cast %399 : vector<1x1x4x16xf32> to vector<4x16xf32>
    %401 = vector.broadcast %398 : vector<4x1xf32> to vector<4x16xf32>
    %402 = arith.mulf %401, %400 : vector<4x16xf32>
    %403 = arith.addf %397, %402 : vector<4x16xf32>
    %404 = vector.extract_strided_slice %324 {offsets = [0, 6], sizes = [4, 1], strides = [1, 1]} : vector<4x8xf32> to vector<4x1xf32>
    %c1_193 = arith.constant 1 : index
    %c6_194 = arith.constant 6 : index
    %c0_195 = arith.constant 0 : index
    %c0_196 = arith.constant 0 : index
    %405 = vector.load %arg9[%c1_193, %c6_194, %c0_195, %c0_196] : memref<4x8x4x16xf32, #tpu.memory_space<vmem>>, vector<1x1x4x16xf32>
    %406 = vector.shape_cast %405 : vector<1x1x4x16xf32> to vector<4x16xf32>
    %407 = vector.broadcast %404 : vector<4x1xf32> to vector<4x16xf32>
    %408 = arith.mulf %407, %406 : vector<4x16xf32>
    %409 = arith.addf %403, %408 : vector<4x16xf32>
    %410 = vector.extract_strided_slice %323 {offsets = [0, 7], sizes = [4, 1], strides = [1, 1]} : vector<4x8xf32> to vector<4x1xf32>
    %c1_197 = arith.constant 1 : index
    %c7_198 = arith.constant 7 : index
    %c0_199 = arith.constant 0 : index
    %c0_200 = arith.constant 0 : index
    %411 = vector.load %arg8[%c1_197, %c7_198, %c0_199, %c0_200] : memref<4x8x4x16xf32, #tpu.memory_space<vmem>>, vector<1x1x4x16xf32>
    %412 = vector.shape_cast %411 : vector<1x1x4x16xf32> to vector<4x16xf32>
    %413 = vector.broadcast %410 : vector<4x1xf32> to vector<4x16xf32>
    %414 = arith.mulf %413, %412 : vector<4x16xf32>
    %415 = arith.addf %409, %414 : vector<4x16xf32>
    %416 = vector.extract_strided_slice %324 {offsets = [0, 7], sizes = [4, 1], strides = [1, 1]} : vector<4x8xf32> to vector<4x1xf32>
    %c1_201 = arith.constant 1 : index
    %c7_202 = arith.constant 7 : index
    %c0_203 = arith.constant 0 : index
    %c0_204 = arith.constant 0 : index
    %417 = vector.load %arg9[%c1_201, %c7_202, %c0_203, %c0_204] : memref<4x8x4x16xf32, #tpu.memory_space<vmem>>, vector<1x1x4x16xf32>
    %418 = vector.shape_cast %417 : vector<1x1x4x16xf32> to vector<4x16xf32>
    %419 = vector.broadcast %416 : vector<4x1xf32> to vector<4x16xf32>
    %420 = arith.mulf %419, %418 : vector<4x16xf32>
    %421 = arith.addf %415, %420 : vector<4x16xf32>
    %422 = vector.extract_strided_slice %421 {offsets = [0, 0], sizes = [4, 8], strides = [1, 1]} : vector<4x16xf32> to vector<4x8xf32>
    %423 = vector.extract_strided_slice %421 {offsets = [0, 8], sizes = [4, 8], strides = [1, 1]} : vector<4x16xf32> to vector<4x8xf32>
    %424 = tpu.concatenate %422, %423 in 0 : vector<4x8xf32>, vector<4x8xf32> -> vector<8x8xf32>
    %c0_205 = arith.constant 0 : index
    %c8 = arith.constant 8 : index
    %425 = vector.load %arg11[%c0_205, %c8] : memref<8x64xf32, #tpu.memory_space<vmem>>, vector<8x8xf32>
    tpu.vector_store %arg11[%c0_205, %c8], %424 {strides = array<i32>} : memref<8x64xf32, #tpu.memory_space<vmem>>, vector<8x8xf32>,
    %426 = vector.extract_strided_slice %3 {offsets = [0, 16], sizes = [8, 8], strides = [1, 1]} : vector<8x64xf32> to vector<8x8xf32>
    %427 = vector.extract_strided_slice %7 {offsets = [0, 16], sizes = [8, 8], strides = [1, 1]} : vector<8x64xf32> to vector<8x8xf32>
    %428 = vector.extract_strided_slice %11 {offsets = [0, 16], sizes = [8, 8], strides = [1, 1]} : vector<8x64xf32> to vector<8x8xf32>
    %429 = vector.extract_strided_slice %426 {offsets = [0, 0], sizes = [4, 8], strides = [1, 1]} : vector<8x8xf32> to vector<4x8xf32>
    %430 = vector.extract_strided_slice %426 {offsets = [4, 0], sizes = [4, 8], strides = [1, 1]} : vector<8x8xf32> to vector<4x8xf32>
    %431 = vector.extract_strided_slice %427 {offsets = [0, 0], sizes = [4, 8], strides = [1, 1]} : vector<8x8xf32> to vector<4x8xf32>
    %432 = vector.extract_strided_slice %427 {offsets = [4, 0], sizes = [4, 8], strides = [1, 1]} : vector<8x8xf32> to vector<4x8xf32>
    %cst_206 = arith.constant 0.000000e+00 : f32
    %433 = vector.broadcast %cst_206 : f32 to vector<4x8xf32>
    %434 = arith.subf %433, %430 : vector<4x8xf32>
    %435 = tpu.concatenate %429, %434 in 1 : vector<4x8xf32>, vector<4x8xf32> -> vector<4x16xf32>
    %436 = tpu.concatenate %430, %429 in 1 : vector<4x8xf32>, vector<4x8xf32> -> vector<4x16xf32>
    %437 = tpu.concatenate %435, %436 in 0 : vector<4x16xf32>, vector<4x16xf32> -> vector<8x16xf32>
    %438 = tpu.concatenate %431, %432 in 1 : vector<4x8xf32>, vector<4x8xf32> -> vector<4x16xf32>
    %cst_207 = arith.constant dense<0.000000e+00> : vector<8x4xf32>
    %439 = tpu.matmul %437, %438, %cst_207 {dimension_numbers = #tpu.dot_dimension_numbers<[1], [1], [0], [0], [0, 0, 1, 0], [], []>} : vector<8x16xf32>, vector<4x16xf32>, vector<8x4xf32> -> vector<8x4xf32>
    %440 = vector.extract_strided_slice %439 {offsets = [0, 0], sizes = [4, 4], strides = [1, 1]} : vector<8x4xf32> to vector<4x4xf32>
    %441 = vector.extract_strided_slice %439 {offsets = [4, 0], sizes = [4, 4], strides = [1, 1]} : vector<8x4xf32> to vector<4x4xf32>
    %cst_208 = arith.constant 2.000000e+00 : f32
    %442 = vector.broadcast %cst_208 : f32 to vector<4x4xf32>
    %443 = arith.mulf %442, %440 : vector<4x4xf32>
    %cst_209 = arith.constant -5.000000e+01 : f32
    %cst_210 = arith.constant 5.000000e+01 : f32
    %444 = vector.broadcast %cst_209 : f32 to vector<4x4xf32>
    %445 = arith.maximumf %444, %443 : vector<4x4xf32>
    %446 = vector.broadcast %cst_210 : f32 to vector<4x4xf32>
    %447 = arith.minimumf %446, %445 : vector<4x4xf32>
    %cst_211 = arith.constant 2.000000e+00 : f32
    %448 = vector.broadcast %cst_211 : f32 to vector<4x4xf32>
    %449 = arith.mulf %448, %441 : vector<4x4xf32>
    %cst_212 = arith.constant 0.318309873 : f32
    %450 = vector.broadcast %cst_212 : f32 to vector<4x4xf32>
    %451 = arith.mulf %449, %450 : vector<4x4xf32>
    %cst_213 = arith.constant 5.000000e-01 : f32
    %452 = vector.broadcast %cst_213 : f32 to vector<4x4xf32>
    %453 = arith.addf %451, %452 : vector<4x4xf32>
    %454 = math.floor %453 : vector<4x4xf32>
    %cst_214 = arith.constant 3.140625 : f32
    %455 = vector.broadcast %cst_214 : f32 to vector<4x4xf32>
    %456 = arith.mulf %454, %455 : vector<4x4xf32>
    %457 = arith.subf %449, %456 : vector<4x4xf32>
    %cst_215 = arith.constant 9.67653584E-4 : f32
    %458 = vector.broadcast %cst_215 : f32 to vector<4x4xf32>
    %459 = arith.mulf %454, %458 : vector<4x4xf32>
    %460 = arith.subf %457, %459 : vector<4x4xf32>
    %cst_216 = arith.constant 5.000000e-01 : f32
    %461 = vector.broadcast %cst_216 : f32 to vector<4x4xf32>
    %462 = arith.mulf %454, %461 : vector<4x4xf32>
    %463 = math.floor %462 : vector<4x4xf32>
    %cst_217 = arith.constant 2.000000e+00 : f32
    %464 = vector.broadcast %cst_217 : f32 to vector<4x4xf32>
    %465 = arith.mulf %464, %463 : vector<4x4xf32>
    %466 = arith.subf %454, %465 : vector<4x4xf32>
    %cst_218 = arith.constant 2.000000e+00 : f32
    %467 = vector.broadcast %cst_218 : f32 to vector<4x4xf32>
    %468 = arith.mulf %467, %466 : vector<4x4xf32>
    %cst_219 = arith.constant 1.000000e+00 : f32
    %469 = vector.broadcast %cst_219 : f32 to vector<4x4xf32>
    %470 = arith.subf %469, %468 : vector<4x4xf32>
    %471 = arith.mulf %460, %460 : vector<4x4xf32>
    %cst_220 = arith.constant -2.50521079E-8 : f32
    %472 = vector.broadcast %cst_220 : f32 to vector<4x4xf32>
    %473 = arith.mulf %471, %472 : vector<4x4xf32>
    %cst_221 = arith.constant 2.75573188E-6 : f32
    %474 = vector.broadcast %cst_221 : f32 to vector<4x4xf32>
    %475 = arith.addf %474, %473 : vector<4x4xf32>
    %476 = arith.mulf %471, %475 : vector<4x4xf32>
    %cst_222 = arith.constant -1.98412701E-4 : f32
    %477 = vector.broadcast %cst_222 : f32 to vector<4x4xf32>
    %478 = arith.addf %477, %476 : vector<4x4xf32>
    %479 = arith.mulf %471, %478 : vector<4x4xf32>
    %cst_223 = arith.constant 0.00833333377 : f32
    %480 = vector.broadcast %cst_223 : f32 to vector<4x4xf32>
    %481 = arith.addf %480, %479 : vector<4x4xf32>
    %482 = arith.mulf %471, %481 : vector<4x4xf32>
    %cst_224 = arith.constant -0.166666672 : f32
    %483 = vector.broadcast %cst_224 : f32 to vector<4x4xf32>
    %484 = arith.addf %483, %482 : vector<4x4xf32>
    %485 = arith.mulf %471, %484 : vector<4x4xf32>
    %cst_225 = arith.constant 1.000000e+00 : f32
    %486 = vector.broadcast %cst_225 : f32 to vector<4x4xf32>
    %487 = arith.addf %486, %485 : vector<4x4xf32>
    %488 = arith.mulf %460, %487 : vector<4x4xf32>
    %cst_226 = arith.constant 2.08767559E-9 : f32
    %489 = vector.broadcast %cst_226 : f32 to vector<4x4xf32>
    %490 = arith.mulf %471, %489 : vector<4x4xf32>
    %cst_227 = arith.constant -2.755732E-7 : f32
    %491 = vector.broadcast %cst_227 : f32 to vector<4x4xf32>
    %492 = arith.addf %491, %490 : vector<4x4xf32>
    %493 = arith.mulf %471, %492 : vector<4x4xf32>
    %cst_228 = arith.constant 2.48015876E-5 : f32
    %494 = vector.broadcast %cst_228 : f32 to vector<4x4xf32>
    %495 = arith.addf %494, %493 : vector<4x4xf32>
    %496 = arith.mulf %471, %495 : vector<4x4xf32>
    %cst_229 = arith.constant -0.00138888892 : f32
    %497 = vector.broadcast %cst_229 : f32 to vector<4x4xf32>
    %498 = arith.addf %497, %496 : vector<4x4xf32>
    %499 = arith.mulf %471, %498 : vector<4x4xf32>
    %cst_230 = arith.constant 0.0416666679 : f32
    %500 = vector.broadcast %cst_230 : f32 to vector<4x4xf32>
    %501 = arith.addf %500, %499 : vector<4x4xf32>
    %502 = arith.mulf %471, %501 : vector<4x4xf32>
    %cst_231 = arith.constant -5.000000e-01 : f32
    %503 = vector.broadcast %cst_231 : f32 to vector<4x4xf32>
    %504 = arith.addf %503, %502 : vector<4x4xf32>
    %505 = arith.mulf %471, %504 : vector<4x4xf32>
    %cst_232 = arith.constant 1.000000e+00 : f32
    %506 = vector.broadcast %cst_232 : f32 to vector<4x4xf32>
    %507 = arith.addf %506, %505 : vector<4x4xf32>
    %508 = arith.mulf %470, %488 : vector<4x4xf32>
    %509 = arith.mulf %470, %507 : vector<4x4xf32>
    %510 = math.exp %447 : vector<4x4xf32>
    %cst_233 = arith.constant 0.000000e+00 : f32
    %511 = vector.broadcast %cst_233 : f32 to vector<4x4xf32>
    %512 = arith.subf %511, %447 : vector<4x4xf32>
    %513 = math.exp %512 : vector<4x4xf32>
    %514 = arith.addf %510, %513 : vector<4x4xf32>
    %cst_234 = arith.constant 2.000000e+00 : f32
    %515 = vector.broadcast %cst_234 : f32 to vector<4x4xf32>
    %516 = arith.mulf %515, %509 : vector<4x4xf32>
    %517 = arith.addf %514, %516 : vector<4x4xf32>
    %518 = tpu.reciprocal %517 {approx = true} : vector<4x4xf32> -> vector<4x4xf32>
    %519 = arith.subf %510, %513 : vector<4x4xf32>
    %520 = arith.mulf %519, %518 : vector<4x4xf32>
    %cst_235 = arith.constant 2.000000e+00 : f32
    %521 = vector.broadcast %cst_235 : f32 to vector<4x4xf32>
    %522 = arith.mulf %521, %508 : vector<4x4xf32>
    %523 = arith.mulf %522, %518 : vector<4x4xf32>
    %cst_236 = arith.constant 0.000000e+00 : f32
    %524 = vector.broadcast %cst_236 : f32 to vector<4x4xf32>
    %525 = arith.subf %524, %523 : vector<4x4xf32>
    %526 = tpu.concatenate %520, %525 in 1 : vector<4x4xf32>, vector<4x4xf32> -> vector<4x8xf32>
    %527 = tpu.concatenate %523, %520 in 1 : vector<4x4xf32>, vector<4x4xf32> -> vector<4x8xf32>
    %528 = tpu.concatenate %526, %527 in 0 : vector<4x8xf32>, vector<4x8xf32> -> vector<8x8xf32>
    %cst_237 = arith.constant dense<0.000000e+00> : vector<8x8xf32>
    %529 = tpu.matmul %528, %428, %cst_237 {dimension_numbers = #tpu.dot_dimension_numbers<[1], [0], [0], [1], [0, 0, 1, 1], [], []>} : vector<8x8xf32>, vector<8x8xf32>, vector<8x8xf32> -> vector<8x8xf32>
    %530 = vector.extract_strided_slice %529 {offsets = [0, 0], sizes = [4, 8], strides = [1, 1]} : vector<8x8xf32> to vector<4x8xf32>
    %531 = vector.extract_strided_slice %529 {offsets = [4, 0], sizes = [4, 8], strides = [1, 1]} : vector<8x8xf32> to vector<4x8xf32>
    %cst_238 = arith.constant 0.000000e+00 : f32
    %532 = vector.broadcast %cst_238 : f32 to vector<4x16xf32>
    %533 = vector.extract_strided_slice %530 {offsets = [0, 0], sizes = [4, 1], strides = [1, 1]} : vector<4x8xf32> to vector<4x1xf32>
    %c2_239 = arith.constant 2 : index
    %c0_240 = arith.constant 0 : index
    %c0_241 = arith.constant 0 : index
    %c0_242 = arith.constant 0 : index
    %534 = vector.load %arg8[%c2_239, %c0_240, %c0_241, %c0_242] : memref<4x8x4x16xf32, #tpu.memory_space<vmem>>, vector<1x1x4x16xf32>
    %535 = vector.shape_cast %534 : vector<1x1x4x16xf32> to vector<4x16xf32>
    %536 = vector.broadcast %533 : vector<4x1xf32> to vector<4x16xf32>
    %537 = arith.mulf %536, %535 : vector<4x16xf32>
    %538 = arith.addf %532, %537 : vector<4x16xf32>
    %539 = vector.extract_strided_slice %531 {offsets = [0, 0], sizes = [4, 1], strides = [1, 1]} : vector<4x8xf32> to vector<4x1xf32>
    %c2_243 = arith.constant 2 : index
    %c0_244 = arith.constant 0 : index
    %c0_245 = arith.constant 0 : index
    %c0_246 = arith.constant 0 : index
    %540 = vector.load %arg9[%c2_243, %c0_244, %c0_245, %c0_246] : memref<4x8x4x16xf32, #tpu.memory_space<vmem>>, vector<1x1x4x16xf32>
    %541 = vector.shape_cast %540 : vector<1x1x4x16xf32> to vector<4x16xf32>
    %542 = vector.broadcast %539 : vector<4x1xf32> to vector<4x16xf32>
    %543 = arith.mulf %542, %541 : vector<4x16xf32>
    %544 = arith.addf %538, %543 : vector<4x16xf32>
    %545 = vector.extract_strided_slice %530 {offsets = [0, 1], sizes = [4, 1], strides = [1, 1]} : vector<4x8xf32> to vector<4x1xf32>
    %c2_247 = arith.constant 2 : index
    %c1_248 = arith.constant 1 : index
    %c0_249 = arith.constant 0 : index
    %c0_250 = arith.constant 0 : index
    %546 = vector.load %arg8[%c2_247, %c1_248, %c0_249, %c0_250] : memref<4x8x4x16xf32, #tpu.memory_space<vmem>>, vector<1x1x4x16xf32>
    %547 = vector.shape_cast %546 : vector<1x1x4x16xf32> to vector<4x16xf32>
    %548 = vector.broadcast %545 : vector<4x1xf32> to vector<4x16xf32>
    %549 = arith.mulf %548, %547 : vector<4x16xf32>
    %550 = arith.addf %544, %549 : vector<4x16xf32>
    %551 = vector.extract_strided_slice %531 {offsets = [0, 1], sizes = [4, 1], strides = [1, 1]} : vector<4x8xf32> to vector<4x1xf32>
    %c2_251 = arith.constant 2 : index
    %c1_252 = arith.constant 1 : index
    %c0_253 = arith.constant 0 : index
    %c0_254 = arith.constant 0 : index
    %552 = vector.load %arg9[%c2_251, %c1_252, %c0_253, %c0_254] : memref<4x8x4x16xf32, #tpu.memory_space<vmem>>, vector<1x1x4x16xf32>
    %553 = vector.shape_cast %552 : vector<1x1x4x16xf32> to vector<4x16xf32>
    %554 = vector.broadcast %551 : vector<4x1xf32> to vector<4x16xf32>
    %555 = arith.mulf %554, %553 : vector<4x16xf32>
    %556 = arith.addf %550, %555 : vector<4x16xf32>
    %557 = vector.extract_strided_slice %530 {offsets = [0, 2], sizes = [4, 1], strides = [1, 1]} : vector<4x8xf32> to vector<4x1xf32>
    %c2_255 = arith.constant 2 : index
    %c2_256 = arith.constant 2 : index
    %c0_257 = arith.constant 0 : index
    %c0_258 = arith.constant 0 : index
    %558 = vector.load %arg8[%c2_255, %c2_256, %c0_257, %c0_258] : memref<4x8x4x16xf32, #tpu.memory_space<vmem>>, vector<1x1x4x16xf32>
    %559 = vector.shape_cast %558 : vector<1x1x4x16xf32> to vector<4x16xf32>
    %560 = vector.broadcast %557 : vector<4x1xf32> to vector<4x16xf32>
    %561 = arith.mulf %560, %559 : vector<4x16xf32>
    %562 = arith.addf %556, %561 : vector<4x16xf32>
    %563 = vector.extract_strided_slice %531 {offsets = [0, 2], sizes = [4, 1], strides = [1, 1]} : vector<4x8xf32> to vector<4x1xf32>
    %c2_259 = arith.constant 2 : index
    %c2_260 = arith.constant 2 : index
    %c0_261 = arith.constant 0 : index
    %c0_262 = arith.constant 0 : index
    %564 = vector.load %arg9[%c2_259, %c2_260, %c0_261, %c0_262] : memref<4x8x4x16xf32, #tpu.memory_space<vmem>>, vector<1x1x4x16xf32>
    %565 = vector.shape_cast %564 : vector<1x1x4x16xf32> to vector<4x16xf32>
    %566 = vector.broadcast %563 : vector<4x1xf32> to vector<4x16xf32>
    %567 = arith.mulf %566, %565 : vector<4x16xf32>
    %568 = arith.addf %562, %567 : vector<4x16xf32>
    %569 = vector.extract_strided_slice %530 {offsets = [0, 3], sizes = [4, 1], strides = [1, 1]} : vector<4x8xf32> to vector<4x1xf32>
    %c2_263 = arith.constant 2 : index
    %c3_264 = arith.constant 3 : index
    %c0_265 = arith.constant 0 : index
    %c0_266 = arith.constant 0 : index
    %570 = vector.load %arg8[%c2_263, %c3_264, %c0_265, %c0_266] : memref<4x8x4x16xf32, #tpu.memory_space<vmem>>, vector<1x1x4x16xf32>
    %571 = vector.shape_cast %570 : vector<1x1x4x16xf32> to vector<4x16xf32>
    %572 = vector.broadcast %569 : vector<4x1xf32> to vector<4x16xf32>
    %573 = arith.mulf %572, %571 : vector<4x16xf32>
    %574 = arith.addf %568, %573 : vector<4x16xf32>
    %575 = vector.extract_strided_slice %531 {offsets = [0, 3], sizes = [4, 1], strides = [1, 1]} : vector<4x8xf32> to vector<4x1xf32>
    %c2_267 = arith.constant 2 : index
    %c3_268 = arith.constant 3 : index
    %c0_269 = arith.constant 0 : index
    %c0_270 = arith.constant 0 : index
    %576 = vector.load %arg9[%c2_267, %c3_268, %c0_269, %c0_270] : memref<4x8x4x16xf32, #tpu.memory_space<vmem>>, vector<1x1x4x16xf32>
    %577 = vector.shape_cast %576 : vector<1x1x4x16xf32> to vector<4x16xf32>
    %578 = vector.broadcast %575 : vector<4x1xf32> to vector<4x16xf32>
    %579 = arith.mulf %578, %577 : vector<4x16xf32>
    %580 = arith.addf %574, %579 : vector<4x16xf32>
    %581 = vector.extract_strided_slice %530 {offsets = [0, 4], sizes = [4, 1], strides = [1, 1]} : vector<4x8xf32> to vector<4x1xf32>
    %c2_271 = arith.constant 2 : index
    %c4_272 = arith.constant 4 : index
    %c0_273 = arith.constant 0 : index
    %c0_274 = arith.constant 0 : index
    %582 = vector.load %arg8[%c2_271, %c4_272, %c0_273, %c0_274] : memref<4x8x4x16xf32, #tpu.memory_space<vmem>>, vector<1x1x4x16xf32>
    %583 = vector.shape_cast %582 : vector<1x1x4x16xf32> to vector<4x16xf32>
    %584 = vector.broadcast %581 : vector<4x1xf32> to vector<4x16xf32>
    %585 = arith.mulf %584, %583 : vector<4x16xf32>
    %586 = arith.addf %580, %585 : vector<4x16xf32>
    %587 = vector.extract_strided_slice %531 {offsets = [0, 4], sizes = [4, 1], strides = [1, 1]} : vector<4x8xf32> to vector<4x1xf32>
    %c2_275 = arith.constant 2 : index
    %c4_276 = arith.constant 4 : index
    %c0_277 = arith.constant 0 : index
    %c0_278 = arith.constant 0 : index
    %588 = vector.load %arg9[%c2_275, %c4_276, %c0_277, %c0_278] : memref<4x8x4x16xf32, #tpu.memory_space<vmem>>, vector<1x1x4x16xf32>
    %589 = vector.shape_cast %588 : vector<1x1x4x16xf32> to vector<4x16xf32>
    %590 = vector.broadcast %587 : vector<4x1xf32> to vector<4x16xf32>
    %591 = arith.mulf %590, %589 : vector<4x16xf32>
    %592 = arith.addf %586, %591 : vector<4x16xf32>
    %593 = vector.extract_strided_slice %530 {offsets = [0, 5], sizes = [4, 1], strides = [1, 1]} : vector<4x8xf32> to vector<4x1xf32>
    %c2_279 = arith.constant 2 : index
    %c5_280 = arith.constant 5 : index
    %c0_281 = arith.constant 0 : index
    %c0_282 = arith.constant 0 : index
    %594 = vector.load %arg8[%c2_279, %c5_280, %c0_281, %c0_282] : memref<4x8x4x16xf32, #tpu.memory_space<vmem>>, vector<1x1x4x16xf32>
    %595 = vector.shape_cast %594 : vector<1x1x4x16xf32> to vector<4x16xf32>
    %596 = vector.broadcast %593 : vector<4x1xf32> to vector<4x16xf32>
    %597 = arith.mulf %596, %595 : vector<4x16xf32>
    %598 = arith.addf %592, %597 : vector<4x16xf32>
    %599 = vector.extract_strided_slice %531 {offsets = [0, 5], sizes = [4, 1], strides = [1, 1]} : vector<4x8xf32> to vector<4x1xf32>
    %c2_283 = arith.constant 2 : index
    %c5_284 = arith.constant 5 : index
    %c0_285 = arith.constant 0 : index
    %c0_286 = arith.constant 0 : index
    %600 = vector.load %arg9[%c2_283, %c5_284, %c0_285, %c0_286] : memref<4x8x4x16xf32, #tpu.memory_space<vmem>>, vector<1x1x4x16xf32>
    %601 = vector.shape_cast %600 : vector<1x1x4x16xf32> to vector<4x16xf32>
    %602 = vector.broadcast %599 : vector<4x1xf32> to vector<4x16xf32>
    %603 = arith.mulf %602, %601 : vector<4x16xf32>
    %604 = arith.addf %598, %603 : vector<4x16xf32>
    %605 = vector.extract_strided_slice %530 {offsets = [0, 6], sizes = [4, 1], strides = [1, 1]} : vector<4x8xf32> to vector<4x1xf32>
    %c2_287 = arith.constant 2 : index
    %c6_288 = arith.constant 6 : index
    %c0_289 = arith.constant 0 : index
    %c0_290 = arith.constant 0 : index
    %606 = vector.load %arg8[%c2_287, %c6_288, %c0_289, %c0_290] : memref<4x8x4x16xf32, #tpu.memory_space<vmem>>, vector<1x1x4x16xf32>
    %607 = vector.shape_cast %606 : vector<1x1x4x16xf32> to vector<4x16xf32>
    %608 = vector.broadcast %605 : vector<4x1xf32> to vector<4x16xf32>
    %609 = arith.mulf %608, %607 : vector<4x16xf32>
    %610 = arith.addf %604, %609 : vector<4x16xf32>
    %611 = vector.extract_strided_slice %531 {offsets = [0, 6], sizes = [4, 1], strides = [1, 1]} : vector<4x8xf32> to vector<4x1xf32>
    %c2_291 = arith.constant 2 : index
    %c6_292 = arith.constant 6 : index
    %c0_293 = arith.constant 0 : index
    %c0_294 = arith.constant 0 : index
    %612 = vector.load %arg9[%c2_291, %c6_292, %c0_293, %c0_294] : memref<4x8x4x16xf32, #tpu.memory_space<vmem>>, vector<1x1x4x16xf32>
    %613 = vector.shape_cast %612 : vector<1x1x4x16xf32> to vector<4x16xf32>
    %614 = vector.broadcast %611 : vector<4x1xf32> to vector<4x16xf32>
    %615 = arith.mulf %614, %613 : vector<4x16xf32>
    %616 = arith.addf %610, %615 : vector<4x16xf32>
    %617 = vector.extract_strided_slice %530 {offsets = [0, 7], sizes = [4, 1], strides = [1, 1]} : vector<4x8xf32> to vector<4x1xf32>
    %c2_295 = arith.constant 2 : index
    %c7_296 = arith.constant 7 : index
    %c0_297 = arith.constant 0 : index
    %c0_298 = arith.constant 0 : index
    %618 = vector.load %arg8[%c2_295, %c7_296, %c0_297, %c0_298] : memref<4x8x4x16xf32, #tpu.memory_space<vmem>>, vector<1x1x4x16xf32>
    %619 = vector.shape_cast %618 : vector<1x1x4x16xf32> to vector<4x16xf32>
    %620 = vector.broadcast %617 : vector<4x1xf32> to vector<4x16xf32>
    %621 = arith.mulf %620, %619 : vector<4x16xf32>
    %622 = arith.addf %616, %621 : vector<4x16xf32>
    %623 = vector.extract_strided_slice %531 {offsets = [0, 7], sizes = [4, 1], strides = [1, 1]} : vector<4x8xf32> to vector<4x1xf32>
    %c2_299 = arith.constant 2 : index
    %c7_300 = arith.constant 7 : index
    %c0_301 = arith.constant 0 : index
    %c0_302 = arith.constant 0 : index
    %624 = vector.load %arg9[%c2_299, %c7_300, %c0_301, %c0_302] : memref<4x8x4x16xf32, #tpu.memory_space<vmem>>, vector<1x1x4x16xf32>
    %625 = vector.shape_cast %624 : vector<1x1x4x16xf32> to vector<4x16xf32>
    %626 = vector.broadcast %623 : vector<4x1xf32> to vector<4x16xf32>
    %627 = arith.mulf %626, %625 : vector<4x16xf32>
    %628 = arith.addf %622, %627 : vector<4x16xf32>
    %629 = vector.extract_strided_slice %628 {offsets = [0, 0], sizes = [4, 8], strides = [1, 1]} : vector<4x16xf32> to vector<4x8xf32>
    %630 = vector.extract_strided_slice %628 {offsets = [0, 8], sizes = [4, 8], strides = [1, 1]} : vector<4x16xf32> to vector<4x8xf32>
    %631 = tpu.concatenate %629, %630 in 0 : vector<4x8xf32>, vector<4x8xf32> -> vector<8x8xf32>
    %c0_303 = arith.constant 0 : index
    %c16 = arith.constant 16 : index
    %632 = vector.load %arg11[%c0_303, %c16] : memref<8x64xf32, #tpu.memory_space<vmem>>, vector<8x8xf32>
    tpu.vector_store %arg11[%c0_303, %c16], %631 {strides = array<i32>} : memref<8x64xf32, #tpu.memory_space<vmem>>, vector<8x8xf32>,
    %633 = vector.extract_strided_slice %3 {offsets = [0, 24], sizes = [8, 8], strides = [1, 1]} : vector<8x64xf32> to vector<8x8xf32>
    %634 = vector.extract_strided_slice %7 {offsets = [0, 24], sizes = [8, 8], strides = [1, 1]} : vector<8x64xf32> to vector<8x8xf32>
    %635 = vector.extract_strided_slice %11 {offsets = [0, 24], sizes = [8, 8], strides = [1, 1]} : vector<8x64xf32> to vector<8x8xf32>
    %636 = vector.extract_strided_slice %633 {offsets = [0, 0], sizes = [4, 8], strides = [1, 1]} : vector<8x8xf32> to vector<4x8xf32>
    %637 = vector.extract_strided_slice %633 {offsets = [4, 0], sizes = [4, 8], strides = [1, 1]} : vector<8x8xf32> to vector<4x8xf32>
    %638 = vector.extract_strided_slice %634 {offsets = [0, 0], sizes = [4, 8], strides = [1, 1]} : vector<8x8xf32> to vector<4x8xf32>
    %639 = vector.extract_strided_slice %634 {offsets = [4, 0], sizes = [4, 8], strides = [1, 1]} : vector<8x8xf32> to vector<4x8xf32>
    %cst_304 = arith.constant 0.000000e+00 : f32
    %640 = vector.broadcast %cst_304 : f32 to vector<4x8xf32>
    %641 = arith.subf %640, %637 : vector<4x8xf32>
    %642 = tpu.concatenate %636, %641 in 1 : vector<4x8xf32>, vector<4x8xf32> -> vector<4x16xf32>
    %643 = tpu.concatenate %637, %636 in 1 : vector<4x8xf32>, vector<4x8xf32> -> vector<4x16xf32>
    %644 = tpu.concatenate %642, %643 in 0 : vector<4x16xf32>, vector<4x16xf32> -> vector<8x16xf32>
    %645 = tpu.concatenate %638, %639 in 1 : vector<4x8xf32>, vector<4x8xf32> -> vector<4x16xf32>
    %cst_305 = arith.constant dense<0.000000e+00> : vector<8x4xf32>
    %646 = tpu.matmul %644, %645, %cst_305 {dimension_numbers = #tpu.dot_dimension_numbers<[1], [1], [0], [0], [0, 0, 1, 0], [], []>} : vector<8x16xf32>, vector<4x16xf32>, vector<8x4xf32> -> vector<8x4xf32>
    %647 = vector.extract_strided_slice %646 {offsets = [0, 0], sizes = [4, 4], strides = [1, 1]} : vector<8x4xf32> to vector<4x4xf32>
    %648 = vector.extract_strided_slice %646 {offsets = [4, 0], sizes = [4, 4], strides = [1, 1]} : vector<8x4xf32> to vector<4x4xf32>
    %cst_306 = arith.constant 2.000000e+00 : f32
    %649 = vector.broadcast %cst_306 : f32 to vector<4x4xf32>
    %650 = arith.mulf %649, %647 : vector<4x4xf32>
    %cst_307 = arith.constant -5.000000e+01 : f32
    %cst_308 = arith.constant 5.000000e+01 : f32
    %651 = vector.broadcast %cst_307 : f32 to vector<4x4xf32>
    %652 = arith.maximumf %651, %650 : vector<4x4xf32>
    %653 = vector.broadcast %cst_308 : f32 to vector<4x4xf32>
    %654 = arith.minimumf %653, %652 : vector<4x4xf32>
    %cst_309 = arith.constant 2.000000e+00 : f32
    %655 = vector.broadcast %cst_309 : f32 to vector<4x4xf32>
    %656 = arith.mulf %655, %648 : vector<4x4xf32>
    %cst_310 = arith.constant 0.318309873 : f32
    %657 = vector.broadcast %cst_310 : f32 to vector<4x4xf32>
    %658 = arith.mulf %656, %657 : vector<4x4xf32>
    %cst_311 = arith.constant 5.000000e-01 : f32
    %659 = vector.broadcast %cst_311 : f32 to vector<4x4xf32>
    %660 = arith.addf %658, %659 : vector<4x4xf32>
    %661 = math.floor %660 : vector<4x4xf32>
    %cst_312 = arith.constant 3.140625 : f32
    %662 = vector.broadcast %cst_312 : f32 to vector<4x4xf32>
    %663 = arith.mulf %661, %662 : vector<4x4xf32>
    %664 = arith.subf %656, %663 : vector<4x4xf32>
    %cst_313 = arith.constant 9.67653584E-4 : f32
    %665 = vector.broadcast %cst_313 : f32 to vector<4x4xf32>
    %666 = arith.mulf %661, %665 : vector<4x4xf32>
    %667 = arith.subf %664, %666 : vector<4x4xf32>
    %cst_314 = arith.constant 5.000000e-01 : f32
    %668 = vector.broadcast %cst_314 : f32 to vector<4x4xf32>
    %669 = arith.mulf %661, %668 : vector<4x4xf32>
    %670 = math.floor %669 : vector<4x4xf32>
    %cst_315 = arith.constant 2.000000e+00 : f32
    %671 = vector.broadcast %cst_315 : f32 to vector<4x4xf32>
    %672 = arith.mulf %671, %670 : vector<4x4xf32>
    %673 = arith.subf %661, %672 : vector<4x4xf32>
    %cst_316 = arith.constant 2.000000e+00 : f32
    %674 = vector.broadcast %cst_316 : f32 to vector<4x4xf32>
    %675 = arith.mulf %674, %673 : vector<4x4xf32>
    %cst_317 = arith.constant 1.000000e+00 : f32
    %676 = vector.broadcast %cst_317 : f32 to vector<4x4xf32>
    %677 = arith.subf %676, %675 : vector<4x4xf32>
    %678 = arith.mulf %667, %667 : vector<4x4xf32>
    %cst_318 = arith.constant -2.50521079E-8 : f32
    %679 = vector.broadcast %cst_318 : f32 to vector<4x4xf32>
    %680 = arith.mulf %678, %679 : vector<4x4xf32>
    %cst_319 = arith.constant 2.75573188E-6 : f32
    %681 = vector.broadcast %cst_319 : f32 to vector<4x4xf32>
    %682 = arith.addf %681, %680 : vector<4x4xf32>
    %683 = arith.mulf %678, %682 : vector<4x4xf32>
    %cst_320 = arith.constant -1.98412701E-4 : f32
    %684 = vector.broadcast %cst_320 : f32 to vector<4x4xf32>
    %685 = arith.addf %684, %683 : vector<4x4xf32>
    %686 = arith.mulf %678, %685 : vector<4x4xf32>
    %cst_321 = arith.constant 0.00833333377 : f32
    %687 = vector.broadcast %cst_321 : f32 to vector<4x4xf32>
    %688 = arith.addf %687, %686 : vector<4x4xf32>
    %689 = arith.mulf %678, %688 : vector<4x4xf32>
    %cst_322 = arith.constant -0.166666672 : f32
    %690 = vector.broadcast %cst_322 : f32 to vector<4x4xf32>
    %691 = arith.addf %690, %689 : vector<4x4xf32>
    %692 = arith.mulf %678, %691 : vector<4x4xf32>
    %cst_323 = arith.constant 1.000000e+00 : f32
    %693 = vector.broadcast %cst_323 : f32 to vector<4x4xf32>
    %694 = arith.addf %693, %692 : vector<4x4xf32>
    %695 = arith.mulf %667, %694 : vector<4x4xf32>
    %cst_324 = arith.constant 2.08767559E-9 : f32
    %696 = vector.broadcast %cst_324 : f32 to vector<4x4xf32>
    %697 = arith.mulf %678, %696 : vector<4x4xf32>
    %cst_325 = arith.constant -2.755732E-7 : f32
    %698 = vector.broadcast %cst_325 : f32 to vector<4x4xf32>
    %699 = arith.addf %698, %697 : vector<4x4xf32>
    %700 = arith.mulf %678, %699 : vector<4x4xf32>
    %cst_326 = arith.constant 2.48015876E-5 : f32
    %701 = vector.broadcast %cst_326 : f32 to vector<4x4xf32>
    %702 = arith.addf %701, %700 : vector<4x4xf32>
    %703 = arith.mulf %678, %702 : vector<4x4xf32>
    %cst_327 = arith.constant -0.00138888892 : f32
    %704 = vector.broadcast %cst_327 : f32 to vector<4x4xf32>
    %705 = arith.addf %704, %703 : vector<4x4xf32>
    %706 = arith.mulf %678, %705 : vector<4x4xf32>
    %cst_328 = arith.constant 0.0416666679 : f32
    %707 = vector.broadcast %cst_328 : f32 to vector<4x4xf32>
    %708 = arith.addf %707, %706 : vector<4x4xf32>
    %709 = arith.mulf %678, %708 : vector<4x4xf32>
    %cst_329 = arith.constant -5.000000e-01 : f32
    %710 = vector.broadcast %cst_329 : f32 to vector<4x4xf32>
    %711 = arith.addf %710, %709 : vector<4x4xf32>
    %712 = arith.mulf %678, %711 : vector<4x4xf32>
    %cst_330 = arith.constant 1.000000e+00 : f32
    %713 = vector.broadcast %cst_330 : f32 to vector<4x4xf32>
    %714 = arith.addf %713, %712 : vector<4x4xf32>
    %715 = arith.mulf %677, %695 : vector<4x4xf32>
    %716 = arith.mulf %677, %714 : vector<4x4xf32>
    %717 = math.exp %654 : vector<4x4xf32>
    %cst_331 = arith.constant 0.000000e+00 : f32
    %718 = vector.broadcast %cst_331 : f32 to vector<4x4xf32>
    %719 = arith.subf %718, %654 : vector<4x4xf32>
    %720 = math.exp %719 : vector<4x4xf32>
    %721 = arith.addf %717, %720 : vector<4x4xf32>
    %cst_332 = arith.constant 2.000000e+00 : f32
    %722 = vector.broadcast %cst_332 : f32 to vector<4x4xf32>
    %723 = arith.mulf %722, %716 : vector<4x4xf32>
    %724 = arith.addf %721, %723 : vector<4x4xf32>
    %725 = tpu.reciprocal %724 {approx = true} : vector<4x4xf32> -> vector<4x4xf32>
    %726 = arith.subf %717, %720 : vector<4x4xf32>
    %727 = arith.mulf %726, %725 : vector<4x4xf32>
    %cst_333 = arith.constant 2.000000e+00 : f32
    %728 = vector.broadcast %cst_333 : f32 to vector<4x4xf32>
    %729 = arith.mulf %728, %715 : vector<4x4xf32>
    %730 = arith.mulf %729, %725 : vector<4x4xf32>
    %cst_334 = arith.constant 0.000000e+00 : f32
    %731 = vector.broadcast %cst_334 : f32 to vector<4x4xf32>
    %732 = arith.subf %731, %730 : vector<4x4xf32>
    %733 = tpu.concatenate %727, %732 in 1 : vector<4x4xf32>, vector<4x4xf32> -> vector<4x8xf32>
    %734 = tpu.concatenate %730, %727 in 1 : vector<4x4xf32>, vector<4x4xf32> -> vector<4x8xf32>
    %735 = tpu.concatenate %733, %734 in 0 : vector<4x8xf32>, vector<4x8xf32> -> vector<8x8xf32>
    %cst_335 = arith.constant dense<0.000000e+00> : vector<8x8xf32>
    %736 = tpu.matmul %735, %635, %cst_335 {dimension_numbers = #tpu.dot_dimension_numbers<[1], [0], [0], [1], [0, 0, 1, 1], [], []>} : vector<8x8xf32>, vector<8x8xf32>, vector<8x8xf32> -> vector<8x8xf32>
    %737 = vector.extract_strided_slice %736 {offsets = [0, 0], sizes = [4, 8], strides = [1, 1]} : vector<8x8xf32> to vector<4x8xf32>
    %738 = vector.extract_strided_slice %736 {offsets = [4, 0], sizes = [4, 8], strides = [1, 1]} : vector<8x8xf32> to vector<4x8xf32>
    %cst_336 = arith.constant 0.000000e+00 : f32
    %739 = vector.broadcast %cst_336 : f32 to vector<4x16xf32>
    %740 = vector.extract_strided_slice %737 {offsets = [0, 0], sizes = [4, 1], strides = [1, 1]} : vector<4x8xf32> to vector<4x1xf32>
    %c3_337 = arith.constant 3 : index
    %c0_338 = arith.constant 0 : index
    %c0_339 = arith.constant 0 : index
    %c0_340 = arith.constant 0 : index
    %741 = vector.load %arg8[%c3_337, %c0_338, %c0_339, %c0_340] : memref<4x8x4x16xf32, #tpu.memory_space<vmem>>, vector<1x1x4x16xf32>
    %742 = vector.shape_cast %741 : vector<1x1x4x16xf32> to vector<4x16xf32>
    %743 = vector.broadcast %740 : vector<4x1xf32> to vector<4x16xf32>
    %744 = arith.mulf %743, %742 : vector<4x16xf32>
    %745 = arith.addf %739, %744 : vector<4x16xf32>
    %746 = vector.extract_strided_slice %738 {offsets = [0, 0], sizes = [4, 1], strides = [1, 1]} : vector<4x8xf32> to vector<4x1xf32>
    %c3_341 = arith.constant 3 : index
    %c0_342 = arith.constant 0 : index
    %c0_343 = arith.constant 0 : index
    %c0_344 = arith.constant 0 : index
    %747 = vector.load %arg9[%c3_341, %c0_342, %c0_343, %c0_344] : memref<4x8x4x16xf32, #tpu.memory_space<vmem>>, vector<1x1x4x16xf32>
    %748 = vector.shape_cast %747 : vector<1x1x4x16xf32> to vector<4x16xf32>
    %749 = vector.broadcast %746 : vector<4x1xf32> to vector<4x16xf32>
    %750 = arith.mulf %749, %748 : vector<4x16xf32>
    %751 = arith.addf %745, %750 : vector<4x16xf32>
    %752 = vector.extract_strided_slice %737 {offsets = [0, 1], sizes = [4, 1], strides = [1, 1]} : vector<4x8xf32> to vector<4x1xf32>
    %c3_345 = arith.constant 3 : index
    %c1_346 = arith.constant 1 : index
    %c0_347 = arith.constant 0 : index
    %c0_348 = arith.constant 0 : index
    %753 = vector.load %arg8[%c3_345, %c1_346, %c0_347, %c0_348] : memref<4x8x4x16xf32, #tpu.memory_space<vmem>>, vector<1x1x4x16xf32>
    %754 = vector.shape_cast %753 : vector<1x1x4x16xf32> to vector<4x16xf32>
    %755 = vector.broadcast %752 : vector<4x1xf32> to vector<4x16xf32>
    %756 = arith.mulf %755, %754 : vector<4x16xf32>
    %757 = arith.addf %751, %756 : vector<4x16xf32>
    %758 = vector.extract_strided_slice %738 {offsets = [0, 1], sizes = [4, 1], strides = [1, 1]} : vector<4x8xf32> to vector<4x1xf32>
    %c3_349 = arith.constant 3 : index
    %c1_350 = arith.constant 1 : index
    %c0_351 = arith.constant 0 : index
    %c0_352 = arith.constant 0 : index
    %759 = vector.load %arg9[%c3_349, %c1_350, %c0_351, %c0_352] : memref<4x8x4x16xf32, #tpu.memory_space<vmem>>, vector<1x1x4x16xf32>
    %760 = vector.shape_cast %759 : vector<1x1x4x16xf32> to vector<4x16xf32>
    %761 = vector.broadcast %758 : vector<4x1xf32> to vector<4x16xf32>
    %762 = arith.mulf %761, %760 : vector<4x16xf32>
    %763 = arith.addf %757, %762 : vector<4x16xf32>
    %764 = vector.extract_strided_slice %737 {offsets = [0, 2], sizes = [4, 1], strides = [1, 1]} : vector<4x8xf32> to vector<4x1xf32>
    %c3_353 = arith.constant 3 : index
    %c2_354 = arith.constant 2 : index
    %c0_355 = arith.constant 0 : index
    %c0_356 = arith.constant 0 : index
    %765 = vector.load %arg8[%c3_353, %c2_354, %c0_355, %c0_356] : memref<4x8x4x16xf32, #tpu.memory_space<vmem>>, vector<1x1x4x16xf32>
    %766 = vector.shape_cast %765 : vector<1x1x4x16xf32> to vector<4x16xf32>
    %767 = vector.broadcast %764 : vector<4x1xf32> to vector<4x16xf32>
    %768 = arith.mulf %767, %766 : vector<4x16xf32>
    %769 = arith.addf %763, %768 : vector<4x16xf32>
    %770 = vector.extract_strided_slice %738 {offsets = [0, 2], sizes = [4, 1], strides = [1, 1]} : vector<4x8xf32> to vector<4x1xf32>
    %c3_357 = arith.constant 3 : index
    %c2_358 = arith.constant 2 : index
    %c0_359 = arith.constant 0 : index
    %c0_360 = arith.constant 0 : index
    %771 = vector.load %arg9[%c3_357, %c2_358, %c0_359, %c0_360] : memref<4x8x4x16xf32, #tpu.memory_space<vmem>>, vector<1x1x4x16xf32>
    %772 = vector.shape_cast %771 : vector<1x1x4x16xf32> to vector<4x16xf32>
    %773 = vector.broadcast %770 : vector<4x1xf32> to vector<4x16xf32>
    %774 = arith.mulf %773, %772 : vector<4x16xf32>
    %775 = arith.addf %769, %774 : vector<4x16xf32>
    %776 = vector.extract_strided_slice %737 {offsets = [0, 3], sizes = [4, 1], strides = [1, 1]} : vector<4x8xf32> to vector<4x1xf32>
    %c3_361 = arith.constant 3 : index
    %c3_362 = arith.constant 3 : index
    %c0_363 = arith.constant 0 : index
    %c0_364 = arith.constant 0 : index
    %777 = vector.load %arg8[%c3_361, %c3_362, %c0_363, %c0_364] : memref<4x8x4x16xf32, #tpu.memory_space<vmem>>, vector<1x1x4x16xf32>
    %778 = vector.shape_cast %777 : vector<1x1x4x16xf32> to vector<4x16xf32>
    %779 = vector.broadcast %776 : vector<4x1xf32> to vector<4x16xf32>
    %780 = arith.mulf %779, %778 : vector<4x16xf32>
    %781 = arith.addf %775, %780 : vector<4x16xf32>
    %782 = vector.extract_strided_slice %738 {offsets = [0, 3], sizes = [4, 1], strides = [1, 1]} : vector<4x8xf32> to vector<4x1xf32>
    %c3_365 = arith.constant 3 : index
    %c3_366 = arith.constant 3 : index
    %c0_367 = arith.constant 0 : index
    %c0_368 = arith.constant 0 : index
    %783 = vector.load %arg9[%c3_365, %c3_366, %c0_367, %c0_368] : memref<4x8x4x16xf32, #tpu.memory_space<vmem>>, vector<1x1x4x16xf32>
    %784 = vector.shape_cast %783 : vector<1x1x4x16xf32> to vector<4x16xf32>
    %785 = vector.broadcast %782 : vector<4x1xf32> to vector<4x16xf32>
    %786 = arith.mulf %785, %784 : vector<4x16xf32>
    %787 = arith.addf %781, %786 : vector<4x16xf32>
    %788 = vector.extract_strided_slice %737 {offsets = [0, 4], sizes = [4, 1], strides = [1, 1]} : vector<4x8xf32> to vector<4x1xf32>
    %c3_369 = arith.constant 3 : index
    %c4_370 = arith.constant 4 : index
    %c0_371 = arith.constant 0 : index
    %c0_372 = arith.constant 0 : index
    %789 = vector.load %arg8[%c3_369, %c4_370, %c0_371, %c0_372] : memref<4x8x4x16xf32, #tpu.memory_space<vmem>>, vector<1x1x4x16xf32>
    %790 = vector.shape_cast %789 : vector<1x1x4x16xf32> to vector<4x16xf32>
    %791 = vector.broadcast %788 : vector<4x1xf32> to vector<4x16xf32>
    %792 = arith.mulf %791, %790 : vector<4x16xf32>
    %793 = arith.addf %787, %792 : vector<4x16xf32>
    %794 = vector.extract_strided_slice %738 {offsets = [0, 4], sizes = [4, 1], strides = [1, 1]} : vector<4x8xf32> to vector<4x1xf32>
    %c3_373 = arith.constant 3 : index
    %c4_374 = arith.constant 4 : index
    %c0_375 = arith.constant 0 : index
    %c0_376 = arith.constant 0 : index
    %795 = vector.load %arg9[%c3_373, %c4_374, %c0_375, %c0_376] : memref<4x8x4x16xf32, #tpu.memory_space<vmem>>, vector<1x1x4x16xf32>
    %796 = vector.shape_cast %795 : vector<1x1x4x16xf32> to vector<4x16xf32>
    %797 = vector.broadcast %794 : vector<4x1xf32> to vector<4x16xf32>
    %798 = arith.mulf %797, %796 : vector<4x16xf32>
    %799 = arith.addf %793, %798 : vector<4x16xf32>
    %800 = vector.extract_strided_slice %737 {offsets = [0, 5], sizes = [4, 1], strides = [1, 1]} : vector<4x8xf32> to vector<4x1xf32>
    %c3_377 = arith.constant 3 : index
    %c5_378 = arith.constant 5 : index
    %c0_379 = arith.constant 0 : index
    %c0_380 = arith.constant 0 : index
    %801 = vector.load %arg8[%c3_377, %c5_378, %c0_379, %c0_380] : memref<4x8x4x16xf32, #tpu.memory_space<vmem>>, vector<1x1x4x16xf32>
    %802 = vector.shape_cast %801 : vector<1x1x4x16xf32> to vector<4x16xf32>
    %803 = vector.broadcast %800 : vector<4x1xf32> to vector<4x16xf32>
    %804 = arith.mulf %803, %802 : vector<4x16xf32>
    %805 = arith.addf %799, %804 : vector<4x16xf32>
    %806 = vector.extract_strided_slice %738 {offsets = [0, 5], sizes = [4, 1], strides = [1, 1]} : vector<4x8xf32> to vector<4x1xf32>
    %c3_381 = arith.constant 3 : index
    %c5_382 = arith.constant 5 : index
    %c0_383 = arith.constant 0 : index
    %c0_384 = arith.constant 0 : index
    %807 = vector.load %arg9[%c3_381, %c5_382, %c0_383, %c0_384] : memref<4x8x4x16xf32, #tpu.memory_space<vmem>>, vector<1x1x4x16xf32>
    %808 = vector.shape_cast %807 : vector<1x1x4x16xf32> to vector<4x16xf32>
    %809 = vector.broadcast %806 : vector<4x1xf32> to vector<4x16xf32>
    %810 = arith.mulf %809, %808 : vector<4x16xf32>
    %811 = arith.addf %805, %810 : vector<4x16xf32>
    %812 = vector.extract_strided_slice %737 {offsets = [0, 6], sizes = [4, 1], strides = [1, 1]} : vector<4x8xf32> to vector<4x1xf32>
    %c3_385 = arith.constant 3 : index
    %c6_386 = arith.constant 6 : index
    %c0_387 = arith.constant 0 : index
    %c0_388 = arith.constant 0 : index
    %813 = vector.load %arg8[%c3_385, %c6_386, %c0_387, %c0_388] : memref<4x8x4x16xf32, #tpu.memory_space<vmem>>, vector<1x1x4x16xf32>
    %814 = vector.shape_cast %813 : vector<1x1x4x16xf32> to vector<4x16xf32>
    %815 = vector.broadcast %812 : vector<4x1xf32> to vector<4x16xf32>
    %816 = arith.mulf %815, %814 : vector<4x16xf32>
    %817 = arith.addf %811, %816 : vector<4x16xf32>
    %818 = vector.extract_strided_slice %738 {offsets = [0, 6], sizes = [4, 1], strides = [1, 1]} : vector<4x8xf32> to vector<4x1xf32>
    %c3_389 = arith.constant 3 : index
    %c6_390 = arith.constant 6 : index
    %c0_391 = arith.constant 0 : index
    %c0_392 = arith.constant 0 : index
    %819 = vector.load %arg9[%c3_389, %c6_390, %c0_391, %c0_392] : memref<4x8x4x16xf32, #tpu.memory_space<vmem>>, vector<1x1x4x16xf32>
    %820 = vector.shape_cast %819 : vector<1x1x4x16xf32> to vector<4x16xf32>
    %821 = vector.broadcast %818 : vector<4x1xf32> to vector<4x16xf32>
    %822 = arith.mulf %821, %820 : vector<4x16xf32>
    %823 = arith.addf %817, %822 : vector<4x16xf32>
    %824 = vector.extract_strided_slice %737 {offsets = [0, 7], sizes = [4, 1], strides = [1, 1]} : vector<4x8xf32> to vector<4x1xf32>
    %c3_393 = arith.constant 3 : index
    %c7_394 = arith.constant 7 : index
    %c0_395 = arith.constant 0 : index
    %c0_396 = arith.constant 0 : index
    %825 = vector.load %arg8[%c3_393, %c7_394, %c0_395, %c0_396] : memref<4x8x4x16xf32, #tpu.memory_space<vmem>>, vector<1x1x4x16xf32>
    %826 = vector.shape_cast %825 : vector<1x1x4x16xf32> to vector<4x16xf32>
    %827 = vector.broadcast %824 : vector<4x1xf32> to vector<4x16xf32>
    %828 = arith.mulf %827, %826 : vector<4x16xf32>
    %829 = arith.addf %823, %828 : vector<4x16xf32>
    %830 = vector.extract_strided_slice %738 {offsets = [0, 7], sizes = [4, 1], strides = [1, 1]} : vector<4x8xf32> to vector<4x1xf32>
    %c3_397 = arith.constant 3 : index
    %c7_398 = arith.constant 7 : index
    %c0_399 = arith.constant 0 : index
    %c0_400 = arith.constant 0 : index
    %831 = vector.load %arg9[%c3_397, %c7_398, %c0_399, %c0_400] : memref<4x8x4x16xf32, #tpu.memory_space<vmem>>, vector<1x1x4x16xf32>
    %832 = vector.shape_cast %831 : vector<1x1x4x16xf32> to vector<4x16xf32>
    %833 = vector.broadcast %830 : vector<4x1xf32> to vector<4x16xf32>
    %834 = arith.mulf %833, %832 : vector<4x16xf32>
    %835 = arith.addf %829, %834 : vector<4x16xf32>
    %836 = vector.extract_strided_slice %835 {offsets = [0, 0], sizes = [4, 8], strides = [1, 1]} : vector<4x16xf32> to vector<4x8xf32>
    %837 = vector.extract_strided_slice %835 {offsets = [0, 8], sizes = [4, 8], strides = [1, 1]} : vector<4x16xf32> to vector<4x8xf32>
    %838 = tpu.concatenate %836, %837 in 0 : vector<4x8xf32>, vector<4x8xf32> -> vector<8x8xf32>
    %c0_401 = arith.constant 0 : index
    %c24 = arith.constant 24 : index
    %839 = vector.load %arg11[%c0_401, %c24] : memref<8x64xf32, #tpu.memory_space<vmem>>, vector<8x8xf32>
    tpu.vector_store %arg11[%c0_401, %c24], %838 {strides = array<i32>} : memref<8x64xf32, #tpu.memory_space<vmem>>, vector<8x8xf32>,
    %840 = vector.extract_strided_slice %3 {offsets = [0, 32], sizes = [8, 8], strides = [1, 1]} : vector<8x64xf32> to vector<8x8xf32>
    %841 = vector.extract_strided_slice %7 {offsets = [0, 32], sizes = [8, 8], strides = [1, 1]} : vector<8x64xf32> to vector<8x8xf32>
    %842 = vector.extract_strided_slice %11 {offsets = [0, 32], sizes = [8, 8], strides = [1, 1]} : vector<8x64xf32> to vector<8x8xf32>
    %843 = vector.extract_strided_slice %840 {offsets = [0, 0], sizes = [4, 8], strides = [1, 1]} : vector<8x8xf32> to vector<4x8xf32>
    %844 = vector.extract_strided_slice %840 {offsets = [4, 0], sizes = [4, 8], strides = [1, 1]} : vector<8x8xf32> to vector<4x8xf32>
    %845 = vector.extract_strided_slice %841 {offsets = [0, 0], sizes = [4, 8], strides = [1, 1]} : vector<8x8xf32> to vector<4x8xf32>
    %846 = vector.extract_strided_slice %841 {offsets = [4, 0], sizes = [4, 8], strides = [1, 1]} : vector<8x8xf32> to vector<4x8xf32>
    %cst_402 = arith.constant 0.000000e+00 : f32
    %847 = vector.broadcast %cst_402 : f32 to vector<4x8xf32>
    %848 = arith.subf %847, %844 : vector<4x8xf32>
    %849 = tpu.concatenate %843, %848 in 1 : vector<4x8xf32>, vector<4x8xf32> -> vector<4x16xf32>
    %850 = tpu.concatenate %844, %843 in 1 : vector<4x8xf32>, vector<4x8xf32> -> vector<4x16xf32>
    %851 = tpu.concatenate %849, %850 in 0 : vector<4x16xf32>, vector<4x16xf32> -> vector<8x16xf32>
    %852 = tpu.concatenate %845, %846 in 1 : vector<4x8xf32>, vector<4x8xf32> -> vector<4x16xf32>
    %cst_403 = arith.constant dense<0.000000e+00> : vector<8x4xf32>
    %853 = tpu.matmul %851, %852, %cst_403 {dimension_numbers = #tpu.dot_dimension_numbers<[1], [1], [0], [0], [0, 0, 1, 0], [], []>} : vector<8x16xf32>, vector<4x16xf32>, vector<8x4xf32> -> vector<8x4xf32>
    %854 = vector.extract_strided_slice %853 {offsets = [0, 0], sizes = [4, 4], strides = [1, 1]} : vector<8x4xf32> to vector<4x4xf32>
    %855 = vector.extract_strided_slice %853 {offsets = [4, 0], sizes = [4, 4], strides = [1, 1]} : vector<8x4xf32> to vector<4x4xf32>
    %cst_404 = arith.constant 2.000000e+00 : f32
    %856 = vector.broadcast %cst_404 : f32 to vector<4x4xf32>
    %857 = arith.mulf %856, %854 : vector<4x4xf32>
    %cst_405 = arith.constant -5.000000e+01 : f32
    %cst_406 = arith.constant 5.000000e+01 : f32
    %858 = vector.broadcast %cst_405 : f32 to vector<4x4xf32>
    %859 = arith.maximumf %858, %857 : vector<4x4xf32>
    %860 = vector.broadcast %cst_406 : f32 to vector<4x4xf32>
    %861 = arith.minimumf %860, %859 : vector<4x4xf32>
    %cst_407 = arith.constant 2.000000e+00 : f32
    %862 = vector.broadcast %cst_407 : f32 to vector<4x4xf32>
    %863 = arith.mulf %862, %855 : vector<4x4xf32>
    %cst_408 = arith.constant 0.318309873 : f32
    %864 = vector.broadcast %cst_408 : f32 to vector<4x4xf32>
    %865 = arith.mulf %863, %864 : vector<4x4xf32>
    %cst_409 = arith.constant 5.000000e-01 : f32
    %866 = vector.broadcast %cst_409 : f32 to vector<4x4xf32>
    %867 = arith.addf %865, %866 : vector<4x4xf32>
    %868 = math.floor %867 : vector<4x4xf32>
    %cst_410 = arith.constant 3.140625 : f32
    %869 = vector.broadcast %cst_410 : f32 to vector<4x4xf32>
    %870 = arith.mulf %868, %869 : vector<4x4xf32>
    %871 = arith.subf %863, %870 : vector<4x4xf32>
    %cst_411 = arith.constant 9.67653584E-4 : f32
    %872 = vector.broadcast %cst_411 : f32 to vector<4x4xf32>
    %873 = arith.mulf %868, %872 : vector<4x4xf32>
    %874 = arith.subf %871, %873 : vector<4x4xf32>
    %cst_412 = arith.constant 5.000000e-01 : f32
    %875 = vector.broadcast %cst_412 : f32 to vector<4x4xf32>
    %876 = arith.mulf %868, %875 : vector<4x4xf32>
    %877 = math.floor %876 : vector<4x4xf32>
    %cst_413 = arith.constant 2.000000e+00 : f32
    %878 = vector.broadcast %cst_413 : f32 to vector<4x4xf32>
    %879 = arith.mulf %878, %877 : vector<4x4xf32>
    %880 = arith.subf %868, %879 : vector<4x4xf32>
    %cst_414 = arith.constant 2.000000e+00 : f32
    %881 = vector.broadcast %cst_414 : f32 to vector<4x4xf32>
    %882 = arith.mulf %881, %880 : vector<4x4xf32>
    %cst_415 = arith.constant 1.000000e+00 : f32
    %883 = vector.broadcast %cst_415 : f32 to vector<4x4xf32>
    %884 = arith.subf %883, %882 : vector<4x4xf32>
    %885 = arith.mulf %874, %874 : vector<4x4xf32>
    %cst_416 = arith.constant -2.50521079E-8 : f32
    %886 = vector.broadcast %cst_416 : f32 to vector<4x4xf32>
    %887 = arith.mulf %885, %886 : vector<4x4xf32>
    %cst_417 = arith.constant 2.75573188E-6 : f32
    %888 = vector.broadcast %cst_417 : f32 to vector<4x4xf32>
    %889 = arith.addf %888, %887 : vector<4x4xf32>
    %890 = arith.mulf %885, %889 : vector<4x4xf32>
    %cst_418 = arith.constant -1.98412701E-4 : f32
    %891 = vector.broadcast %cst_418 : f32 to vector<4x4xf32>
    %892 = arith.addf %891, %890 : vector<4x4xf32>
    %893 = arith.mulf %885, %892 : vector<4x4xf32>
    %cst_419 = arith.constant 0.00833333377 : f32
    %894 = vector.broadcast %cst_419 : f32 to vector<4x4xf32>
    %895 = arith.addf %894, %893 : vector<4x4xf32>
    %896 = arith.mulf %885, %895 : vector<4x4xf32>
    %cst_420 = arith.constant -0.166666672 : f32
    %897 = vector.broadcast %cst_420 : f32 to vector<4x4xf32>
    %898 = arith.addf %897, %896 : vector<4x4xf32>
    %899 = arith.mulf %885, %898 : vector<4x4xf32>
    %cst_421 = arith.constant 1.000000e+00 : f32
    %900 = vector.broadcast %cst_421 : f32 to vector<4x4xf32>
    %901 = arith.addf %900, %899 : vector<4x4xf32>
    %902 = arith.mulf %874, %901 : vector<4x4xf32>
    %cst_422 = arith.constant 2.08767559E-9 : f32
    %903 = vector.broadcast %cst_422 : f32 to vector<4x4xf32>
    %904 = arith.mulf %885, %903 : vector<4x4xf32>
    %cst_423 = arith.constant -2.755732E-7 : f32
    %905 = vector.broadcast %cst_423 : f32 to vector<4x4xf32>
    %906 = arith.addf %905, %904 : vector<4x4xf32>
    %907 = arith.mulf %885, %906 : vector<4x4xf32>
    %cst_424 = arith.constant 2.48015876E-5 : f32
    %908 = vector.broadcast %cst_424 : f32 to vector<4x4xf32>
    %909 = arith.addf %908, %907 : vector<4x4xf32>
    %910 = arith.mulf %885, %909 : vector<4x4xf32>
    %cst_425 = arith.constant -0.00138888892 : f32
    %911 = vector.broadcast %cst_425 : f32 to vector<4x4xf32>
    %912 = arith.addf %911, %910 : vector<4x4xf32>
    %913 = arith.mulf %885, %912 : vector<4x4xf32>
    %cst_426 = arith.constant 0.0416666679 : f32
    %914 = vector.broadcast %cst_426 : f32 to vector<4x4xf32>
    %915 = arith.addf %914, %913 : vector<4x4xf32>
    %916 = arith.mulf %885, %915 : vector<4x4xf32>
    %cst_427 = arith.constant -5.000000e-01 : f32
    %917 = vector.broadcast %cst_427 : f32 to vector<4x4xf32>
    %918 = arith.addf %917, %916 : vector<4x4xf32>
    %919 = arith.mulf %885, %918 : vector<4x4xf32>
    %cst_428 = arith.constant 1.000000e+00 : f32
    %920 = vector.broadcast %cst_428 : f32 to vector<4x4xf32>
    %921 = arith.addf %920, %919 : vector<4x4xf32>
    %922 = arith.mulf %884, %902 : vector<4x4xf32>
    %923 = arith.mulf %884, %921 : vector<4x4xf32>
    %924 = math.exp %861 : vector<4x4xf32>
    %cst_429 = arith.constant 0.000000e+00 : f32
    %925 = vector.broadcast %cst_429 : f32 to vector<4x4xf32>
    %926 = arith.subf %925, %861 : vector<4x4xf32>
    %927 = math.exp %926 : vector<4x4xf32>
    %928 = arith.addf %924, %927 : vector<4x4xf32>
    %cst_430 = arith.constant 2.000000e+00 : f32
    %929 = vector.broadcast %cst_430 : f32 to vector<4x4xf32>
    %930 = arith.mulf %929, %923 : vector<4x4xf32>
    %931 = arith.addf %928, %930 : vector<4x4xf32>
    %932 = tpu.reciprocal %931 {approx = true} : vector<4x4xf32> -> vector<4x4xf32>
    %933 = arith.subf %924, %927 : vector<4x4xf32>
    %934 = arith.mulf %933, %932 : vector<4x4xf32>
    %cst_431 = arith.constant 2.000000e+00 : f32
    %935 = vector.broadcast %cst_431 : f32 to vector<4x4xf32>
    %936 = arith.mulf %935, %922 : vector<4x4xf32>
    %937 = arith.mulf %936, %932 : vector<4x4xf32>
    %cst_432 = arith.constant 0.000000e+00 : f32
    %938 = vector.broadcast %cst_432 : f32 to vector<4x4xf32>
    %939 = arith.subf %938, %937 : vector<4x4xf32>
    %940 = tpu.concatenate %934, %939 in 1 : vector<4x4xf32>, vector<4x4xf32> -> vector<4x8xf32>
    %941 = tpu.concatenate %937, %934 in 1 : vector<4x4xf32>, vector<4x4xf32> -> vector<4x8xf32>
    %942 = tpu.concatenate %940, %941 in 0 : vector<4x8xf32>, vector<4x8xf32> -> vector<8x8xf32>
    %cst_433 = arith.constant dense<0.000000e+00> : vector<8x8xf32>
    %943 = tpu.matmul %942, %842, %cst_433 {dimension_numbers = #tpu.dot_dimension_numbers<[1], [0], [0], [1], [0, 0, 1, 1], [], []>} : vector<8x8xf32>, vector<8x8xf32>, vector<8x8xf32> -> vector<8x8xf32>
    %944 = vector.extract_strided_slice %943 {offsets = [0, 0], sizes = [4, 8], strides = [1, 1]} : vector<8x8xf32> to vector<4x8xf32>
    %945 = vector.extract_strided_slice %943 {offsets = [4, 0], sizes = [4, 8], strides = [1, 1]} : vector<8x8xf32> to vector<4x8xf32>
    %cst_434 = arith.constant 0.000000e+00 : f32
    %946 = vector.broadcast %cst_434 : f32 to vector<4x16xf32>
    %947 = vector.extract_strided_slice %944 {offsets = [0, 0], sizes = [4, 1], strides = [1, 1]} : vector<4x8xf32> to vector<4x1xf32>
    %c0_435 = arith.constant 0 : index
    %c0_436 = arith.constant 0 : index
    %c0_437 = arith.constant 0 : index
    %c0_438 = arith.constant 0 : index
    %948 = vector.load %arg8[%c0_435, %c0_436, %c0_437, %c0_438] : memref<4x8x4x16xf32, #tpu.memory_space<vmem>>, vector<1x1x4x16xf32>
    %949 = vector.shape_cast %948 : vector<1x1x4x16xf32> to vector<4x16xf32>
    %950 = vector.broadcast %947 : vector<4x1xf32> to vector<4x16xf32>
    %951 = arith.mulf %950, %949 : vector<4x16xf32>
    %952 = arith.addf %946, %951 : vector<4x16xf32>
    %953 = vector.extract_strided_slice %945 {offsets = [0, 0], sizes = [4, 1], strides = [1, 1]} : vector<4x8xf32> to vector<4x1xf32>
    %c0_439 = arith.constant 0 : index
    %c0_440 = arith.constant 0 : index
    %c0_441 = arith.constant 0 : index
    %c0_442 = arith.constant 0 : index
    %954 = vector.load %arg9[%c0_439, %c0_440, %c0_441, %c0_442] : memref<4x8x4x16xf32, #tpu.memory_space<vmem>>, vector<1x1x4x16xf32>
    %955 = vector.shape_cast %954 : vector<1x1x4x16xf32> to vector<4x16xf32>
    %956 = vector.broadcast %953 : vector<4x1xf32> to vector<4x16xf32>
    %957 = arith.mulf %956, %955 : vector<4x16xf32>
    %958 = arith.addf %952, %957 : vector<4x16xf32>
    %959 = vector.extract_strided_slice %944 {offsets = [0, 1], sizes = [4, 1], strides = [1, 1]} : vector<4x8xf32> to vector<4x1xf32>
    %c0_443 = arith.constant 0 : index
    %c1_444 = arith.constant 1 : index
    %c0_445 = arith.constant 0 : index
    %c0_446 = arith.constant 0 : index
    %960 = vector.load %arg8[%c0_443, %c1_444, %c0_445, %c0_446] : memref<4x8x4x16xf32, #tpu.memory_space<vmem>>, vector<1x1x4x16xf32>
    %961 = vector.shape_cast %960 : vector<1x1x4x16xf32> to vector<4x16xf32>
    %962 = vector.broadcast %959 : vector<4x1xf32> to vector<4x16xf32>
    %963 = arith.mulf %962, %961 : vector<4x16xf32>
    %964 = arith.addf %958, %963 : vector<4x16xf32>
    %965 = vector.extract_strided_slice %945 {offsets = [0, 1], sizes = [4, 1], strides = [1, 1]} : vector<4x8xf32> to vector<4x1xf32>
    %c0_447 = arith.constant 0 : index
    %c1_448 = arith.constant 1 : index
    %c0_449 = arith.constant 0 : index
    %c0_450 = arith.constant 0 : index
    %966 = vector.load %arg9[%c0_447, %c1_448, %c0_449, %c0_450] : memref<4x8x4x16xf32, #tpu.memory_space<vmem>>, vector<1x1x4x16xf32>
    %967 = vector.shape_cast %966 : vector<1x1x4x16xf32> to vector<4x16xf32>
    %968 = vector.broadcast %965 : vector<4x1xf32> to vector<4x16xf32>
    %969 = arith.mulf %968, %967 : vector<4x16xf32>
    %970 = arith.addf %964, %969 : vector<4x16xf32>
    %971 = vector.extract_strided_slice %944 {offsets = [0, 2], sizes = [4, 1], strides = [1, 1]} : vector<4x8xf32> to vector<4x1xf32>
    %c0_451 = arith.constant 0 : index
    %c2_452 = arith.constant 2 : index
    %c0_453 = arith.constant 0 : index
    %c0_454 = arith.constant 0 : index
    %972 = vector.load %arg8[%c0_451, %c2_452, %c0_453, %c0_454] : memref<4x8x4x16xf32, #tpu.memory_space<vmem>>, vector<1x1x4x16xf32>
    %973 = vector.shape_cast %972 : vector<1x1x4x16xf32> to vector<4x16xf32>
    %974 = vector.broadcast %971 : vector<4x1xf32> to vector<4x16xf32>
    %975 = arith.mulf %974, %973 : vector<4x16xf32>
    %976 = arith.addf %970, %975 : vector<4x16xf32>
    %977 = vector.extract_strided_slice %945 {offsets = [0, 2], sizes = [4, 1], strides = [1, 1]} : vector<4x8xf32> to vector<4x1xf32>
    %c0_455 = arith.constant 0 : index
    %c2_456 = arith.constant 2 : index
    %c0_457 = arith.constant 0 : index
    %c0_458 = arith.constant 0 : index
    %978 = vector.load %arg9[%c0_455, %c2_456, %c0_457, %c0_458] : memref<4x8x4x16xf32, #tpu.memory_space<vmem>>, vector<1x1x4x16xf32>
    %979 = vector.shape_cast %978 : vector<1x1x4x16xf32> to vector<4x16xf32>
    %980 = vector.broadcast %977 : vector<4x1xf32> to vector<4x16xf32>
    %981 = arith.mulf %980, %979 : vector<4x16xf32>
    %982 = arith.addf %976, %981 : vector<4x16xf32>
    %983 = vector.extract_strided_slice %944 {offsets = [0, 3], sizes = [4, 1], strides = [1, 1]} : vector<4x8xf32> to vector<4x1xf32>
    %c0_459 = arith.constant 0 : index
    %c3_460 = arith.constant 3 : index
    %c0_461 = arith.constant 0 : index
    %c0_462 = arith.constant 0 : index
    %984 = vector.load %arg8[%c0_459, %c3_460, %c0_461, %c0_462] : memref<4x8x4x16xf32, #tpu.memory_space<vmem>>, vector<1x1x4x16xf32>
    %985 = vector.shape_cast %984 : vector<1x1x4x16xf32> to vector<4x16xf32>
    %986 = vector.broadcast %983 : vector<4x1xf32> to vector<4x16xf32>
    %987 = arith.mulf %986, %985 : vector<4x16xf32>
    %988 = arith.addf %982, %987 : vector<4x16xf32>
    %989 = vector.extract_strided_slice %945 {offsets = [0, 3], sizes = [4, 1], strides = [1, 1]} : vector<4x8xf32> to vector<4x1xf32>
    %c0_463 = arith.constant 0 : index
    %c3_464 = arith.constant 3 : index
    %c0_465 = arith.constant 0 : index
    %c0_466 = arith.constant 0 : index
    %990 = vector.load %arg9[%c0_463, %c3_464, %c0_465, %c0_466] : memref<4x8x4x16xf32, #tpu.memory_space<vmem>>, vector<1x1x4x16xf32>
    %991 = vector.shape_cast %990 : vector<1x1x4x16xf32> to vector<4x16xf32>
    %992 = vector.broadcast %989 : vector<4x1xf32> to vector<4x16xf32>
    %993 = arith.mulf %992, %991 : vector<4x16xf32>
    %994 = arith.addf %988, %993 : vector<4x16xf32>
    %995 = vector.extract_strided_slice %944 {offsets = [0, 4], sizes = [4, 1], strides = [1, 1]} : vector<4x8xf32> to vector<4x1xf32>
    %c0_467 = arith.constant 0 : index
    %c4_468 = arith.constant 4 : index
    %c0_469 = arith.constant 0 : index
    %c0_470 = arith.constant 0 : index
    %996 = vector.load %arg8[%c0_467, %c4_468, %c0_469, %c0_470] : memref<4x8x4x16xf32, #tpu.memory_space<vmem>>, vector<1x1x4x16xf32>
    %997 = vector.shape_cast %996 : vector<1x1x4x16xf32> to vector<4x16xf32>
    %998 = vector.broadcast %995 : vector<4x1xf32> to vector<4x16xf32>
    %999 = arith.mulf %998, %997 : vector<4x16xf32>
    %1000 = arith.addf %994, %999 : vector<4x16xf32>
    %1001 = vector.extract_strided_slice %945 {offsets = [0, 4], sizes = [4, 1], strides = [1, 1]} : vector<4x8xf32> to vector<4x1xf32>
    %c0_471 = arith.constant 0 : index
    %c4_472 = arith.constant 4 : index
    %c0_473 = arith.constant 0 : index
    %c0_474 = arith.constant 0 : index
    %1002 = vector.load %arg9[%c0_471, %c4_472, %c0_473, %c0_474] : memref<4x8x4x16xf32, #tpu.memory_space<vmem>>, vector<1x1x4x16xf32>
    %1003 = vector.shape_cast %1002 : vector<1x1x4x16xf32> to vector<4x16xf32>
    %1004 = vector.broadcast %1001 : vector<4x1xf32> to vector<4x16xf32>
    %1005 = arith.mulf %1004, %1003 : vector<4x16xf32>
    %1006 = arith.addf %1000, %1005 : vector<4x16xf32>
    %1007 = vector.extract_strided_slice %944 {offsets = [0, 5], sizes = [4, 1], strides = [1, 1]} : vector<4x8xf32> to vector<4x1xf32>
    %c0_475 = arith.constant 0 : index
    %c5_476 = arith.constant 5 : index
    %c0_477 = arith.constant 0 : index
    %c0_478 = arith.constant 0 : index
    %1008 = vector.load %arg8[%c0_475, %c5_476, %c0_477, %c0_478] : memref<4x8x4x16xf32, #tpu.memory_space<vmem>>, vector<1x1x4x16xf32>
    %1009 = vector.shape_cast %1008 : vector<1x1x4x16xf32> to vector<4x16xf32>
    %1010 = vector.broadcast %1007 : vector<4x1xf32> to vector<4x16xf32>
    %1011 = arith.mulf %1010, %1009 : vector<4x16xf32>
    %1012 = arith.addf %1006, %1011 : vector<4x16xf32>
    %1013 = vector.extract_strided_slice %945 {offsets = [0, 5], sizes = [4, 1], strides = [1, 1]} : vector<4x8xf32> to vector<4x1xf32>
    %c0_479 = arith.constant 0 : index
    %c5_480 = arith.constant 5 : index
    %c0_481 = arith.constant 0 : index
    %c0_482 = arith.constant 0 : index
    %1014 = vector.load %arg9[%c0_479, %c5_480, %c0_481, %c0_482] : memref<4x8x4x16xf32, #tpu.memory_space<vmem>>, vector<1x1x4x16xf32>
    %1015 = vector.shape_cast %1014 : vector<1x1x4x16xf32> to vector<4x16xf32>
    %1016 = vector.broadcast %1013 : vector<4x1xf32> to vector<4x16xf32>
    %1017 = arith.mulf %1016, %1015 : vector<4x16xf32>
    %1018 = arith.addf %1012, %1017 : vector<4x16xf32>
    %1019 = vector.extract_strided_slice %944 {offsets = [0, 6], sizes = [4, 1], strides = [1, 1]} : vector<4x8xf32> to vector<4x1xf32>
    %c0_483 = arith.constant 0 : index
    %c6_484 = arith.constant 6 : index
    %c0_485 = arith.constant 0 : index
    %c0_486 = arith.constant 0 : index
    %1020 = vector.load %arg8[%c0_483, %c6_484, %c0_485, %c0_486] : memref<4x8x4x16xf32, #tpu.memory_space<vmem>>, vector<1x1x4x16xf32>
    %1021 = vector.shape_cast %1020 : vector<1x1x4x16xf32> to vector<4x16xf32>
    %1022 = vector.broadcast %1019 : vector<4x1xf32> to vector<4x16xf32>
    %1023 = arith.mulf %1022, %1021 : vector<4x16xf32>
    %1024 = arith.addf %1018, %1023 : vector<4x16xf32>
    %1025 = vector.extract_strided_slice %945 {offsets = [0, 6], sizes = [4, 1], strides = [1, 1]} : vector<4x8xf32> to vector<4x1xf32>
    %c0_487 = arith.constant 0 : index
    %c6_488 = arith.constant 6 : index
    %c0_489 = arith.constant 0 : index
    %c0_490 = arith.constant 0 : index
    %1026 = vector.load %arg9[%c0_487, %c6_488, %c0_489, %c0_490] : memref<4x8x4x16xf32, #tpu.memory_space<vmem>>, vector<1x1x4x16xf32>
    %1027 = vector.shape_cast %1026 : vector<1x1x4x16xf32> to vector<4x16xf32>
    %1028 = vector.broadcast %1025 : vector<4x1xf32> to vector<4x16xf32>
    %1029 = arith.mulf %1028, %1027 : vector<4x16xf32>
    %1030 = arith.addf %1024, %1029 : vector<4x16xf32>
    %1031 = vector.extract_strided_slice %944 {offsets = [0, 7], sizes = [4, 1], strides = [1, 1]} : vector<4x8xf32> to vector<4x1xf32>
    %c0_491 = arith.constant 0 : index
    %c7_492 = arith.constant 7 : index
    %c0_493 = arith.constant 0 : index
    %c0_494 = arith.constant 0 : index
    %1032 = vector.load %arg8[%c0_491, %c7_492, %c0_493, %c0_494] : memref<4x8x4x16xf32, #tpu.memory_space<vmem>>, vector<1x1x4x16xf32>
    %1033 = vector.shape_cast %1032 : vector<1x1x4x16xf32> to vector<4x16xf32>
    %1034 = vector.broadcast %1031 : vector<4x1xf32> to vector<4x16xf32>
    %1035 = arith.mulf %1034, %1033 : vector<4x16xf32>
    %1036 = arith.addf %1030, %1035 : vector<4x16xf32>
    %1037 = vector.extract_strided_slice %945 {offsets = [0, 7], sizes = [4, 1], strides = [1, 1]} : vector<4x8xf32> to vector<4x1xf32>
    %c0_495 = arith.constant 0 : index
    %c7_496 = arith.constant 7 : index
    %c0_497 = arith.constant 0 : index
    %c0_498 = arith.constant 0 : index
    %1038 = vector.load %arg9[%c0_495, %c7_496, %c0_497, %c0_498] : memref<4x8x4x16xf32, #tpu.memory_space<vmem>>, vector<1x1x4x16xf32>
    %1039 = vector.shape_cast %1038 : vector<1x1x4x16xf32> to vector<4x16xf32>
    %1040 = vector.broadcast %1037 : vector<4x1xf32> to vector<4x16xf32>
    %1041 = arith.mulf %1040, %1039 : vector<4x16xf32>
    %1042 = arith.addf %1036, %1041 : vector<4x16xf32>
    %1043 = vector.extract_strided_slice %1042 {offsets = [0, 0], sizes = [4, 8], strides = [1, 1]} : vector<4x16xf32> to vector<4x8xf32>
    %1044 = vector.extract_strided_slice %1042 {offsets = [0, 8], sizes = [4, 8], strides = [1, 1]} : vector<4x16xf32> to vector<4x8xf32>
    %1045 = tpu.concatenate %1043, %1044 in 0 : vector<4x8xf32>, vector<4x8xf32> -> vector<8x8xf32>
    %c0_499 = arith.constant 0 : index
    %c32 = arith.constant 32 : index
    %1046 = vector.load %arg11[%c0_499, %c32] : memref<8x64xf32, #tpu.memory_space<vmem>>, vector<8x8xf32>
    tpu.vector_store %arg11[%c0_499, %c32], %1045 {strides = array<i32>} : memref<8x64xf32, #tpu.memory_space<vmem>>, vector<8x8xf32>,
    %1047 = vector.extract_strided_slice %3 {offsets = [0, 40], sizes = [8, 8], strides = [1, 1]} : vector<8x64xf32> to vector<8x8xf32>
    %1048 = vector.extract_strided_slice %7 {offsets = [0, 40], sizes = [8, 8], strides = [1, 1]} : vector<8x64xf32> to vector<8x8xf32>
    %1049 = vector.extract_strided_slice %11 {offsets = [0, 40], sizes = [8, 8], strides = [1, 1]} : vector<8x64xf32> to vector<8x8xf32>
    %1050 = vector.extract_strided_slice %1047 {offsets = [0, 0], sizes = [4, 8], strides = [1, 1]} : vector<8x8xf32> to vector<4x8xf32>
    %1051 = vector.extract_strided_slice %1047 {offsets = [4, 0], sizes = [4, 8], strides = [1, 1]} : vector<8x8xf32> to vector<4x8xf32>
    %1052 = vector.extract_strided_slice %1048 {offsets = [0, 0], sizes = [4, 8], strides = [1, 1]} : vector<8x8xf32> to vector<4x8xf32>
    %1053 = vector.extract_strided_slice %1048 {offsets = [4, 0], sizes = [4, 8], strides = [1, 1]} : vector<8x8xf32> to vector<4x8xf32>
    %cst_500 = arith.constant 0.000000e+00 : f32
    %1054 = vector.broadcast %cst_500 : f32 to vector<4x8xf32>
    %1055 = arith.subf %1054, %1051 : vector<4x8xf32>
    %1056 = tpu.concatenate %1050, %1055 in 1 : vector<4x8xf32>, vector<4x8xf32> -> vector<4x16xf32>
    %1057 = tpu.concatenate %1051, %1050 in 1 : vector<4x8xf32>, vector<4x8xf32> -> vector<4x16xf32>
    %1058 = tpu.concatenate %1056, %1057 in 0 : vector<4x16xf32>, vector<4x16xf32> -> vector<8x16xf32>
    %1059 = tpu.concatenate %1052, %1053 in 1 : vector<4x8xf32>, vector<4x8xf32> -> vector<4x16xf32>
    %cst_501 = arith.constant dense<0.000000e+00> : vector<8x4xf32>
    %1060 = tpu.matmul %1058, %1059, %cst_501 {dimension_numbers = #tpu.dot_dimension_numbers<[1], [1], [0], [0], [0, 0, 1, 0], [], []>} : vector<8x16xf32>, vector<4x16xf32>, vector<8x4xf32> -> vector<8x4xf32>
    %1061 = vector.extract_strided_slice %1060 {offsets = [0, 0], sizes = [4, 4], strides = [1, 1]} : vector<8x4xf32> to vector<4x4xf32>
    %1062 = vector.extract_strided_slice %1060 {offsets = [4, 0], sizes = [4, 4], strides = [1, 1]} : vector<8x4xf32> to vector<4x4xf32>
    %cst_502 = arith.constant 2.000000e+00 : f32
    %1063 = vector.broadcast %cst_502 : f32 to vector<4x4xf32>
    %1064 = arith.mulf %1063, %1061 : vector<4x4xf32>
    %cst_503 = arith.constant -5.000000e+01 : f32
    %cst_504 = arith.constant 5.000000e+01 : f32
    %1065 = vector.broadcast %cst_503 : f32 to vector<4x4xf32>
    %1066 = arith.maximumf %1065, %1064 : vector<4x4xf32>
    %1067 = vector.broadcast %cst_504 : f32 to vector<4x4xf32>
    %1068 = arith.minimumf %1067, %1066 : vector<4x4xf32>
    %cst_505 = arith.constant 2.000000e+00 : f32
    %1069 = vector.broadcast %cst_505 : f32 to vector<4x4xf32>
    %1070 = arith.mulf %1069, %1062 : vector<4x4xf32>
    %cst_506 = arith.constant 0.318309873 : f32
    %1071 = vector.broadcast %cst_506 : f32 to vector<4x4xf32>
    %1072 = arith.mulf %1070, %1071 : vector<4x4xf32>
    %cst_507 = arith.constant 5.000000e-01 : f32
    %1073 = vector.broadcast %cst_507 : f32 to vector<4x4xf32>
    %1074 = arith.addf %1072, %1073 : vector<4x4xf32>
    %1075 = math.floor %1074 : vector<4x4xf32>
    %cst_508 = arith.constant 3.140625 : f32
    %1076 = vector.broadcast %cst_508 : f32 to vector<4x4xf32>
    %1077 = arith.mulf %1075, %1076 : vector<4x4xf32>
    %1078 = arith.subf %1070, %1077 : vector<4x4xf32>
    %cst_509 = arith.constant 9.67653584E-4 : f32
    %1079 = vector.broadcast %cst_509 : f32 to vector<4x4xf32>
    %1080 = arith.mulf %1075, %1079 : vector<4x4xf32>
    %1081 = arith.subf %1078, %1080 : vector<4x4xf32>
    %cst_510 = arith.constant 5.000000e-01 : f32
    %1082 = vector.broadcast %cst_510 : f32 to vector<4x4xf32>
    %1083 = arith.mulf %1075, %1082 : vector<4x4xf32>
    %1084 = math.floor %1083 : vector<4x4xf32>
    %cst_511 = arith.constant 2.000000e+00 : f32
    %1085 = vector.broadcast %cst_511 : f32 to vector<4x4xf32>
    %1086 = arith.mulf %1085, %1084 : vector<4x4xf32>
    %1087 = arith.subf %1075, %1086 : vector<4x4xf32>
    %cst_512 = arith.constant 2.000000e+00 : f32
    %1088 = vector.broadcast %cst_512 : f32 to vector<4x4xf32>
    %1089 = arith.mulf %1088, %1087 : vector<4x4xf32>
    %cst_513 = arith.constant 1.000000e+00 : f32
    %1090 = vector.broadcast %cst_513 : f32 to vector<4x4xf32>
    %1091 = arith.subf %1090, %1089 : vector<4x4xf32>
    %1092 = arith.mulf %1081, %1081 : vector<4x4xf32>
    %cst_514 = arith.constant -2.50521079E-8 : f32
    %1093 = vector.broadcast %cst_514 : f32 to vector<4x4xf32>
    %1094 = arith.mulf %1092, %1093 : vector<4x4xf32>
    %cst_515 = arith.constant 2.75573188E-6 : f32
    %1095 = vector.broadcast %cst_515 : f32 to vector<4x4xf32>
    %1096 = arith.addf %1095, %1094 : vector<4x4xf32>
    %1097 = arith.mulf %1092, %1096 : vector<4x4xf32>
    %cst_516 = arith.constant -1.98412701E-4 : f32
    %1098 = vector.broadcast %cst_516 : f32 to vector<4x4xf32>
    %1099 = arith.addf %1098, %1097 : vector<4x4xf32>
    %1100 = arith.mulf %1092, %1099 : vector<4x4xf32>
    %cst_517 = arith.constant 0.00833333377 : f32
    %1101 = vector.broadcast %cst_517 : f32 to vector<4x4xf32>
    %1102 = arith.addf %1101, %1100 : vector<4x4xf32>
    %1103 = arith.mulf %1092, %1102 : vector<4x4xf32>
    %cst_518 = arith.constant -0.166666672 : f32
    %1104 = vector.broadcast %cst_518 : f32 to vector<4x4xf32>
    %1105 = arith.addf %1104, %1103 : vector<4x4xf32>
    %1106 = arith.mulf %1092, %1105 : vector<4x4xf32>
    %cst_519 = arith.constant 1.000000e+00 : f32
    %1107 = vector.broadcast %cst_519 : f32 to vector<4x4xf32>
    %1108 = arith.addf %1107, %1106 : vector<4x4xf32>
    %1109 = arith.mulf %1081, %1108 : vector<4x4xf32>
    %cst_520 = arith.constant 2.08767559E-9 : f32
    %1110 = vector.broadcast %cst_520 : f32 to vector<4x4xf32>
    %1111 = arith.mulf %1092, %1110 : vector<4x4xf32>
    %cst_521 = arith.constant -2.755732E-7 : f32
    %1112 = vector.broadcast %cst_521 : f32 to vector<4x4xf32>
    %1113 = arith.addf %1112, %1111 : vector<4x4xf32>
    %1114 = arith.mulf %1092, %1113 : vector<4x4xf32>
    %cst_522 = arith.constant 2.48015876E-5 : f32
    %1115 = vector.broadcast %cst_522 : f32 to vector<4x4xf32>
    %1116 = arith.addf %1115, %1114 : vector<4x4xf32>
    %1117 = arith.mulf %1092, %1116 : vector<4x4xf32>
    %cst_523 = arith.constant -0.00138888892 : f32
    %1118 = vector.broadcast %cst_523 : f32 to vector<4x4xf32>
    %1119 = arith.addf %1118, %1117 : vector<4x4xf32>
    %1120 = arith.mulf %1092, %1119 : vector<4x4xf32>
    %cst_524 = arith.constant 0.0416666679 : f32
    %1121 = vector.broadcast %cst_524 : f32 to vector<4x4xf32>
    %1122 = arith.addf %1121, %1120 : vector<4x4xf32>
    %1123 = arith.mulf %1092, %1122 : vector<4x4xf32>
    %cst_525 = arith.constant -5.000000e-01 : f32
    %1124 = vector.broadcast %cst_525 : f32 to vector<4x4xf32>
    %1125 = arith.addf %1124, %1123 : vector<4x4xf32>
    %1126 = arith.mulf %1092, %1125 : vector<4x4xf32>
    %cst_526 = arith.constant 1.000000e+00 : f32
    %1127 = vector.broadcast %cst_526 : f32 to vector<4x4xf32>
    %1128 = arith.addf %1127, %1126 : vector<4x4xf32>
    %1129 = arith.mulf %1091, %1109 : vector<4x4xf32>
    %1130 = arith.mulf %1091, %1128 : vector<4x4xf32>
    %1131 = math.exp %1068 : vector<4x4xf32>
    %cst_527 = arith.constant 0.000000e+00 : f32
    %1132 = vector.broadcast %cst_527 : f32 to vector<4x4xf32>
    %1133 = arith.subf %1132, %1068 : vector<4x4xf32>
    %1134 = math.exp %1133 : vector<4x4xf32>
    %1135 = arith.addf %1131, %1134 : vector<4x4xf32>
    %cst_528 = arith.constant 2.000000e+00 : f32
    %1136 = vector.broadcast %cst_528 : f32 to vector<4x4xf32>
    %1137 = arith.mulf %1136, %1130 : vector<4x4xf32>
    %1138 = arith.addf %1135, %1137 : vector<4x4xf32>
    %1139 = tpu.reciprocal %1138 {approx = true} : vector<4x4xf32> -> vector<4x4xf32>
    %1140 = arith.subf %1131, %1134 : vector<4x4xf32>
    %1141 = arith.mulf %1140, %1139 : vector<4x4xf32>
    %cst_529 = arith.constant 2.000000e+00 : f32
    %1142 = vector.broadcast %cst_529 : f32 to vector<4x4xf32>
    %1143 = arith.mulf %1142, %1129 : vector<4x4xf32>
    %1144 = arith.mulf %1143, %1139 : vector<4x4xf32>
    %cst_530 = arith.constant 0.000000e+00 : f32
    %1145 = vector.broadcast %cst_530 : f32 to vector<4x4xf32>
    %1146 = arith.subf %1145, %1144 : vector<4x4xf32>
    %1147 = tpu.concatenate %1141, %1146 in 1 : vector<4x4xf32>, vector<4x4xf32> -> vector<4x8xf32>
    %1148 = tpu.concatenate %1144, %1141 in 1 : vector<4x4xf32>, vector<4x4xf32> -> vector<4x8xf32>
    %1149 = tpu.concatenate %1147, %1148 in 0 : vector<4x8xf32>, vector<4x8xf32> -> vector<8x8xf32>
    %cst_531 = arith.constant dense<0.000000e+00> : vector<8x8xf32>
    %1150 = tpu.matmul %1149, %1049, %cst_531 {dimension_numbers = #tpu.dot_dimension_numbers<[1], [0], [0], [1], [0, 0, 1, 1], [], []>} : vector<8x8xf32>, vector<8x8xf32>, vector<8x8xf32> -> vector<8x8xf32>
    %1151 = vector.extract_strided_slice %1150 {offsets = [0, 0], sizes = [4, 8], strides = [1, 1]} : vector<8x8xf32> to vector<4x8xf32>
    %1152 = vector.extract_strided_slice %1150 {offsets = [4, 0], sizes = [4, 8], strides = [1, 1]} : vector<8x8xf32> to vector<4x8xf32>
    %cst_532 = arith.constant 0.000000e+00 : f32
    %1153 = vector.broadcast %cst_532 : f32 to vector<4x16xf32>
    %1154 = vector.extract_strided_slice %1151 {offsets = [0, 0], sizes = [4, 1], strides = [1, 1]} : vector<4x8xf32> to vector<4x1xf32>
    %c1_533 = arith.constant 1 : index
    %c0_534 = arith.constant 0 : index
    %c0_535 = arith.constant 0 : index
    %c0_536 = arith.constant 0 : index
    %1155 = vector.load %arg8[%c1_533, %c0_534, %c0_535, %c0_536] : memref<4x8x4x16xf32, #tpu.memory_space<vmem>>, vector<1x1x4x16xf32>
    %1156 = vector.shape_cast %1155 : vector<1x1x4x16xf32> to vector<4x16xf32>
    %1157 = vector.broadcast %1154 : vector<4x1xf32> to vector<4x16xf32>
    %1158 = arith.mulf %1157, %1156 : vector<4x16xf32>
    %1159 = arith.addf %1153, %1158 : vector<4x16xf32>
    %1160 = vector.extract_strided_slice %1152 {offsets = [0, 0], sizes = [4, 1], strides = [1, 1]} : vector<4x8xf32> to vector<4x1xf32>
    %c1_537 = arith.constant 1 : index
    %c0_538 = arith.constant 0 : index
    %c0_539 = arith.constant 0 : index
    %c0_540 = arith.constant 0 : index
    %1161 = vector.load %arg9[%c1_537, %c0_538, %c0_539, %c0_540] : memref<4x8x4x16xf32, #tpu.memory_space<vmem>>, vector<1x1x4x16xf32>
    %1162 = vector.shape_cast %1161 : vector<1x1x4x16xf32> to vector<4x16xf32>
    %1163 = vector.broadcast %1160 : vector<4x1xf32> to vector<4x16xf32>
    %1164 = arith.mulf %1163, %1162 : vector<4x16xf32>
    %1165 = arith.addf %1159, %1164 : vector<4x16xf32>
    %1166 = vector.extract_strided_slice %1151 {offsets = [0, 1], sizes = [4, 1], strides = [1, 1]} : vector<4x8xf32> to vector<4x1xf32>
    %c1_541 = arith.constant 1 : index
    %c1_542 = arith.constant 1 : index
    %c0_543 = arith.constant 0 : index
    %c0_544 = arith.constant 0 : index
    %1167 = vector.load %arg8[%c1_541, %c1_542, %c0_543, %c0_544] : memref<4x8x4x16xf32, #tpu.memory_space<vmem>>, vector<1x1x4x16xf32>
    %1168 = vector.shape_cast %1167 : vector<1x1x4x16xf32> to vector<4x16xf32>
    %1169 = vector.broadcast %1166 : vector<4x1xf32> to vector<4x16xf32>
    %1170 = arith.mulf %1169, %1168 : vector<4x16xf32>
    %1171 = arith.addf %1165, %1170 : vector<4x16xf32>
    %1172 = vector.extract_strided_slice %1152 {offsets = [0, 1], sizes = [4, 1], strides = [1, 1]} : vector<4x8xf32> to vector<4x1xf32>
    %c1_545 = arith.constant 1 : index
    %c1_546 = arith.constant 1 : index
    %c0_547 = arith.constant 0 : index
    %c0_548 = arith.constant 0 : index
    %1173 = vector.load %arg9[%c1_545, %c1_546, %c0_547, %c0_548] : memref<4x8x4x16xf32, #tpu.memory_space<vmem>>, vector<1x1x4x16xf32>
    %1174 = vector.shape_cast %1173 : vector<1x1x4x16xf32> to vector<4x16xf32>
    %1175 = vector.broadcast %1172 : vector<4x1xf32> to vector<4x16xf32>
    %1176 = arith.mulf %1175, %1174 : vector<4x16xf32>
    %1177 = arith.addf %1171, %1176 : vector<4x16xf32>
    %1178 = vector.extract_strided_slice %1151 {offsets = [0, 2], sizes = [4, 1], strides = [1, 1]} : vector<4x8xf32> to vector<4x1xf32>
    %c1_549 = arith.constant 1 : index
    %c2_550 = arith.constant 2 : index
    %c0_551 = arith.constant 0 : index
    %c0_552 = arith.constant 0 : index
    %1179 = vector.load %arg8[%c1_549, %c2_550, %c0_551, %c0_552] : memref<4x8x4x16xf32, #tpu.memory_space<vmem>>, vector<1x1x4x16xf32>
    %1180 = vector.shape_cast %1179 : vector<1x1x4x16xf32> to vector<4x16xf32>
    %1181 = vector.broadcast %1178 : vector<4x1xf32> to vector<4x16xf32>
    %1182 = arith.mulf %1181, %1180 : vector<4x16xf32>
    %1183 = arith.addf %1177, %1182 : vector<4x16xf32>
    %1184 = vector.extract_strided_slice %1152 {offsets = [0, 2], sizes = [4, 1], strides = [1, 1]} : vector<4x8xf32> to vector<4x1xf32>
    %c1_553 = arith.constant 1 : index
    %c2_554 = arith.constant 2 : index
    %c0_555 = arith.constant 0 : index
    %c0_556 = arith.constant 0 : index
    %1185 = vector.load %arg9[%c1_553, %c2_554, %c0_555, %c0_556] : memref<4x8x4x16xf32, #tpu.memory_space<vmem>>, vector<1x1x4x16xf32>
    %1186 = vector.shape_cast %1185 : vector<1x1x4x16xf32> to vector<4x16xf32>
    %1187 = vector.broadcast %1184 : vector<4x1xf32> to vector<4x16xf32>
    %1188 = arith.mulf %1187, %1186 : vector<4x16xf32>
    %1189 = arith.addf %1183, %1188 : vector<4x16xf32>
    %1190 = vector.extract_strided_slice %1151 {offsets = [0, 3], sizes = [4, 1], strides = [1, 1]} : vector<4x8xf32> to vector<4x1xf32>
    %c1_557 = arith.constant 1 : index
    %c3_558 = arith.constant 3 : index
    %c0_559 = arith.constant 0 : index
    %c0_560 = arith.constant 0 : index
    %1191 = vector.load %arg8[%c1_557, %c3_558, %c0_559, %c0_560] : memref<4x8x4x16xf32, #tpu.memory_space<vmem>>, vector<1x1x4x16xf32>
    %1192 = vector.shape_cast %1191 : vector<1x1x4x16xf32> to vector<4x16xf32>
    %1193 = vector.broadcast %1190 : vector<4x1xf32> to vector<4x16xf32>
    %1194 = arith.mulf %1193, %1192 : vector<4x16xf32>
    %1195 = arith.addf %1189, %1194 : vector<4x16xf32>
    %1196 = vector.extract_strided_slice %1152 {offsets = [0, 3], sizes = [4, 1], strides = [1, 1]} : vector<4x8xf32> to vector<4x1xf32>
    %c1_561 = arith.constant 1 : index
    %c3_562 = arith.constant 3 : index
    %c0_563 = arith.constant 0 : index
    %c0_564 = arith.constant 0 : index
    %1197 = vector.load %arg9[%c1_561, %c3_562, %c0_563, %c0_564] : memref<4x8x4x16xf32, #tpu.memory_space<vmem>>, vector<1x1x4x16xf32>
    %1198 = vector.shape_cast %1197 : vector<1x1x4x16xf32> to vector<4x16xf32>
    %1199 = vector.broadcast %1196 : vector<4x1xf32> to vector<4x16xf32>
    %1200 = arith.mulf %1199, %1198 : vector<4x16xf32>
    %1201 = arith.addf %1195, %1200 : vector<4x16xf32>
    %1202 = vector.extract_strided_slice %1151 {offsets = [0, 4], sizes = [4, 1], strides = [1, 1]} : vector<4x8xf32> to vector<4x1xf32>
    %c1_565 = arith.constant 1 : index
    %c4_566 = arith.constant 4 : index
    %c0_567 = arith.constant 0 : index
    %c0_568 = arith.constant 0 : index
    %1203 = vector.load %arg8[%c1_565, %c4_566, %c0_567, %c0_568] : memref<4x8x4x16xf32, #tpu.memory_space<vmem>>, vector<1x1x4x16xf32>
    %1204 = vector.shape_cast %1203 : vector<1x1x4x16xf32> to vector<4x16xf32>
    %1205 = vector.broadcast %1202 : vector<4x1xf32> to vector<4x16xf32>
    %1206 = arith.mulf %1205, %1204 : vector<4x16xf32>
    %1207 = arith.addf %1201, %1206 : vector<4x16xf32>
    %1208 = vector.extract_strided_slice %1152 {offsets = [0, 4], sizes = [4, 1], strides = [1, 1]} : vector<4x8xf32> to vector<4x1xf32>
    %c1_569 = arith.constant 1 : index
    %c4_570 = arith.constant 4 : index
    %c0_571 = arith.constant 0 : index
    %c0_572 = arith.constant 0 : index
    %1209 = vector.load %arg9[%c1_569, %c4_570, %c0_571, %c0_572] : memref<4x8x4x16xf32, #tpu.memory_space<vmem>>, vector<1x1x4x16xf32>
    %1210 = vector.shape_cast %1209 : vector<1x1x4x16xf32> to vector<4x16xf32>
    %1211 = vector.broadcast %1208 : vector<4x1xf32> to vector<4x16xf32>
    %1212 = arith.mulf %1211, %1210 : vector<4x16xf32>
    %1213 = arith.addf %1207, %1212 : vector<4x16xf32>
    %1214 = vector.extract_strided_slice %1151 {offsets = [0, 5], sizes = [4, 1], strides = [1, 1]} : vector<4x8xf32> to vector<4x1xf32>
    %c1_573 = arith.constant 1 : index
    %c5_574 = arith.constant 5 : index
    %c0_575 = arith.constant 0 : index
    %c0_576 = arith.constant 0 : index
    %1215 = vector.load %arg8[%c1_573, %c5_574, %c0_575, %c0_576] : memref<4x8x4x16xf32, #tpu.memory_space<vmem>>, vector<1x1x4x16xf32>
    %1216 = vector.shape_cast %1215 : vector<1x1x4x16xf32> to vector<4x16xf32>
    %1217 = vector.broadcast %1214 : vector<4x1xf32> to vector<4x16xf32>
    %1218 = arith.mulf %1217, %1216 : vector<4x16xf32>
    %1219 = arith.addf %1213, %1218 : vector<4x16xf32>
    %1220 = vector.extract_strided_slice %1152 {offsets = [0, 5], sizes = [4, 1], strides = [1, 1]} : vector<4x8xf32> to vector<4x1xf32>
    %c1_577 = arith.constant 1 : index
    %c5_578 = arith.constant 5 : index
    %c0_579 = arith.constant 0 : index
    %c0_580 = arith.constant 0 : index
    %1221 = vector.load %arg9[%c1_577, %c5_578, %c0_579, %c0_580] : memref<4x8x4x16xf32, #tpu.memory_space<vmem>>, vector<1x1x4x16xf32>
    %1222 = vector.shape_cast %1221 : vector<1x1x4x16xf32> to vector<4x16xf32>
    %1223 = vector.broadcast %1220 : vector<4x1xf32> to vector<4x16xf32>
    %1224 = arith.mulf %1223, %1222 : vector<4x16xf32>
    %1225 = arith.addf %1219, %1224 : vector<4x16xf32>
    %1226 = vector.extract_strided_slice %1151 {offsets = [0, 6], sizes = [4, 1], strides = [1, 1]} : vector<4x8xf32> to vector<4x1xf32>
    %c1_581 = arith.constant 1 : index
    %c6_582 = arith.constant 6 : index
    %c0_583 = arith.constant 0 : index
    %c0_584 = arith.constant 0 : index
    %1227 = vector.load %arg8[%c1_581, %c6_582, %c0_583, %c0_584] : memref<4x8x4x16xf32, #tpu.memory_space<vmem>>, vector<1x1x4x16xf32>
    %1228 = vector.shape_cast %1227 : vector<1x1x4x16xf32> to vector<4x16xf32>
    %1229 = vector.broadcast %1226 : vector<4x1xf32> to vector<4x16xf32>
    %1230 = arith.mulf %1229, %1228 : vector<4x16xf32>
    %1231 = arith.addf %1225, %1230 : vector<4x16xf32>
    %1232 = vector.extract_strided_slice %1152 {offsets = [0, 6], sizes = [4, 1], strides = [1, 1]} : vector<4x8xf32> to vector<4x1xf32>
    %c1_585 = arith.constant 1 : index
    %c6_586 = arith.constant 6 : index
    %c0_587 = arith.constant 0 : index
    %c0_588 = arith.constant 0 : index
    %1233 = vector.load %arg9[%c1_585, %c6_586, %c0_587, %c0_588] : memref<4x8x4x16xf32, #tpu.memory_space<vmem>>, vector<1x1x4x16xf32>
    %1234 = vector.shape_cast %1233 : vector<1x1x4x16xf32> to vector<4x16xf32>
    %1235 = vector.broadcast %1232 : vector<4x1xf32> to vector<4x16xf32>
    %1236 = arith.mulf %1235, %1234 : vector<4x16xf32>
    %1237 = arith.addf %1231, %1236 : vector<4x16xf32>
    %1238 = vector.extract_strided_slice %1151 {offsets = [0, 7], sizes = [4, 1], strides = [1, 1]} : vector<4x8xf32> to vector<4x1xf32>
    %c1_589 = arith.constant 1 : index
    %c7_590 = arith.constant 7 : index
    %c0_591 = arith.constant 0 : index
    %c0_592 = arith.constant 0 : index
    %1239 = vector.load %arg8[%c1_589, %c7_590, %c0_591, %c0_592] : memref<4x8x4x16xf32, #tpu.memory_space<vmem>>, vector<1x1x4x16xf32>
    %1240 = vector.shape_cast %1239 : vector<1x1x4x16xf32> to vector<4x16xf32>
    %1241 = vector.broadcast %1238 : vector<4x1xf32> to vector<4x16xf32>
    %1242 = arith.mulf %1241, %1240 : vector<4x16xf32>
    %1243 = arith.addf %1237, %1242 : vector<4x16xf32>
    %1244 = vector.extract_strided_slice %1152 {offsets = [0, 7], sizes = [4, 1], strides = [1, 1]} : vector<4x8xf32> to vector<4x1xf32>
    %c1_593 = arith.constant 1 : index
    %c7_594 = arith.constant 7 : index
    %c0_595 = arith.constant 0 : index
    %c0_596 = arith.constant 0 : index
    %1245 = vector.load %arg9[%c1_593, %c7_594, %c0_595, %c0_596] : memref<4x8x4x16xf32, #tpu.memory_space<vmem>>, vector<1x1x4x16xf32>
    %1246 = vector.shape_cast %1245 : vector<1x1x4x16xf32> to vector<4x16xf32>
    %1247 = vector.broadcast %1244 : vector<4x1xf32> to vector<4x16xf32>
    %1248 = arith.mulf %1247, %1246 : vector<4x16xf32>
    %1249 = arith.addf %1243, %1248 : vector<4x16xf32>
    %1250 = vector.extract_strided_slice %1249 {offsets = [0, 0], sizes = [4, 8], strides = [1, 1]} : vector<4x16xf32> to vector<4x8xf32>
    %1251 = vector.extract_strided_slice %1249 {offsets = [0, 8], sizes = [4, 8], strides = [1, 1]} : vector<4x16xf32> to vector<4x8xf32>
    %1252 = tpu.concatenate %1250, %1251 in 0 : vector<4x8xf32>, vector<4x8xf32> -> vector<8x8xf32>
    %c0_597 = arith.constant 0 : index
    %c40 = arith.constant 40 : index
    %1253 = vector.load %arg11[%c0_597, %c40] : memref<8x64xf32, #tpu.memory_space<vmem>>, vector<8x8xf32>
    tpu.vector_store %arg11[%c0_597, %c40], %1252 {strides = array<i32>} : memref<8x64xf32, #tpu.memory_space<vmem>>, vector<8x8xf32>,
    %1254 = vector.extract_strided_slice %3 {offsets = [0, 48], sizes = [8, 8], strides = [1, 1]} : vector<8x64xf32> to vector<8x8xf32>
    %1255 = vector.extract_strided_slice %7 {offsets = [0, 48], sizes = [8, 8], strides = [1, 1]} : vector<8x64xf32> to vector<8x8xf32>
    %1256 = vector.extract_strided_slice %11 {offsets = [0, 48], sizes = [8, 8], strides = [1, 1]} : vector<8x64xf32> to vector<8x8xf32>
    %1257 = vector.extract_strided_slice %1254 {offsets = [0, 0], sizes = [4, 8], strides = [1, 1]} : vector<8x8xf32> to vector<4x8xf32>
    %1258 = vector.extract_strided_slice %1254 {offsets = [4, 0], sizes = [4, 8], strides = [1, 1]} : vector<8x8xf32> to vector<4x8xf32>
    %1259 = vector.extract_strided_slice %1255 {offsets = [0, 0], sizes = [4, 8], strides = [1, 1]} : vector<8x8xf32> to vector<4x8xf32>
    %1260 = vector.extract_strided_slice %1255 {offsets = [4, 0], sizes = [4, 8], strides = [1, 1]} : vector<8x8xf32> to vector<4x8xf32>
    %cst_598 = arith.constant 0.000000e+00 : f32
    %1261 = vector.broadcast %cst_598 : f32 to vector<4x8xf32>
    %1262 = arith.subf %1261, %1258 : vector<4x8xf32>
    %1263 = tpu.concatenate %1257, %1262 in 1 : vector<4x8xf32>, vector<4x8xf32> -> vector<4x16xf32>
    %1264 = tpu.concatenate %1258, %1257 in 1 : vector<4x8xf32>, vector<4x8xf32> -> vector<4x16xf32>
    %1265 = tpu.concatenate %1263, %1264 in 0 : vector<4x16xf32>, vector<4x16xf32> -> vector<8x16xf32>
    %1266 = tpu.concatenate %1259, %1260 in 1 : vector<4x8xf32>, vector<4x8xf32> -> vector<4x16xf32>
    %cst_599 = arith.constant dense<0.000000e+00> : vector<8x4xf32>
    %1267 = tpu.matmul %1265, %1266, %cst_599 {dimension_numbers = #tpu.dot_dimension_numbers<[1], [1], [0], [0], [0, 0, 1, 0], [], []>} : vector<8x16xf32>, vector<4x16xf32>, vector<8x4xf32> -> vector<8x4xf32>
    %1268 = vector.extract_strided_slice %1267 {offsets = [0, 0], sizes = [4, 4], strides = [1, 1]} : vector<8x4xf32> to vector<4x4xf32>
    %1269 = vector.extract_strided_slice %1267 {offsets = [4, 0], sizes = [4, 4], strides = [1, 1]} : vector<8x4xf32> to vector<4x4xf32>
    %cst_600 = arith.constant 2.000000e+00 : f32
    %1270 = vector.broadcast %cst_600 : f32 to vector<4x4xf32>
    %1271 = arith.mulf %1270, %1268 : vector<4x4xf32>
    %cst_601 = arith.constant -5.000000e+01 : f32
    %cst_602 = arith.constant 5.000000e+01 : f32
    %1272 = vector.broadcast %cst_601 : f32 to vector<4x4xf32>
    %1273 = arith.maximumf %1272, %1271 : vector<4x4xf32>
    %1274 = vector.broadcast %cst_602 : f32 to vector<4x4xf32>
    %1275 = arith.minimumf %1274, %1273 : vector<4x4xf32>
    %cst_603 = arith.constant 2.000000e+00 : f32
    %1276 = vector.broadcast %cst_603 : f32 to vector<4x4xf32>
    %1277 = arith.mulf %1276, %1269 : vector<4x4xf32>
    %cst_604 = arith.constant 0.318309873 : f32
    %1278 = vector.broadcast %cst_604 : f32 to vector<4x4xf32>
    %1279 = arith.mulf %1277, %1278 : vector<4x4xf32>
    %cst_605 = arith.constant 5.000000e-01 : f32
    %1280 = vector.broadcast %cst_605 : f32 to vector<4x4xf32>
    %1281 = arith.addf %1279, %1280 : vector<4x4xf32>
    %1282 = math.floor %1281 : vector<4x4xf32>
    %cst_606 = arith.constant 3.140625 : f32
    %1283 = vector.broadcast %cst_606 : f32 to vector<4x4xf32>
    %1284 = arith.mulf %1282, %1283 : vector<4x4xf32>
    %1285 = arith.subf %1277, %1284 : vector<4x4xf32>
    %cst_607 = arith.constant 9.67653584E-4 : f32
    %1286 = vector.broadcast %cst_607 : f32 to vector<4x4xf32>
    %1287 = arith.mulf %1282, %1286 : vector<4x4xf32>
    %1288 = arith.subf %1285, %1287 : vector<4x4xf32>
    %cst_608 = arith.constant 5.000000e-01 : f32
    %1289 = vector.broadcast %cst_608 : f32 to vector<4x4xf32>
    %1290 = arith.mulf %1282, %1289 : vector<4x4xf32>
    %1291 = math.floor %1290 : vector<4x4xf32>
    %cst_609 = arith.constant 2.000000e+00 : f32
    %1292 = vector.broadcast %cst_609 : f32 to vector<4x4xf32>
    %1293 = arith.mulf %1292, %1291 : vector<4x4xf32>
    %1294 = arith.subf %1282, %1293 : vector<4x4xf32>
    %cst_610 = arith.constant 2.000000e+00 : f32
    %1295 = vector.broadcast %cst_610 : f32 to vector<4x4xf32>
    %1296 = arith.mulf %1295, %1294 : vector<4x4xf32>
    %cst_611 = arith.constant 1.000000e+00 : f32
    %1297 = vector.broadcast %cst_611 : f32 to vector<4x4xf32>
    %1298 = arith.subf %1297, %1296 : vector<4x4xf32>
    %1299 = arith.mulf %1288, %1288 : vector<4x4xf32>
    %cst_612 = arith.constant -2.50521079E-8 : f32
    %1300 = vector.broadcast %cst_612 : f32 to vector<4x4xf32>
    %1301 = arith.mulf %1299, %1300 : vector<4x4xf32>
    %cst_613 = arith.constant 2.75573188E-6 : f32
    %1302 = vector.broadcast %cst_613 : f32 to vector<4x4xf32>
    %1303 = arith.addf %1302, %1301 : vector<4x4xf32>
    %1304 = arith.mulf %1299, %1303 : vector<4x4xf32>
    %cst_614 = arith.constant -1.98412701E-4 : f32
    %1305 = vector.broadcast %cst_614 : f32 to vector<4x4xf32>
    %1306 = arith.addf %1305, %1304 : vector<4x4xf32>
    %1307 = arith.mulf %1299, %1306 : vector<4x4xf32>
    %cst_615 = arith.constant 0.00833333377 : f32
    %1308 = vector.broadcast %cst_615 : f32 to vector<4x4xf32>
    %1309 = arith.addf %1308, %1307 : vector<4x4xf32>
    %1310 = arith.mulf %1299, %1309 : vector<4x4xf32>
    %cst_616 = arith.constant -0.166666672 : f32
    %1311 = vector.broadcast %cst_616 : f32 to vector<4x4xf32>
    %1312 = arith.addf %1311, %1310 : vector<4x4xf32>
    %1313 = arith.mulf %1299, %1312 : vector<4x4xf32>
    %cst_617 = arith.constant 1.000000e+00 : f32
    %1314 = vector.broadcast %cst_617 : f32 to vector<4x4xf32>
    %1315 = arith.addf %1314, %1313 : vector<4x4xf32>
    %1316 = arith.mulf %1288, %1315 : vector<4x4xf32>
    %cst_618 = arith.constant 2.08767559E-9 : f32
    %1317 = vector.broadcast %cst_618 : f32 to vector<4x4xf32>
    %1318 = arith.mulf %1299, %1317 : vector<4x4xf32>
    %cst_619 = arith.constant -2.755732E-7 : f32
    %1319 = vector.broadcast %cst_619 : f32 to vector<4x4xf32>
    %1320 = arith.addf %1319, %1318 : vector<4x4xf32>
    %1321 = arith.mulf %1299, %1320 : vector<4x4xf32>
    %cst_620 = arith.constant 2.48015876E-5 : f32
    %1322 = vector.broadcast %cst_620 : f32 to vector<4x4xf32>
    %1323 = arith.addf %1322, %1321 : vector<4x4xf32>
    %1324 = arith.mulf %1299, %1323 : vector<4x4xf32>
    %cst_621 = arith.constant -0.00138888892 : f32
    %1325 = vector.broadcast %cst_621 : f32 to vector<4x4xf32>
    %1326 = arith.addf %1325, %1324 : vector<4x4xf32>
    %1327 = arith.mulf %1299, %1326 : vector<4x4xf32>
    %cst_622 = arith.constant 0.0416666679 : f32
    %1328 = vector.broadcast %cst_622 : f32 to vector<4x4xf32>
    %1329 = arith.addf %1328, %1327 : vector<4x4xf32>
    %1330 = arith.mulf %1299, %1329 : vector<4x4xf32>
    %cst_623 = arith.constant -5.000000e-01 : f32
    %1331 = vector.broadcast %cst_623 : f32 to vector<4x4xf32>
    %1332 = arith.addf %1331, %1330 : vector<4x4xf32>
    %1333 = arith.mulf %1299, %1332 : vector<4x4xf32>
    %cst_624 = arith.constant 1.000000e+00 : f32
    %1334 = vector.broadcast %cst_624 : f32 to vector<4x4xf32>
    %1335 = arith.addf %1334, %1333 : vector<4x4xf32>
    %1336 = arith.mulf %1298, %1316 : vector<4x4xf32>
    %1337 = arith.mulf %1298, %1335 : vector<4x4xf32>
    %1338 = math.exp %1275 : vector<4x4xf32>
    %cst_625 = arith.constant 0.000000e+00 : f32
    %1339 = vector.broadcast %cst_625 : f32 to vector<4x4xf32>
    %1340 = arith.subf %1339, %1275 : vector<4x4xf32>
    %1341 = math.exp %1340 : vector<4x4xf32>
    %1342 = arith.addf %1338, %1341 : vector<4x4xf32>
    %cst_626 = arith.constant 2.000000e+00 : f32
    %1343 = vector.broadcast %cst_626 : f32 to vector<4x4xf32>
    %1344 = arith.mulf %1343, %1337 : vector<4x4xf32>
    %1345 = arith.addf %1342, %1344 : vector<4x4xf32>
    %1346 = tpu.reciprocal %1345 {approx = true} : vector<4x4xf32> -> vector<4x4xf32>
    %1347 = arith.subf %1338, %1341 : vector<4x4xf32>
    %1348 = arith.mulf %1347, %1346 : vector<4x4xf32>
    %cst_627 = arith.constant 2.000000e+00 : f32
    %1349 = vector.broadcast %cst_627 : f32 to vector<4x4xf32>
    %1350 = arith.mulf %1349, %1336 : vector<4x4xf32>
    %1351 = arith.mulf %1350, %1346 : vector<4x4xf32>
    %cst_628 = arith.constant 0.000000e+00 : f32
    %1352 = vector.broadcast %cst_628 : f32 to vector<4x4xf32>
    %1353 = arith.subf %1352, %1351 : vector<4x4xf32>
    %1354 = tpu.concatenate %1348, %1353 in 1 : vector<4x4xf32>, vector<4x4xf32> -> vector<4x8xf32>
    %1355 = tpu.concatenate %1351, %1348 in 1 : vector<4x4xf32>, vector<4x4xf32> -> vector<4x8xf32>
    %1356 = tpu.concatenate %1354, %1355 in 0 : vector<4x8xf32>, vector<4x8xf32> -> vector<8x8xf32>
    %cst_629 = arith.constant dense<0.000000e+00> : vector<8x8xf32>
    %1357 = tpu.matmul %1356, %1256, %cst_629 {dimension_numbers = #tpu.dot_dimension_numbers<[1], [0], [0], [1], [0, 0, 1, 1], [], []>} : vector<8x8xf32>, vector<8x8xf32>, vector<8x8xf32> -> vector<8x8xf32>
    %1358 = vector.extract_strided_slice %1357 {offsets = [0, 0], sizes = [4, 8], strides = [1, 1]} : vector<8x8xf32> to vector<4x8xf32>
    %1359 = vector.extract_strided_slice %1357 {offsets = [4, 0], sizes = [4, 8], strides = [1, 1]} : vector<8x8xf32> to vector<4x8xf32>
    %cst_630 = arith.constant 0.000000e+00 : f32
    %1360 = vector.broadcast %cst_630 : f32 to vector<4x16xf32>
    %1361 = vector.extract_strided_slice %1358 {offsets = [0, 0], sizes = [4, 1], strides = [1, 1]} : vector<4x8xf32> to vector<4x1xf32>
    %c2_631 = arith.constant 2 : index
    %c0_632 = arith.constant 0 : index
    %c0_633 = arith.constant 0 : index
    %c0_634 = arith.constant 0 : index
    %1362 = vector.load %arg8[%c2_631, %c0_632, %c0_633, %c0_634] : memref<4x8x4x16xf32, #tpu.memory_space<vmem>>, vector<1x1x4x16xf32>
    %1363 = vector.shape_cast %1362 : vector<1x1x4x16xf32> to vector<4x16xf32>
    %1364 = vector.broadcast %1361 : vector<4x1xf32> to vector<4x16xf32>
    %1365 = arith.mulf %1364, %1363 : vector<4x16xf32>
    %1366 = arith.addf %1360, %1365 : vector<4x16xf32>
    %1367 = vector.extract_strided_slice %1359 {offsets = [0, 0], sizes = [4, 1], strides = [1, 1]} : vector<4x8xf32> to vector<4x1xf32>
    %c2_635 = arith.constant 2 : index
    %c0_636 = arith.constant 0 : index
    %c0_637 = arith.constant 0 : index
    %c0_638 = arith.constant 0 : index
    %1368 = vector.load %arg9[%c2_635, %c0_636, %c0_637, %c0_638] : memref<4x8x4x16xf32, #tpu.memory_space<vmem>>, vector<1x1x4x16xf32>
    %1369 = vector.shape_cast %1368 : vector<1x1x4x16xf32> to vector<4x16xf32>
    %1370 = vector.broadcast %1367 : vector<4x1xf32> to vector<4x16xf32>
    %1371 = arith.mulf %1370, %1369 : vector<4x16xf32>
    %1372 = arith.addf %1366, %1371 : vector<4x16xf32>
    %1373 = vector.extract_strided_slice %1358 {offsets = [0, 1], sizes = [4, 1], strides = [1, 1]} : vector<4x8xf32> to vector<4x1xf32>
    %c2_639 = arith.constant 2 : index
    %c1_640 = arith.constant 1 : index
    %c0_641 = arith.constant 0 : index
    %c0_642 = arith.constant 0 : index
    %1374 = vector.load %arg8[%c2_639, %c1_640, %c0_641, %c0_642] : memref<4x8x4x16xf32, #tpu.memory_space<vmem>>, vector<1x1x4x16xf32>
    %1375 = vector.shape_cast %1374 : vector<1x1x4x16xf32> to vector<4x16xf32>
    %1376 = vector.broadcast %1373 : vector<4x1xf32> to vector<4x16xf32>
    %1377 = arith.mulf %1376, %1375 : vector<4x16xf32>
    %1378 = arith.addf %1372, %1377 : vector<4x16xf32>
    %1379 = vector.extract_strided_slice %1359 {offsets = [0, 1], sizes = [4, 1], strides = [1, 1]} : vector<4x8xf32> to vector<4x1xf32>
    %c2_643 = arith.constant 2 : index
    %c1_644 = arith.constant 1 : index
    %c0_645 = arith.constant 0 : index
    %c0_646 = arith.constant 0 : index
    %1380 = vector.load %arg9[%c2_643, %c1_644, %c0_645, %c0_646] : memref<4x8x4x16xf32, #tpu.memory_space<vmem>>, vector<1x1x4x16xf32>
    %1381 = vector.shape_cast %1380 : vector<1x1x4x16xf32> to vector<4x16xf32>
    %1382 = vector.broadcast %1379 : vector<4x1xf32> to vector<4x16xf32>
    %1383 = arith.mulf %1382, %1381 : vector<4x16xf32>
    %1384 = arith.addf %1378, %1383 : vector<4x16xf32>
    %1385 = vector.extract_strided_slice %1358 {offsets = [0, 2], sizes = [4, 1], strides = [1, 1]} : vector<4x8xf32> to vector<4x1xf32>
    %c2_647 = arith.constant 2 : index
    %c2_648 = arith.constant 2 : index
    %c0_649 = arith.constant 0 : index
    %c0_650 = arith.constant 0 : index
    %1386 = vector.load %arg8[%c2_647, %c2_648, %c0_649, %c0_650] : memref<4x8x4x16xf32, #tpu.memory_space<vmem>>, vector<1x1x4x16xf32>
    %1387 = vector.shape_cast %1386 : vector<1x1x4x16xf32> to vector<4x16xf32>
    %1388 = vector.broadcast %1385 : vector<4x1xf32> to vector<4x16xf32>
    %1389 = arith.mulf %1388, %1387 : vector<4x16xf32>
    %1390 = arith.addf %1384, %1389 : vector<4x16xf32>
    %1391 = vector.extract_strided_slice %1359 {offsets = [0, 2], sizes = [4, 1], strides = [1, 1]} : vector<4x8xf32> to vector<4x1xf32>
    %c2_651 = arith.constant 2 : index
    %c2_652 = arith.constant 2 : index
    %c0_653 = arith.constant 0 : index
    %c0_654 = arith.constant 0 : index
    %1392 = vector.load %arg9[%c2_651, %c2_652, %c0_653, %c0_654] : memref<4x8x4x16xf32, #tpu.memory_space<vmem>>, vector<1x1x4x16xf32>
    %1393 = vector.shape_cast %1392 : vector<1x1x4x16xf32> to vector<4x16xf32>
    %1394 = vector.broadcast %1391 : vector<4x1xf32> to vector<4x16xf32>
    %1395 = arith.mulf %1394, %1393 : vector<4x16xf32>
    %1396 = arith.addf %1390, %1395 : vector<4x16xf32>
    %1397 = vector.extract_strided_slice %1358 {offsets = [0, 3], sizes = [4, 1], strides = [1, 1]} : vector<4x8xf32> to vector<4x1xf32>
    %c2_655 = arith.constant 2 : index
    %c3_656 = arith.constant 3 : index
    %c0_657 = arith.constant 0 : index
    %c0_658 = arith.constant 0 : index
    %1398 = vector.load %arg8[%c2_655, %c3_656, %c0_657, %c0_658] : memref<4x8x4x16xf32, #tpu.memory_space<vmem>>, vector<1x1x4x16xf32>
    %1399 = vector.shape_cast %1398 : vector<1x1x4x16xf32> to vector<4x16xf32>
    %1400 = vector.broadcast %1397 : vector<4x1xf32> to vector<4x16xf32>
    %1401 = arith.mulf %1400, %1399 : vector<4x16xf32>
    %1402 = arith.addf %1396, %1401 : vector<4x16xf32>
    %1403 = vector.extract_strided_slice %1359 {offsets = [0, 3], sizes = [4, 1], strides = [1, 1]} : vector<4x8xf32> to vector<4x1xf32>
    %c2_659 = arith.constant 2 : index
    %c3_660 = arith.constant 3 : index
    %c0_661 = arith.constant 0 : index
    %c0_662 = arith.constant 0 : index
    %1404 = vector.load %arg9[%c2_659, %c3_660, %c0_661, %c0_662] : memref<4x8x4x16xf32, #tpu.memory_space<vmem>>, vector<1x1x4x16xf32>
    %1405 = vector.shape_cast %1404 : vector<1x1x4x16xf32> to vector<4x16xf32>
    %1406 = vector.broadcast %1403 : vector<4x1xf32> to vector<4x16xf32>
    %1407 = arith.mulf %1406, %1405 : vector<4x16xf32>
    %1408 = arith.addf %1402, %1407 : vector<4x16xf32>
    %1409 = vector.extract_strided_slice %1358 {offsets = [0, 4], sizes = [4, 1], strides = [1, 1]} : vector<4x8xf32> to vector<4x1xf32>
    %c2_663 = arith.constant 2 : index
    %c4_664 = arith.constant 4 : index
    %c0_665 = arith.constant 0 : index
    %c0_666 = arith.constant 0 : index
    %1410 = vector.load %arg8[%c2_663, %c4_664, %c0_665, %c0_666] : memref<4x8x4x16xf32, #tpu.memory_space<vmem>>, vector<1x1x4x16xf32>
    %1411 = vector.shape_cast %1410 : vector<1x1x4x16xf32> to vector<4x16xf32>
    %1412 = vector.broadcast %1409 : vector<4x1xf32> to vector<4x16xf32>
    %1413 = arith.mulf %1412, %1411 : vector<4x16xf32>
    %1414 = arith.addf %1408, %1413 : vector<4x16xf32>
    %1415 = vector.extract_strided_slice %1359 {offsets = [0, 4], sizes = [4, 1], strides = [1, 1]} : vector<4x8xf32> to vector<4x1xf32>
    %c2_667 = arith.constant 2 : index
    %c4_668 = arith.constant 4 : index
    %c0_669 = arith.constant 0 : index
    %c0_670 = arith.constant 0 : index
    %1416 = vector.load %arg9[%c2_667, %c4_668, %c0_669, %c0_670] : memref<4x8x4x16xf32, #tpu.memory_space<vmem>>, vector<1x1x4x16xf32>
    %1417 = vector.shape_cast %1416 : vector<1x1x4x16xf32> to vector<4x16xf32>
    %1418 = vector.broadcast %1415 : vector<4x1xf32> to vector<4x16xf32>
    %1419 = arith.mulf %1418, %1417 : vector<4x16xf32>
    %1420 = arith.addf %1414, %1419 : vector<4x16xf32>
    %1421 = vector.extract_strided_slice %1358 {offsets = [0, 5], sizes = [4, 1], strides = [1, 1]} : vector<4x8xf32> to vector<4x1xf32>
    %c2_671 = arith.constant 2 : index
    %c5_672 = arith.constant 5 : index
    %c0_673 = arith.constant 0 : index
    %c0_674 = arith.constant 0 : index
    %1422 = vector.load %arg8[%c2_671, %c5_672, %c0_673, %c0_674] : memref<4x8x4x16xf32, #tpu.memory_space<vmem>>, vector<1x1x4x16xf32>
    %1423 = vector.shape_cast %1422 : vector<1x1x4x16xf32> to vector<4x16xf32>
    %1424 = vector.broadcast %1421 : vector<4x1xf32> to vector<4x16xf32>
    %1425 = arith.mulf %1424, %1423 : vector<4x16xf32>
    %1426 = arith.addf %1420, %1425 : vector<4x16xf32>
    %1427 = vector.extract_strided_slice %1359 {offsets = [0, 5], sizes = [4, 1], strides = [1, 1]} : vector<4x8xf32> to vector<4x1xf32>
    %c2_675 = arith.constant 2 : index
    %c5_676 = arith.constant 5 : index
    %c0_677 = arith.constant 0 : index
    %c0_678 = arith.constant 0 : index
    %1428 = vector.load %arg9[%c2_675, %c5_676, %c0_677, %c0_678] : memref<4x8x4x16xf32, #tpu.memory_space<vmem>>, vector<1x1x4x16xf32>
    %1429 = vector.shape_cast %1428 : vector<1x1x4x16xf32> to vector<4x16xf32>
    %1430 = vector.broadcast %1427 : vector<4x1xf32> to vector<4x16xf32>
    %1431 = arith.mulf %1430, %1429 : vector<4x16xf32>
    %1432 = arith.addf %1426, %1431 : vector<4x16xf32>
    %1433 = vector.extract_strided_slice %1358 {offsets = [0, 6], sizes = [4, 1], strides = [1, 1]} : vector<4x8xf32> to vector<4x1xf32>
    %c2_679 = arith.constant 2 : index
    %c6_680 = arith.constant 6 : index
    %c0_681 = arith.constant 0 : index
    %c0_682 = arith.constant 0 : index
    %1434 = vector.load %arg8[%c2_679, %c6_680, %c0_681, %c0_682] : memref<4x8x4x16xf32, #tpu.memory_space<vmem>>, vector<1x1x4x16xf32>
    %1435 = vector.shape_cast %1434 : vector<1x1x4x16xf32> to vector<4x16xf32>
    %1436 = vector.broadcast %1433 : vector<4x1xf32> to vector<4x16xf32>
    %1437 = arith.mulf %1436, %1435 : vector<4x16xf32>
    %1438 = arith.addf %1432, %1437 : vector<4x16xf32>
    %1439 = vector.extract_strided_slice %1359 {offsets = [0, 6], sizes = [4, 1], strides = [1, 1]} : vector<4x8xf32> to vector<4x1xf32>
    %c2_683 = arith.constant 2 : index
    %c6_684 = arith.constant 6 : index
    %c0_685 = arith.constant 0 : index
    %c0_686 = arith.constant 0 : index
    %1440 = vector.load %arg9[%c2_683, %c6_684, %c0_685, %c0_686] : memref<4x8x4x16xf32, #tpu.memory_space<vmem>>, vector<1x1x4x16xf32>
    %1441 = vector.shape_cast %1440 : vector<1x1x4x16xf32> to vector<4x16xf32>
    %1442 = vector.broadcast %1439 : vector<4x1xf32> to vector<4x16xf32>
    %1443 = arith.mulf %1442, %1441 : vector<4x16xf32>
    %1444 = arith.addf %1438, %1443 : vector<4x16xf32>
    %1445 = vector.extract_strided_slice %1358 {offsets = [0, 7], sizes = [4, 1], strides = [1, 1]} : vector<4x8xf32> to vector<4x1xf32>
    %c2_687 = arith.constant 2 : index
    %c7_688 = arith.constant 7 : index
    %c0_689 = arith.constant 0 : index
    %c0_690 = arith.constant 0 : index
    %1446 = vector.load %arg8[%c2_687, %c7_688, %c0_689, %c0_690] : memref<4x8x4x16xf32, #tpu.memory_space<vmem>>, vector<1x1x4x16xf32>
    %1447 = vector.shape_cast %1446 : vector<1x1x4x16xf32> to vector<4x16xf32>
    %1448 = vector.broadcast %1445 : vector<4x1xf32> to vector<4x16xf32>
    %1449 = arith.mulf %1448, %1447 : vector<4x16xf32>
    %1450 = arith.addf %1444, %1449 : vector<4x16xf32>
    %1451 = vector.extract_strided_slice %1359 {offsets = [0, 7], sizes = [4, 1], strides = [1, 1]} : vector<4x8xf32> to vector<4x1xf32>
    %c2_691 = arith.constant 2 : index
    %c7_692 = arith.constant 7 : index
    %c0_693 = arith.constant 0 : index
    %c0_694 = arith.constant 0 : index
    %1452 = vector.load %arg9[%c2_691, %c7_692, %c0_693, %c0_694] : memref<4x8x4x16xf32, #tpu.memory_space<vmem>>, vector<1x1x4x16xf32>
    %1453 = vector.shape_cast %1452 : vector<1x1x4x16xf32> to vector<4x16xf32>
    %1454 = vector.broadcast %1451 : vector<4x1xf32> to vector<4x16xf32>
    %1455 = arith.mulf %1454, %1453 : vector<4x16xf32>
    %1456 = arith.addf %1450, %1455 : vector<4x16xf32>
    %1457 = vector.extract_strided_slice %1456 {offsets = [0, 0], sizes = [4, 8], strides = [1, 1]} : vector<4x16xf32> to vector<4x8xf32>
    %1458 = vector.extract_strided_slice %1456 {offsets = [0, 8], sizes = [4, 8], strides = [1, 1]} : vector<4x16xf32> to vector<4x8xf32>
    %1459 = tpu.concatenate %1457, %1458 in 0 : vector<4x8xf32>, vector<4x8xf32> -> vector<8x8xf32>
    %c0_695 = arith.constant 0 : index
    %c48 = arith.constant 48 : index
    %1460 = vector.load %arg11[%c0_695, %c48] : memref<8x64xf32, #tpu.memory_space<vmem>>, vector<8x8xf32>
    tpu.vector_store %arg11[%c0_695, %c48], %1459 {strides = array<i32>} : memref<8x64xf32, #tpu.memory_space<vmem>>, vector<8x8xf32>,
    %1461 = vector.extract_strided_slice %3 {offsets = [0, 56], sizes = [8, 8], strides = [1, 1]} : vector<8x64xf32> to vector<8x8xf32>
    %1462 = vector.extract_strided_slice %7 {offsets = [0, 56], sizes = [8, 8], strides = [1, 1]} : vector<8x64xf32> to vector<8x8xf32>
    %1463 = vector.extract_strided_slice %11 {offsets = [0, 56], sizes = [8, 8], strides = [1, 1]} : vector<8x64xf32> to vector<8x8xf32>
    %1464 = vector.extract_strided_slice %1461 {offsets = [0, 0], sizes = [4, 8], strides = [1, 1]} : vector<8x8xf32> to vector<4x8xf32>
    %1465 = vector.extract_strided_slice %1461 {offsets = [4, 0], sizes = [4, 8], strides = [1, 1]} : vector<8x8xf32> to vector<4x8xf32>
    %1466 = vector.extract_strided_slice %1462 {offsets = [0, 0], sizes = [4, 8], strides = [1, 1]} : vector<8x8xf32> to vector<4x8xf32>
    %1467 = vector.extract_strided_slice %1462 {offsets = [4, 0], sizes = [4, 8], strides = [1, 1]} : vector<8x8xf32> to vector<4x8xf32>
    %cst_696 = arith.constant 0.000000e+00 : f32
    %1468 = vector.broadcast %cst_696 : f32 to vector<4x8xf32>
    %1469 = arith.subf %1468, %1465 : vector<4x8xf32>
    %1470 = tpu.concatenate %1464, %1469 in 1 : vector<4x8xf32>, vector<4x8xf32> -> vector<4x16xf32>
    %1471 = tpu.concatenate %1465, %1464 in 1 : vector<4x8xf32>, vector<4x8xf32> -> vector<4x16xf32>
    %1472 = tpu.concatenate %1470, %1471 in 0 : vector<4x16xf32>, vector<4x16xf32> -> vector<8x16xf32>
    %1473 = tpu.concatenate %1466, %1467 in 1 : vector<4x8xf32>, vector<4x8xf32> -> vector<4x16xf32>
    %cst_697 = arith.constant dense<0.000000e+00> : vector<8x4xf32>
    %1474 = tpu.matmul %1472, %1473, %cst_697 {dimension_numbers = #tpu.dot_dimension_numbers<[1], [1], [0], [0], [0, 0, 1, 0], [], []>} : vector<8x16xf32>, vector<4x16xf32>, vector<8x4xf32> -> vector<8x4xf32>
    %1475 = vector.extract_strided_slice %1474 {offsets = [0, 0], sizes = [4, 4], strides = [1, 1]} : vector<8x4xf32> to vector<4x4xf32>
    %1476 = vector.extract_strided_slice %1474 {offsets = [4, 0], sizes = [4, 4], strides = [1, 1]} : vector<8x4xf32> to vector<4x4xf32>
    %cst_698 = arith.constant 2.000000e+00 : f32
    %1477 = vector.broadcast %cst_698 : f32 to vector<4x4xf32>
    %1478 = arith.mulf %1477, %1475 : vector<4x4xf32>
    %cst_699 = arith.constant -5.000000e+01 : f32
    %cst_700 = arith.constant 5.000000e+01 : f32
    %1479 = vector.broadcast %cst_699 : f32 to vector<4x4xf32>
    %1480 = arith.maximumf %1479, %1478 : vector<4x4xf32>
    %1481 = vector.broadcast %cst_700 : f32 to vector<4x4xf32>
    %1482 = arith.minimumf %1481, %1480 : vector<4x4xf32>
    %cst_701 = arith.constant 2.000000e+00 : f32
    %1483 = vector.broadcast %cst_701 : f32 to vector<4x4xf32>
    %1484 = arith.mulf %1483, %1476 : vector<4x4xf32>
    %cst_702 = arith.constant 0.318309873 : f32
    %1485 = vector.broadcast %cst_702 : f32 to vector<4x4xf32>
    %1486 = arith.mulf %1484, %1485 : vector<4x4xf32>
    %cst_703 = arith.constant 5.000000e-01 : f32
    %1487 = vector.broadcast %cst_703 : f32 to vector<4x4xf32>
    %1488 = arith.addf %1486, %1487 : vector<4x4xf32>
    %1489 = math.floor %1488 : vector<4x4xf32>
    %cst_704 = arith.constant 3.140625 : f32
    %1490 = vector.broadcast %cst_704 : f32 to vector<4x4xf32>
    %1491 = arith.mulf %1489, %1490 : vector<4x4xf32>
    %1492 = arith.subf %1484, %1491 : vector<4x4xf32>
    %cst_705 = arith.constant 9.67653584E-4 : f32
    %1493 = vector.broadcast %cst_705 : f32 to vector<4x4xf32>
    %1494 = arith.mulf %1489, %1493 : vector<4x4xf32>
    %1495 = arith.subf %1492, %1494 : vector<4x4xf32>
    %cst_706 = arith.constant 5.000000e-01 : f32
    %1496 = vector.broadcast %cst_706 : f32 to vector<4x4xf32>
    %1497 = arith.mulf %1489, %1496 : vector<4x4xf32>
    %1498 = math.floor %1497 : vector<4x4xf32>
    %cst_707 = arith.constant 2.000000e+00 : f32
    %1499 = vector.broadcast %cst_707 : f32 to vector<4x4xf32>
    %1500 = arith.mulf %1499, %1498 : vector<4x4xf32>
    %1501 = arith.subf %1489, %1500 : vector<4x4xf32>
    %cst_708 = arith.constant 2.000000e+00 : f32
    %1502 = vector.broadcast %cst_708 : f32 to vector<4x4xf32>
    %1503 = arith.mulf %1502, %1501 : vector<4x4xf32>
    %cst_709 = arith.constant 1.000000e+00 : f32
    %1504 = vector.broadcast %cst_709 : f32 to vector<4x4xf32>
    %1505 = arith.subf %1504, %1503 : vector<4x4xf32>
    %1506 = arith.mulf %1495, %1495 : vector<4x4xf32>
    %cst_710 = arith.constant -2.50521079E-8 : f32
    %1507 = vector.broadcast %cst_710 : f32 to vector<4x4xf32>
    %1508 = arith.mulf %1506, %1507 : vector<4x4xf32>
    %cst_711 = arith.constant 2.75573188E-6 : f32
    %1509 = vector.broadcast %cst_711 : f32 to vector<4x4xf32>
    %1510 = arith.addf %1509, %1508 : vector<4x4xf32>
    %1511 = arith.mulf %1506, %1510 : vector<4x4xf32>
    %cst_712 = arith.constant -1.98412701E-4 : f32
    %1512 = vector.broadcast %cst_712 : f32 to vector<4x4xf32>
    %1513 = arith.addf %1512, %1511 : vector<4x4xf32>
    %1514 = arith.mulf %1506, %1513 : vector<4x4xf32>
    %cst_713 = arith.constant 0.00833333377 : f32
    %1515 = vector.broadcast %cst_713 : f32 to vector<4x4xf32>
    %1516 = arith.addf %1515, %1514 : vector<4x4xf32>
    %1517 = arith.mulf %1506, %1516 : vector<4x4xf32>
    %cst_714 = arith.constant -0.166666672 : f32
    %1518 = vector.broadcast %cst_714 : f32 to vector<4x4xf32>
    %1519 = arith.addf %1518, %1517 : vector<4x4xf32>
    %1520 = arith.mulf %1506, %1519 : vector<4x4xf32>
    %cst_715 = arith.constant 1.000000e+00 : f32
    %1521 = vector.broadcast %cst_715 : f32 to vector<4x4xf32>
    %1522 = arith.addf %1521, %1520 : vector<4x4xf32>
    %1523 = arith.mulf %1495, %1522 : vector<4x4xf32>
    %cst_716 = arith.constant 2.08767559E-9 : f32
    %1524 = vector.broadcast %cst_716 : f32 to vector<4x4xf32>
    %1525 = arith.mulf %1506, %1524 : vector<4x4xf32>
    %cst_717 = arith.constant -2.755732E-7 : f32
    %1526 = vector.broadcast %cst_717 : f32 to vector<4x4xf32>
    %1527 = arith.addf %1526, %1525 : vector<4x4xf32>
    %1528 = arith.mulf %1506, %1527 : vector<4x4xf32>
    %cst_718 = arith.constant 2.48015876E-5 : f32
    %1529 = vector.broadcast %cst_718 : f32 to vector<4x4xf32>
    %1530 = arith.addf %1529, %1528 : vector<4x4xf32>
    %1531 = arith.mulf %1506, %1530 : vector<4x4xf32>
    %cst_719 = arith.constant -0.00138888892 : f32
    %1532 = vector.broadcast %cst_719 : f32 to vector<4x4xf32>
    %1533 = arith.addf %1532, %1531 : vector<4x4xf32>
    %1534 = arith.mulf %1506, %1533 : vector<4x4xf32>
    %cst_720 = arith.constant 0.0416666679 : f32
    %1535 = vector.broadcast %cst_720 : f32 to vector<4x4xf32>
    %1536 = arith.addf %1535, %1534 : vector<4x4xf32>
    %1537 = arith.mulf %1506, %1536 : vector<4x4xf32>
    %cst_721 = arith.constant -5.000000e-01 : f32
    %1538 = vector.broadcast %cst_721 : f32 to vector<4x4xf32>
    %1539 = arith.addf %1538, %1537 : vector<4x4xf32>
    %1540 = arith.mulf %1506, %1539 : vector<4x4xf32>
    %cst_722 = arith.constant 1.000000e+00 : f32
    %1541 = vector.broadcast %cst_722 : f32 to vector<4x4xf32>
    %1542 = arith.addf %1541, %1540 : vector<4x4xf32>
    %1543 = arith.mulf %1505, %1523 : vector<4x4xf32>
    %1544 = arith.mulf %1505, %1542 : vector<4x4xf32>
    %1545 = math.exp %1482 : vector<4x4xf32>
    %cst_723 = arith.constant 0.000000e+00 : f32
    %1546 = vector.broadcast %cst_723 : f32 to vector<4x4xf32>
    %1547 = arith.subf %1546, %1482 : vector<4x4xf32>
    %1548 = math.exp %1547 : vector<4x4xf32>
    %1549 = arith.addf %1545, %1548 : vector<4x4xf32>
    %cst_724 = arith.constant 2.000000e+00 : f32
    %1550 = vector.broadcast %cst_724 : f32 to vector<4x4xf32>
    %1551 = arith.mulf %1550, %1544 : vector<4x4xf32>
    %1552 = arith.addf %1549, %1551 : vector<4x4xf32>
    %1553 = tpu.reciprocal %1552 {approx = true} : vector<4x4xf32> -> vector<4x4xf32>
    %1554 = arith.subf %1545, %1548 : vector<4x4xf32>
    %1555 = arith.mulf %1554, %1553 : vector<4x4xf32>
    %cst_725 = arith.constant 2.000000e+00 : f32
    %1556 = vector.broadcast %cst_725 : f32 to vector<4x4xf32>
    %1557 = arith.mulf %1556, %1543 : vector<4x4xf32>
    %1558 = arith.mulf %1557, %1553 : vector<4x4xf32>
    %cst_726 = arith.constant 0.000000e+00 : f32
    %1559 = vector.broadcast %cst_726 : f32 to vector<4x4xf32>
    %1560 = arith.subf %1559, %1558 : vector<4x4xf32>
    %1561 = tpu.concatenate %1555, %1560 in 1 : vector<4x4xf32>, vector<4x4xf32> -> vector<4x8xf32>
    %1562 = tpu.concatenate %1558, %1555 in 1 : vector<4x4xf32>, vector<4x4xf32> -> vector<4x8xf32>
    %1563 = tpu.concatenate %1561, %1562 in 0 : vector<4x8xf32>, vector<4x8xf32> -> vector<8x8xf32>
    %cst_727 = arith.constant dense<0.000000e+00> : vector<8x8xf32>
    %1564 = tpu.matmul %1563, %1463, %cst_727 {dimension_numbers = #tpu.dot_dimension_numbers<[1], [0], [0], [1], [0, 0, 1, 1], [], []>} : vector<8x8xf32>, vector<8x8xf32>, vector<8x8xf32> -> vector<8x8xf32>
    %1565 = vector.extract_strided_slice %1564 {offsets = [0, 0], sizes = [4, 8], strides = [1, 1]} : vector<8x8xf32> to vector<4x8xf32>
    %1566 = vector.extract_strided_slice %1564 {offsets = [4, 0], sizes = [4, 8], strides = [1, 1]} : vector<8x8xf32> to vector<4x8xf32>
    %cst_728 = arith.constant 0.000000e+00 : f32
    %1567 = vector.broadcast %cst_728 : f32 to vector<4x16xf32>
    %1568 = vector.extract_strided_slice %1565 {offsets = [0, 0], sizes = [4, 1], strides = [1, 1]} : vector<4x8xf32> to vector<4x1xf32>
    %c3_729 = arith.constant 3 : index
    %c0_730 = arith.constant 0 : index
    %c0_731 = arith.constant 0 : index
    %c0_732 = arith.constant 0 : index
    %1569 = vector.load %arg8[%c3_729, %c0_730, %c0_731, %c0_732] : memref<4x8x4x16xf32, #tpu.memory_space<vmem>>, vector<1x1x4x16xf32>
    %1570 = vector.shape_cast %1569 : vector<1x1x4x16xf32> to vector<4x16xf32>
    %1571 = vector.broadcast %1568 : vector<4x1xf32> to vector<4x16xf32>
    %1572 = arith.mulf %1571, %1570 : vector<4x16xf32>
    %1573 = arith.addf %1567, %1572 : vector<4x16xf32>
    %1574 = vector.extract_strided_slice %1566 {offsets = [0, 0], sizes = [4, 1], strides = [1, 1]} : vector<4x8xf32> to vector<4x1xf32>
    %c3_733 = arith.constant 3 : index
    %c0_734 = arith.constant 0 : index
    %c0_735 = arith.constant 0 : index
    %c0_736 = arith.constant 0 : index
    %1575 = vector.load %arg9[%c3_733, %c0_734, %c0_735, %c0_736] : memref<4x8x4x16xf32, #tpu.memory_space<vmem>>, vector<1x1x4x16xf32>
    %1576 = vector.shape_cast %1575 : vector<1x1x4x16xf32> to vector<4x16xf32>
    %1577 = vector.broadcast %1574 : vector<4x1xf32> to vector<4x16xf32>
    %1578 = arith.mulf %1577, %1576 : vector<4x16xf32>
    %1579 = arith.addf %1573, %1578 : vector<4x16xf32>
    %1580 = vector.extract_strided_slice %1565 {offsets = [0, 1], sizes = [4, 1], strides = [1, 1]} : vector<4x8xf32> to vector<4x1xf32>
    %c3_737 = arith.constant 3 : index
    %c1_738 = arith.constant 1 : index
    %c0_739 = arith.constant 0 : index
    %c0_740 = arith.constant 0 : index
    %1581 = vector.load %arg8[%c3_737, %c1_738, %c0_739, %c0_740] : memref<4x8x4x16xf32, #tpu.memory_space<vmem>>, vector<1x1x4x16xf32>
    %1582 = vector.shape_cast %1581 : vector<1x1x4x16xf32> to vector<4x16xf32>
    %1583 = vector.broadcast %1580 : vector<4x1xf32> to vector<4x16xf32>
    %1584 = arith.mulf %1583, %1582 : vector<4x16xf32>
    %1585 = arith.addf %1579, %1584 : vector<4x16xf32>
    %1586 = vector.extract_strided_slice %1566 {offsets = [0, 1], sizes = [4, 1], strides = [1, 1]} : vector<4x8xf32> to vector<4x1xf32>
    %c3_741 = arith.constant 3 : index
    %c1_742 = arith.constant 1 : index
    %c0_743 = arith.constant 0 : index
    %c0_744 = arith.constant 0 : index
    %1587 = vector.load %arg9[%c3_741, %c1_742, %c0_743, %c0_744] : memref<4x8x4x16xf32, #tpu.memory_space<vmem>>, vector<1x1x4x16xf32>
    %1588 = vector.shape_cast %1587 : vector<1x1x4x16xf32> to vector<4x16xf32>
    %1589 = vector.broadcast %1586 : vector<4x1xf32> to vector<4x16xf32>
    %1590 = arith.mulf %1589, %1588 : vector<4x16xf32>
    %1591 = arith.addf %1585, %1590 : vector<4x16xf32>
    %1592 = vector.extract_strided_slice %1565 {offsets = [0, 2], sizes = [4, 1], strides = [1, 1]} : vector<4x8xf32> to vector<4x1xf32>
    %c3_745 = arith.constant 3 : index
    %c2_746 = arith.constant 2 : index
    %c0_747 = arith.constant 0 : index
    %c0_748 = arith.constant 0 : index
    %1593 = vector.load %arg8[%c3_745, %c2_746, %c0_747, %c0_748] : memref<4x8x4x16xf32, #tpu.memory_space<vmem>>, vector<1x1x4x16xf32>
    %1594 = vector.shape_cast %1593 : vector<1x1x4x16xf32> to vector<4x16xf32>
    %1595 = vector.broadcast %1592 : vector<4x1xf32> to vector<4x16xf32>
    %1596 = arith.mulf %1595, %1594 : vector<4x16xf32>
    %1597 = arith.addf %1591, %1596 : vector<4x16xf32>
    %1598 = vector.extract_strided_slice %1566 {offsets = [0, 2], sizes = [4, 1], strides = [1, 1]} : vector<4x8xf32> to vector<4x1xf32>
    %c3_749 = arith.constant 3 : index
    %c2_750 = arith.constant 2 : index
    %c0_751 = arith.constant 0 : index
    %c0_752 = arith.constant 0 : index
    %1599 = vector.load %arg9[%c3_749, %c2_750, %c0_751, %c0_752] : memref<4x8x4x16xf32, #tpu.memory_space<vmem>>, vector<1x1x4x16xf32>
    %1600 = vector.shape_cast %1599 : vector<1x1x4x16xf32> to vector<4x16xf32>
    %1601 = vector.broadcast %1598 : vector<4x1xf32> to vector<4x16xf32>
    %1602 = arith.mulf %1601, %1600 : vector<4x16xf32>
    %1603 = arith.addf %1597, %1602 : vector<4x16xf32>
    %1604 = vector.extract_strided_slice %1565 {offsets = [0, 3], sizes = [4, 1], strides = [1, 1]} : vector<4x8xf32> to vector<4x1xf32>
    %c3_753 = arith.constant 3 : index
    %c3_754 = arith.constant 3 : index
    %c0_755 = arith.constant 0 : index
    %c0_756 = arith.constant 0 : index
    %1605 = vector.load %arg8[%c3_753, %c3_754, %c0_755, %c0_756] : memref<4x8x4x16xf32, #tpu.memory_space<vmem>>, vector<1x1x4x16xf32>
    %1606 = vector.shape_cast %1605 : vector<1x1x4x16xf32> to vector<4x16xf32>
    %1607 = vector.broadcast %1604 : vector<4x1xf32> to vector<4x16xf32>
    %1608 = arith.mulf %1607, %1606 : vector<4x16xf32>
    %1609 = arith.addf %1603, %1608 : vector<4x16xf32>
    %1610 = vector.extract_strided_slice %1566 {offsets = [0, 3], sizes = [4, 1], strides = [1, 1]} : vector<4x8xf32> to vector<4x1xf32>
    %c3_757 = arith.constant 3 : index
    %c3_758 = arith.constant 3 : index
    %c0_759 = arith.constant 0 : index
    %c0_760 = arith.constant 0 : index
    %1611 = vector.load %arg9[%c3_757, %c3_758, %c0_759, %c0_760] : memref<4x8x4x16xf32, #tpu.memory_space<vmem>>, vector<1x1x4x16xf32>
    %1612 = vector.shape_cast %1611 : vector<1x1x4x16xf32> to vector<4x16xf32>
    %1613 = vector.broadcast %1610 : vector<4x1xf32> to vector<4x16xf32>
    %1614 = arith.mulf %1613, %1612 : vector<4x16xf32>
    %1615 = arith.addf %1609, %1614 : vector<4x16xf32>
    %1616 = vector.extract_strided_slice %1565 {offsets = [0, 4], sizes = [4, 1], strides = [1, 1]} : vector<4x8xf32> to vector<4x1xf32>
    %c3_761 = arith.constant 3 : index
    %c4_762 = arith.constant 4 : index
    %c0_763 = arith.constant 0 : index
    %c0_764 = arith.constant 0 : index
    %1617 = vector.load %arg8[%c3_761, %c4_762, %c0_763, %c0_764] : memref<4x8x4x16xf32, #tpu.memory_space<vmem>>, vector<1x1x4x16xf32>
    %1618 = vector.shape_cast %1617 : vector<1x1x4x16xf32> to vector<4x16xf32>
    %1619 = vector.broadcast %1616 : vector<4x1xf32> to vector<4x16xf32>
    %1620 = arith.mulf %1619, %1618 : vector<4x16xf32>
    %1621 = arith.addf %1615, %1620 : vector<4x16xf32>
    %1622 = vector.extract_strided_slice %1566 {offsets = [0, 4], sizes = [4, 1], strides = [1, 1]} : vector<4x8xf32> to vector<4x1xf32>
    %c3_765 = arith.constant 3 : index
    %c4_766 = arith.constant 4 : index
    %c0_767 = arith.constant 0 : index
    %c0_768 = arith.constant 0 : index
    %1623 = vector.load %arg9[%c3_765, %c4_766, %c0_767, %c0_768] : memref<4x8x4x16xf32, #tpu.memory_space<vmem>>, vector<1x1x4x16xf32>
    %1624 = vector.shape_cast %1623 : vector<1x1x4x16xf32> to vector<4x16xf32>
    %1625 = vector.broadcast %1622 : vector<4x1xf32> to vector<4x16xf32>
    %1626 = arith.mulf %1625, %1624 : vector<4x16xf32>
    %1627 = arith.addf %1621, %1626 : vector<4x16xf32>
    %1628 = vector.extract_strided_slice %1565 {offsets = [0, 5], sizes = [4, 1], strides = [1, 1]} : vector<4x8xf32> to vector<4x1xf32>
    %c3_769 = arith.constant 3 : index
    %c5_770 = arith.constant 5 : index
    %c0_771 = arith.constant 0 : index
    %c0_772 = arith.constant 0 : index
    %1629 = vector.load %arg8[%c3_769, %c5_770, %c0_771, %c0_772] : memref<4x8x4x16xf32, #tpu.memory_space<vmem>>, vector<1x1x4x16xf32>
    %1630 = vector.shape_cast %1629 : vector<1x1x4x16xf32> to vector<4x16xf32>
    %1631 = vector.broadcast %1628 : vector<4x1xf32> to vector<4x16xf32>
    %1632 = arith.mulf %1631, %1630 : vector<4x16xf32>
    %1633 = arith.addf %1627, %1632 : vector<4x16xf32>
    %1634 = vector.extract_strided_slice %1566 {offsets = [0, 5], sizes = [4, 1], strides = [1, 1]} : vector<4x8xf32> to vector<4x1xf32>
    %c3_773 = arith.constant 3 : index
    %c5_774 = arith.constant 5 : index
    %c0_775 = arith.constant 0 : index
    %c0_776 = arith.constant 0 : index
    %1635 = vector.load %arg9[%c3_773, %c5_774, %c0_775, %c0_776] : memref<4x8x4x16xf32, #tpu.memory_space<vmem>>, vector<1x1x4x16xf32>
    %1636 = vector.shape_cast %1635 : vector<1x1x4x16xf32> to vector<4x16xf32>
    %1637 = vector.broadcast %1634 : vector<4x1xf32> to vector<4x16xf32>
    %1638 = arith.mulf %1637, %1636 : vector<4x16xf32>
    %1639 = arith.addf %1633, %1638 : vector<4x16xf32>
    %1640 = vector.extract_strided_slice %1565 {offsets = [0, 6], sizes = [4, 1], strides = [1, 1]} : vector<4x8xf32> to vector<4x1xf32>
    %c3_777 = arith.constant 3 : index
    %c6_778 = arith.constant 6 : index
    %c0_779 = arith.constant 0 : index
    %c0_780 = arith.constant 0 : index
    %1641 = vector.load %arg8[%c3_777, %c6_778, %c0_779, %c0_780] : memref<4x8x4x16xf32, #tpu.memory_space<vmem>>, vector<1x1x4x16xf32>
    %1642 = vector.shape_cast %1641 : vector<1x1x4x16xf32> to vector<4x16xf32>
    %1643 = vector.broadcast %1640 : vector<4x1xf32> to vector<4x16xf32>
    %1644 = arith.mulf %1643, %1642 : vector<4x16xf32>
    %1645 = arith.addf %1639, %1644 : vector<4x16xf32>
    %1646 = vector.extract_strided_slice %1566 {offsets = [0, 6], sizes = [4, 1], strides = [1, 1]} : vector<4x8xf32> to vector<4x1xf32>
    %c3_781 = arith.constant 3 : index
    %c6_782 = arith.constant 6 : index
    %c0_783 = arith.constant 0 : index
    %c0_784 = arith.constant 0 : index
    %1647 = vector.load %arg9[%c3_781, %c6_782, %c0_783, %c0_784] : memref<4x8x4x16xf32, #tpu.memory_space<vmem>>, vector<1x1x4x16xf32>
    %1648 = vector.shape_cast %1647 : vector<1x1x4x16xf32> to vector<4x16xf32>
    %1649 = vector.broadcast %1646 : vector<4x1xf32> to vector<4x16xf32>
    %1650 = arith.mulf %1649, %1648 : vector<4x16xf32>
    %1651 = arith.addf %1645, %1650 : vector<4x16xf32>
    %1652 = vector.extract_strided_slice %1565 {offsets = [0, 7], sizes = [4, 1], strides = [1, 1]} : vector<4x8xf32> to vector<4x1xf32>
    %c3_785 = arith.constant 3 : index
    %c7_786 = arith.constant 7 : index
    %c0_787 = arith.constant 0 : index
    %c0_788 = arith.constant 0 : index
    %1653 = vector.load %arg8[%c3_785, %c7_786, %c0_787, %c0_788] : memref<4x8x4x16xf32, #tpu.memory_space<vmem>>, vector<1x1x4x16xf32>
    %1654 = vector.shape_cast %1653 : vector<1x1x4x16xf32> to vector<4x16xf32>
    %1655 = vector.broadcast %1652 : vector<4x1xf32> to vector<4x16xf32>
    %1656 = arith.mulf %1655, %1654 : vector<4x16xf32>
    %1657 = arith.addf %1651, %1656 : vector<4x16xf32>
    %1658 = vector.extract_strided_slice %1566 {offsets = [0, 7], sizes = [4, 1], strides = [1, 1]} : vector<4x8xf32> to vector<4x1xf32>
    %c3_789 = arith.constant 3 : index
    %c7_790 = arith.constant 7 : index
    %c0_791 = arith.constant 0 : index
    %c0_792 = arith.constant 0 : index
    %1659 = vector.load %arg9[%c3_789, %c7_790, %c0_791, %c0_792] : memref<4x8x4x16xf32, #tpu.memory_space<vmem>>, vector<1x1x4x16xf32>
    %1660 = vector.shape_cast %1659 : vector<1x1x4x16xf32> to vector<4x16xf32>
    %1661 = vector.broadcast %1658 : vector<4x1xf32> to vector<4x16xf32>
    %1662 = arith.mulf %1661, %1660 : vector<4x16xf32>
    %1663 = arith.addf %1657, %1662 : vector<4x16xf32>
    %1664 = vector.extract_strided_slice %1663 {offsets = [0, 0], sizes = [4, 8], strides = [1, 1]} : vector<4x16xf32> to vector<4x8xf32>
    %1665 = vector.extract_strided_slice %1663 {offsets = [0, 8], sizes = [4, 8], strides = [1, 1]} : vector<4x16xf32> to vector<4x8xf32>
    %1666 = tpu.concatenate %1664, %1665 in 0 : vector<4x8xf32>, vector<4x8xf32> -> vector<8x8xf32>
    %c0_793 = arith.constant 0 : index
    %c56 = arith.constant 56 : index
    %1667 = vector.load %arg11[%c0_793, %c56] : memref<8x64xf32, #tpu.memory_space<vmem>>, vector<8x8xf32>
    tpu.vector_store %arg11[%c0_793, %c56], %1666 {strides = array<i32>} : memref<8x64xf32, #tpu.memory_space<vmem>>, vector<8x8xf32>,
    %c0_794 = arith.constant 0 : index
    %c0_795 = arith.constant 0 : index
    %1668 = vector.load %arg7[%c0_794, %c0_795] : memref<16x8xbf16, #tpu.memory_space<vmem>>, vector<16x8xbf16>
    %c0_796 = arith.constant 0 : index
    %c0_797 = arith.constant 0 : index
    %1669 = vector.load %arg11[%c0_796, %c0_797] : memref<8x64xf32, #tpu.memory_space<vmem>>, vector<8x64xf32>
    %1670 = arith.truncf %1669 : vector<8x64xf32> to vector<8x64xbf16>
    %cst_798 = arith.constant dense<0.000000e+00> : vector<16x64xf32>
    %1671 = tpu.matmul %1668, %1670, %cst_798 {dimension_numbers = #tpu.dot_dimension_numbers<[1], [0], [0], [1], [0, 0, 1, 1], [], []>} : vector<16x8xbf16>, vector<8x64xbf16>, vector<16x64xf32> -> vector<16x64xf32>
    %c0_799 = arith.constant 0 : index
    %c0_800 = arith.constant 0 : index
    %c0_801 = arith.constant 0 : index
    %1672 = vector.load %arg10[%c0_799, %c0_800, %c0_801] : memref<1x16x64xf32, #tpu.memory_space<vmem>>, vector<1x16x64xf32>
    %1673 = vector.shape_cast %1672 : vector<1x16x64xf32> to vector<16x64xf32>
    %1674 = vector.shape_cast %1671 : vector<16x64xf32> to vector<1x16x64xf32>
    tpu.vector_store %arg10[%c0_799, %c0_800, %c0_801], %1674 {strides = array<i32>} : memref<1x16x64xf32, #tpu.memory_space<vmem>>, vector<1x16x64xf32>,
    return
  }
  func.func @transform_0(%arg0: i32, %arg1: i32) -> (i32, i32, i32) {
    %c0_i32 = arith.constant 0 : i32
    %c0_i32_0 = arith.constant 0 : i32
    return %arg1, %c0_i32, %arg0 : i32, i32, i32
  }
  func.func @transform_1(%arg0: i32, %arg1: i32) -> (i32, i32, i32) {
    %c0_i32 = arith.constant 0 : i32
    %c0_i32_0 = arith.constant 0 : i32
    return %arg1, %c0_i32, %arg0 : i32, i32, i32
  }
  func.func @transform_2(%arg0: i32, %arg1: i32) -> (i32, i32, i32) {
    %c0_i32 = arith.constant 0 : i32
    %c0_i32_0 = arith.constant 0 : i32
    return %arg1, %c0_i32, %arg0 : i32, i32, i32
  }
  func.func @transform_3(%arg0: i32, %arg1: i32) -> (i32, i32) {
    %c0_i32 = arith.constant 0 : i32
    %c0_i32_0 = arith.constant 0 : i32
    %c0_i32_1 = arith.constant 0 : i32
    return %c0_i32, %c0_i32_0 : i32, i32
  }
  func.func @transform_4(%arg0: i32, %arg1: i32) -> (i32, i32) {
    %c0_i32 = arith.constant 0 : i32
    %c0_i32_0 = arith.constant 0 : i32
    %c0_i32_1 = arith.constant 0 : i32
    return %c0_i32, %c0_i32_0 : i32, i32
  }
  func.func @transform_5(%arg0: i32, %arg1: i32) -> (i32, i32) {
    %c0_i32 = arith.constant 0 : i32
    %c0_i32_0 = arith.constant 0 : i32
    %c0_i32_1 = arith.constant 0 : i32
    return %c0_i32, %c0_i32_0 : i32, i32
  }
  func.func @transform_6(%arg0: i32, %arg1: i32) -> (i32, i32, i32, i32) {
    %c0_i32 = arith.constant 0 : i32
    %c0_i32_0 = arith.constant 0 : i32
    %c0_i32_1 = arith.constant 0 : i32
    %c0_i32_2 = arith.constant 0 : i32
    return %arg0, %c0_i32, %c0_i32_0, %c0_i32_1 : i32, i32, i32, i32
  }
  func.func @transform_7(%arg0: i32, %arg1: i32) -> (i32, i32, i32, i32) {
    %c0_i32 = arith.constant 0 : i32
    %c0_i32_0 = arith.constant 0 : i32
    %c0_i32_1 = arith.constant 0 : i32
    %c0_i32_2 = arith.constant 0 : i32
    return %arg0, %c0_i32, %c0_i32_0, %c0_i32_1 : i32, i32, i32, i32
  }
  func.func @transform_8(%arg0: i32, %arg1: i32) -> (i32, i32, i32) {
    %c0_i32 = arith.constant 0 : i32
    %c0_i32_0 = arith.constant 0 : i32
    return %arg1, %c0_i32, %arg0 : i32, i32, i32
  }
}

</mosaic_0001>

<bundles_post_ra>
// kernel: tpu_custom_call.1
= control target key start
LH: loop header
LB: loop body
LE: loop exit
PB: predicated region body
PF: predicated region fallthrough
CT: control target
= control target key end

     0   :  { %13 = vsyncpa [#allocation4], 0  ;;  %s3788_s0 = inlined_call_operand.vmem [shape: bf16[1,16,64], index: 0, kind: input, shape index: {}]   ;;  %s3789_s1 = inlined_call_operand.hbm [shape: bf16[1,16,64], index: 1, kind: input, shape index: {}]   ;;  %s3790_s2 = inlined_call_operand.hbm [shape: bf16[1,16,64], index: 2, kind: input, shape index: {}]   ;;  %s3791_s3 = inlined_call_operand.vmem [shape: bf16[8,16], index: 3, kind: input, shape index: {}]   ;;  %s3792_s4 = inlined_call_operand.hbm [shape: bf16[8,16], index: 4, kind: input, shape index: {}]   ;;  %s3793_s5 = inlined_call_operand.vmem [shape: bf16[16,8], index: 5, kind: input, shape index: {}]   ;;  %s3794_s6 = inlined_call_operand.hbm [shape: f32[4,8,4,16], index: 6, kind: input, shape index: {}]   ;;  %s3795_s7 = inlined_call_operand.hbm [shape: f32[4,8,4,16], index: 7, kind: input, shape index: {}]   ;;  %s3796_s8 = inlined_call_operand.hbm [shape: f32[1,16,64], index: 8, kind: output, shape index: {}]  }
   0x1   :  { %14 = vsyncpa [#allocation7], 0 }
   0x2   :  { %15 = vsyncpa [#allocation10], 0 }
   0x3   :  { %16 = vsyncpa [#allocation5], 0  ;;  %s36_s29 = sshll.u32 %s3790_s2, 4  ;;  %s2923_s30 = smov [#allocation6]   ;;  %s37_s29 = int_to_ptr.hbm [resolvable:$true] %s36_s29 }
   0x4   :  { %s38_s9 = sshll.u32 %s2923_s30, 4  ;;  %s64_s12 = sshll.u32 %s3794_s6, 4  ;;  %s39_s9 = int_to_ptr.vmem [resolvable:$true] %s38_s9  ;;  %s65_s12 = int_to_ptr.hbm [resolvable:$true] %s64_s12 }
   0x5   :  { %s2924_s13 = smov 64   ;;  %s2925_s14 = smov 4  }
   0x6   :  { %44 = dma.hbm_to_vmem [thread:$0]  %s37_s29, 128, %s39_s9, [#allocation7], %s2924_s13, %s2924_s13, %s2925_s14  }
   0x7   :  { %s2926_s15 = smov [#allocation9]   ;;  %s23_s19 = sshll.u32 %s3789_s1, 4  ;;  %s24_s19 = int_to_ptr.hbm [resolvable:$true] %s23_s19 }
   0x8   :  { %s66_s16 = sshll.u32 %s2926_s15, 4  ;;  %s52_s21 = sshll.u32 %s3792_s4, 4  ;;  %s67_s16 = int_to_ptr.vmem [resolvable:$true] %s66_s16  ;;  %s53_s21 = int_to_ptr.hbm [resolvable:$true] %s52_s21 }
   0x9   :  { %72 = dma.hbm_to_vmem [thread:$0]  %s65_s12, 2048, %s67_s16, [#allocation10], %s2924_s13, %s2924_s13, %s2925_s14  }
   0xa   :  { %s2927_s6 = smov [#allocation3]   ;;  %s2928_s23 = smov [#allocation8]  }
   0xb   :  { %s25_s22 = sshll.u32 %s2927_s6, 4  ;;  %s54_s24 = sshll.u32 %s2928_s23, 4  ;;  %s26_s22 = int_to_ptr.vmem [resolvable:$true] %s25_s22  ;;  %s55_s24 = int_to_ptr.vmem [resolvable:$true] %s54_s24 }
   0xc   :  { %31 = dma.hbm_to_vmem [thread:$0]  %s24_s19, 128, %s26_s22, [#allocation4], %s2924_s13, %s2924_s13, %s2925_s14  }
   0xd   :  { %s77_s1 = sshll.u32 %s3795_s7, 4  ;;  %s2929_s27 = smov [#allocation11]   ;;  %s78_s1 = int_to_ptr.hbm [resolvable:$true] %s77_s1 }
   0xe   :  { %57 = dma.hbm_to_vmem [thread:$0]  %s53_s21, 64, %s55_s24, [#allocation7]  }
   0xf   :  { %s79_s28 = sshll.u32 %s2929_s27, 4  ;;  %s80_s28 = int_to_ptr.vmem [resolvable:$true] %s79_s28 }
  0x10   :  { %85 = dma.hbm_to_vmem [thread:$0]  %s78_s1, 2048, %s80_s28, [#allocation10], %s2924_s13, %s2924_s13, %s2925_s14  }
  0x11   :  { %2915 = dma.done.wait [#allocation4], 128  }
  0x12   :  { %2916 = vsyncadd [#allocation4], 4294967168 }
  0x13   :  { %2917 = dma.done.wait [#allocation7], 192  }
  0x14   :  { %2918 = vsyncadd [#allocation7], 4294967104 }
  0x15   :  { %2919 = dma.done.wait [#allocation10], 4096  }
  0x16   :  { %2920 = vsyncadd [#allocation10], 4294963200  ;;  %v2633_v0 = vld [vmem:[%s3788_s0] sm:$0xff]  ;;  %v2634_v1 = vld [vmem:[#allocation3] sm:$0xff]  ;;  %vm116_vm0 = vcmask 130048   ;;  %s2930_s0 = smov 112  }
  0x17   :  { %v2635_v2 = vld [vmem:[#allocation6] sm:$0xff]  ;;  %127 = vmatpush.bf16.msra.mxu0 %v2633_v0  ;;  %152 = vmatpush.bf16.msra.mxu1 %v2634_v1  ;;  %v107_v3 = vld [vmem:[%s3791_s3] sm:$0xf]  ;;  %v133_v4 = vld [vmem:[#allocation8] sm:$0xf]  ;;  %s2931_s3 = smov 8  }
  0x18   :  { %173 = vmatpush.bf16.msra.mxu2 %v2635_v2  ;;  %s2932_s9 = smov 120   ;;  %s2933_s10 = smov 96   ;;  %vm185_vm1 = vcmask 64512   ;;  %vm193_vm2 = vcmask 1043456   ;;  %vm294_vm3 = vcmask 31744   ;;  %vm772_vm4 = vcmask 130112  }
  0x19   :  { %s2934_s11 = smov 104   ;;  %s2935_s12 = smov 80   ;;  %vm1075_vm5 = vcmask 195712   ;;  %vm1378_vm6 = vcmask 261312   ;;  %vm1665_vm7 = vcmask 326912   ;;  %vm1952_vm8 = vcmask 392512  }
  0x1a   :  { %2585 = vmatmul.msk.bf16.vlgmr.msra.gmra.mxu0 %vm116_vm0, %v107_v3  ;;  %2590 = vmatmul.msk.bf16.vlgmr.msra.gmra.mxu1 %vm116_vm0, %v133_v4  ;;  %s2936_s13 = smov 88   ;;  %s2937_s15 = smov 72   ;;  %vm2239_vm9 = vcmask 458112   ;;  %vm2526_vm10 = vcmask 523712   ;;  %vm2557_vm11 = vcmask 523264  }
  0x1b   :  { %2595 = vmatmul.msk.bf16.vlgmr.msra.gmra.mxu2 %vm116_vm0, %v133_v4  ;;  %s2947_s16 = smov 16   ;;  %s2948_s17 = smov 40  }
  0x1c   :  { %s2949_s18 = smov 32   ;;  %s2950_s19 = smov 48  }
  0x1d   :  { %s2951_s2 = smov 56   ;;  %s2566_s23 = sshll.u32 %s3796_s8, 4  ;;  %s2567_s23 = int_to_ptr.hbm [resolvable:$true] %s2566_s23 }
  0x1e   :  { %s2952_s24 = smov [#allocation12]   ;;  %s2953_s26 = smov 128  }
  0x1f   :  { %s2564_s25 = sshll.u32 %s2952_s24, 4  ;;  %s2565_s25 = int_to_ptr.vmem [resolvable:$true] %s2564_s25 }
  0x97   :  { %v3027_v5 = vpop.f32.mrf.mxu0  ;;  %v3029_v6 = vpop.f32.mrf.mxu1 }
  0x98   :  { %v3032_v7 = vrot.slane %v3029_v6, 4  ;;  %786 = vrot.lane.b32.xlu2 %v3029_v6, %s2930_s0  ;;  %v3037_v8 = vrot.slane %v3027_v5, 4  ;;  %v179_v9 = vsub.f32 0.0, %v3027_v5 }
  0x9a   :  { %197 = vrot.lane.b32.xlu0 %v3032_v7, %s2931_s3  ;;  %189 = vrot.lane.b32.xlu1 %v3037_v8, %s2931_s3  ;;  %v3044_v10 = vrot.slane %v179_v9, 4 }
  0x9e   :  { %v175_v15 = vpop.f32.mrf.mxu2 }
  0x9f   :  { %v131_v11 = vpop.f32.mrf.mxu0  ;;  %v156_v12 = vpop.f32.mrf.mxu1 }
  0xa0   :  { %476 = vrot.lane.b32.xlu2 %v3027_v5, %s2932_s9 }
  0xa2   :  { %774 = vrot.lane.b32.xlu1 %v3027_v5, %s2930_s0  ;;  %182 = vrot.lane.b32.xlu0 %v3044_v10, %s2931_s3 }
  0xa6   :  { %v177_v17 = vpop.f32.mrf.mxu2 }
  0xa8   :  { %1380 = vrot.lane.b32.xlu2 %v3027_v5, %s2933_s10 }
  0xaa   :  { %484 = vrot.lane.b32.xlu1 %v3029_v6, %s2932_s9  ;;  %789 = vrot.lane.b32.xlu0 %v3032_v7, %s2932_s9 }
  0xb0   :  { %1089 = vrot.lane.b32.xlu2 %v3029_v6, %s2934_s11 }
  0xb2   :  { %1395 = vrot.lane.b32.xlu1 %v3032_v7, %s2934_s11  ;;  %781 = vrot.lane.b32.xlu0 %v3037_v8, %s2932_s9 }
  0xb8   :  { %777 = vrot.lane.b32.xlu2 %v3044_v10, %s2932_s9 }
  0xba   :  { %1387 = vrot.lane.b32.xlu1 %v3037_v8, %s2934_s11  ;;  %1392 = vrot.lane.b32.xlu0 %v3029_v6, %s2933_s10 }
  0xc0   :  { %1080 = vrot.lane.b32.xlu2 %v3044_v10, %s2930_s0 }
  0xc2   :  { %1077 = vrot.lane.b32.xlu1 %v3027_v5, %s2934_s11  ;;  %1092 = vrot.lane.b32.xlu0 %v3032_v7, %s2930_s0 }
  0xca   :  { %1084 = vrot.lane.b32.xlu0 %v3037_v8, %s2930_s0 }
  0xd2   :  { %1383 = vrot.lane.b32.xlu0 %v3044_v10, %s2934_s11 }
  0xda   :  { %1954 = vrot.lane.b32.xlu0 %v3027_v5, %s2935_s12 }
  0xe2   :  { %1679 = vrot.lane.b32.xlu0 %v3029_v6, %s2936_s13 }
  0xea   :  { %1670 = vrot.lane.b32.xlu0 %v3044_v10, %s2933_s10 }
  0xf2   :  { %v787_v13 = vpop.permute.xlu2 %786  ;;  %2256 = vrot.lane.b32.xlu0 %v3032_v7, %s2935_s12 }
  0xfa   :  { %v477_v14 = vpop.permute.xlu2 %476  ;;  %2248 = vrot.lane.b32.xlu0 %v3037_v8, %s2935_s12 }
  0xfb   :  { %v480_v31 = vsel %vm185_vm1, %v477_v14, %v3044_v10  ;;  %v482_v32 = vsel %vm185_vm1, %v477_v14, %v3037_v8 }
  0xfc   :  { %v483_v35 = vsel %vm193_vm2, %v480_v31, %v482_v32 }
 0x102   :  { %v1381_v16 = vpop.permute.xlu2 %1380  ;;  %591 = vrot.lane.b32.xlu0 %v175_v15, %s2932_s9 }
 0x10a   :  { %v1090_v18 = vpop.permute.xlu2 %1089  ;;  %894 = vrot.lane.b32.xlu0 %v175_v15, %s2930_s0 }
 0x10c   :  { %v198_v19 = vpop.permute.xlu0 %197  ;;  %v190_v20 = vpop.permute.xlu1 %189 }
 0x10d   :  { %v200_v21 = vsel %vm185_vm1, %v3029_v6, %v198_v19  ;;  %v192_v25 = vsel %vm185_vm1, %v3027_v5, %v190_v20 }
 0x10e   :  { %2596 = vmatpush.xpose.msk.msra.mxu3 %vm116_vm0, %v200_v21 }
 0x112   :  { %321 = vmatpush.msrb.mxu3 %v175_v15  ;;  %1197 = vrot.lane.b32.xlu0 %v175_v15, %s2934_s11  ;;  %v778_v22 = vpop.permute.xlu2 %777 }
 0x114   :  { %v775_v23 = vpop.permute.xlu1 %774  ;;  %v183_v24 = vpop.permute.xlu0 %182 }
 0x115   :  { %v780_v26 = vsel %vm185_vm1, %v775_v23, %v778_v22  ;;  %v186_v27 = vsel %vm185_vm1, %v3027_v5, %v183_v24 }
 0x116   :  { %v194_v28 = vsel %vm193_vm2, %v186_v27, %v192_v25 }
 0x117   :  { %2597 = vmatmul.msk.f32.vlgmr.msra.gmra.mxu3 %vm116_vm0, %v194_v28 }
 0x11a   :  { %1500 = vrot.lane.b32.xlu0 %v175_v15, %s2933_s10  ;;  %v1081_v46 = vpop.permute.xlu2 %1080 }
 0x11c   :  { %v485_v29 = vpop.permute.xlu1 %484  ;;  %v790_v30 = vpop.permute.xlu0 %789 }
 0x11d   :  { %v792_v33 = vsel %vm185_vm1, %v787_v13, %v790_v30  ;;  %v488_v34 = vsel %vm185_vm1, %v485_v29, %v3032_v7 }
 0x11e   :  { %2600 = vmatpush.xpose.msk.msrb.mxu0 %vm116_vm0, %v488_v34  ;;  %2604 = vmatpush.xpose.msk.msra.mxu3 %vm116_vm0, %v792_v33 }
 0x121   :  { %2601 = vmatmul.msk.f32.vlgmr.msrb.gmra.mxu0 %vm116_vm0, %v483_v35 }
 0x122   :  { %1787 = vrot.lane.b32.xlu0 %v175_v15, %s2936_s13 }
 0x124   :  { %v782_v36 = vpop.permute.xlu0 %781  ;;  %v1396_v38 = vpop.permute.xlu1 %1395 }
 0x125   :  { %v784_v37 = vsel %vm185_vm1, %v775_v23, %v782_v36 }
 0x126   :  { %v3118_v39 = vsel %vm193_vm2, %v780_v26, %v784_v37 }
 0x12a   :  { %2074 = vrot.lane.b32.xlu0 %v175_v15, %s2935_s12 }
 0x12c   :  { %v1393_v40 = vpop.permute.xlu0 %1392  ;;  %v1388_v42 = vpop.permute.xlu1 %1387 }
 0x12d   :  { %v1398_v41 = vsel %vm185_vm1, %v1393_v40, %v1396_v38  ;;  %v1390_v52 = vsel %vm185_vm1, %v1381_v16, %v1388_v42 }
 0x12e   :  { %2612 = vmatpush.xpose.msk.msrb.mxu2 %vm116_vm0, %v1398_v41 }
 0x132   :  { %2361 = vrot.lane.b32.xlu0 %v175_v15, %s2937_s15 }
 0x134   :  { %v1093_v43 = vpop.permute.xlu0 %1092  ;;  %v1078_v45 = vpop.permute.xlu1 %1077 }
 0x135   :  { %v1095_v44 = vsel %vm185_vm1, %v1090_v18, %v1093_v43  ;;  %v1083_v48 = vsel %vm185_vm1, %v1078_v45, %v1081_v46 }
 0x136   :  { %2608 = vmatpush.xpose.msk.msra.mxu0 %vm116_vm0, %v1095_v44 }
 0x13c   :  { %v1085_v47 = vpop.permute.xlu0 %1084 }
 0x13d   :  { %v1087_v49 = vsel %vm185_vm1, %v1078_v45, %v1085_v47 }
 0x13e   :  { %v1088_v50 = vsel %vm193_vm2, %v1083_v48, %v1087_v49 }
 0x13f   :  { %2609 = vmatmul.msk.f32.vlgmr.msra.gmra.mxu0 %vm116_vm0, %v1088_v50 }
 0x144   :  { %v1384_v51 = vpop.permute.xlu0 %1383 }
 0x145   :  { %v1386_v53 = vsel %vm185_vm1, %v1381_v16, %v1384_v51 }
 0x146   :  { %v1391_v54 = vsel %vm193_vm2, %v1386_v53, %v1390_v52 }
 0x147   :  { %2613 = vmatmul.msk.f32.vlgmr.msrb.gmra.mxu2 %vm116_vm0, %v1391_v54 }
 0x19a   :  { %v224_v55 = vpop.f32.mrf.mxu3 }
 0x19b   :  { %v227_v56 = vmul.f32 2.0, %v224_v55 }
 0x19d   :  { %v230_v57 = vmul.f32 0.31830987, %v227_v56  ;;  %v2598_v26 = vclamps-f32 %v227_v56, 50.0 }
 0x19e   :  { %v512_v58 = vpop.f32.mrf.mxu0 }
 0x19f   :  { %v231_v59 = vadd.f32 0.5, %v230_v57  ;;  %v3134_v60 = vmul.f32 2.0, %v512_v58  ;;  %v271_v32 = vsub.f32 0.0, %v2598_v26  ;;  %v269_v41 = vmul.f32 1.442695, %v2598_v26 }
 0x1a1   :  { %v232_v61 = vfloor.f32 %v231_v59  ;;  %v518_v62 = vmul.f32 0.31830987, %v3134_v60  ;;  %v272_v38 = vmul.f32 1.442695, %v271_v32 }
 0x1a3   :  { %v233_v63 = vmul.f32 3.140625, %v232_v61  ;;  %v519_v0 = vadd.f32 0.5, %v518_v62  ;;  %v235_v2 = vmul.f32 0.0009676536, %v232_v61  ;;  %v237_v16 = vmul.f32 0.5, %v232_v61 }
 0x1a4   :  { %2723 = vpow2.f32 %v272_v38 }
 0x1a5   :  { %v234_v1 = vsub.f32 %v227_v56, %v233_v63  ;;  %v3137_v3 = vfloor.f32 %v519_v0  ;;  %v238_v22 = vfloor.f32 %v237_v16  ;;  %2725 = vpow2.f32 %v269_v41 }
 0x1a7   :  { %v3139_v4 = vsub.f32 %v234_v1, %v235_v2  ;;  %v521_v9 = vmul.f32 3.140625, %v3137_v3  ;;  %v523_v13 = vmul.f32 0.0009676536, %v3137_v3  ;;  %v239_v29 = vmul.f32 2.0, %v238_v22 }
 0x1a9   :  { %v243_v11 = vmul.f32 %v3139_v4, %v3139_v4  ;;  %v522_v12 = vsub.f32 %v3134_v60, %v521_v9  ;;  %v240_v35 = vsub.f32 %v232_v61, %v239_v29 }
 0x1aa   :  { %v2724_v58 = vpop.eup %2723 }
 0x1ab   :  { %v255_v14 = vmul.f32 2.0876756e-09, %v243_v11  ;;  %v244_v15 = vmul.f32 -2.5052108e-08, %v243_v11  ;;  %v3146_v17 = vsub.f32 %v522_v12, %v523_v13  ;;  %v241_v44 = vmul.f32 2.0, %v240_v35  ;;  %v2726_v62 = vpop.eup %2725 }
 0x1ac   :  { %v274_v2 = vadd.f32 %v2726_v62, %v2724_v58 }
 0x1ad   :  { %v256_v18 = vadd.f32 -2.755732e-07, %v255_v14  ;;  %v245_v19 = vadd.f32 2.7557319e-06, %v244_v15  ;;  %v3150_v23 = vmul.f32 %v3146_v17, %v3146_v17  ;;  %v242_v51 = vsub.f32 1.0, %v241_v44 }
 0x1af   :  { %v257_v20 = vmul.f32 %v256_v18, %v243_v11  ;;  %v246_v21 = vmul.f32 %v245_v19, %v243_v11  ;;  %v543_v31 = vmul.f32 2.0876756e-09, %v3150_v23  ;;  %v532_v26 = vmul.f32 -2.5052108e-08, %v3150_v23 }
 0x1b1   :  { %v258_v24 = vadd.f32 2.4801588e-05, %v257_v20  ;;  %v247_v25 = vadd.f32 -0.0001984127, %v246_v21  ;;  %v544_v37 = vadd.f32 -2.755732e-07, %v543_v31 }
 0x1b2   :  { %v533_v35 = vadd.f32 2.7557319e-06, %v532_v26 }
 0x1b3   :  { %v259_v27 = vmul.f32 %v258_v24, %v243_v11  ;;  %v248_v28 = vmul.f32 %v247_v25, %v243_v11  ;;  %v545_v47 = vmul.f32 %v544_v37, %v3150_v23  ;;  %v525_v24 = vmul.f32 0.5, %v3137_v3 }
 0x1b5   :  { %v260_v30 = vadd.f32 -0.0013888889, %v259_v27  ;;  %v249_v34 = vadd.f32 0.008333334, %v248_v28  ;;  %v546_v54 = vadd.f32 2.4801588e-05, %v545_v47  ;;  %v526_v32 = vfloor.f32 %v525_v24 }
 0x1b7   :  { %v261_v33 = vmul.f32 %v260_v30, %v243_v11  ;;  %v250_v43 = vmul.f32 %v249_v34, %v243_v11  ;;  %v547_v61 = vmul.f32 %v546_v54, %v3150_v23  ;;  %v527_v44 = vmul.f32 2.0, %v526_v32 }
 0x1b9   :  { %v262_v36 = vadd.f32 0.041666668, %v261_v33  ;;  %v251_v50 = vadd.f32 -0.16666667, %v250_v43  ;;  %v548_v14 = vadd.f32 -0.0013888889, %v547_v61  ;;  %v281_v33 = vsub.f32 %v2726_v62, %v2724_v58 }
 0x1ba   :  { %v2602_v58 = vclamps-f32 %v3134_v60, 50.0 }
 0x1bb   :  { %v263_v40 = vmul.f32 %v262_v36, %v243_v11  ;;  %v252_v57 = vmul.f32 %v251_v50, %v243_v11  ;;  %v549_v21 = vmul.f32 %v548_v14, %v3150_v23 }
 0x1bc   :  { %v1119_v42 = vpop.f32.mrf.mxu0 }
 0x1bd   :  { %v3153_v45 = vmul.f32 2.0, %v1119_v42  ;;  %v264_v46 = vadd.f32 -0.5, %v263_v40  ;;  %v253_v12 = vadd.f32 1.0, %v252_v57  ;;  %v550_v30 = vadd.f32 0.041666668, %v549_v21 }
 0x1bf   :  { %v1125_v48 = vmul.f32 0.31830987, %v3153_v45  ;;  %v265_v49 = vmul.f32 %v264_v46, %v243_v11  ;;  %v254_v19 = vmul.f32 %v253_v12, %v3139_v4  ;;  %v551_v43 = vmul.f32 %v550_v30, %v3150_v23 }
 0x1c1   :  { %v1126_v52 = vadd.f32 0.5, %v1125_v48  ;;  %v266_v53 = vadd.f32 1.0, %v265_v49  ;;  %v267_v27 = vmul.f32 %v254_v19, %v242_v51  ;;  %v552_v57 = vadd.f32 -0.5, %v551_v43 }
 0x1c3   :  { %v3157_v55 = vfloor.f32 %v1126_v52  ;;  %v268_v56 = vmul.f32 %v266_v53, %v242_v51  ;;  %v283_v37 = vmul.f32 2.0, %v267_v27  ;;  %v534_v51 = vmul.f32 %v533_v35, %v3150_v23 }
 0x1c4   :  { %v553_v12 = vmul.f32 %v552_v57, %v3150_v23  ;;  %v557_v35 = vmul.f32 1.442695, %v2602_v58 }
 0x1c5   :  { %v1128_v59 = vmul.f32 3.140625, %v3157_v55  ;;  %v275_v63 = vmul.f32 2.0, %v268_v56  ;;  %v1130_v1 = vmul.f32 0.0009676536, %v3157_v55  ;;  %v1132_v49 = vmul.f32 0.5, %v3157_v55 }
 0x1c7   :  { %v1129_v0 = vsub.f32 %v3153_v45, %v1128_v59  ;;  %v277_v9 = vrot.slane %v275_v63, 4  ;;  %v528_v59 = vsub.f32 %v3137_v3, %v527_v44  ;;  %v1133_v63 = vfloor.f32 %v1132_v49 }
 0x1c9   :  { %v3163_v13 = vsub.f32 %v1129_v0, %v1130_v1  ;;  %v279_v16 = vadd.f32 %v277_v9, %v274_v2  ;;  %v535_v0 = vadd.f32 -0.0001984127, %v534_v51  ;;  %v1134_v3 = vmul.f32 2.0, %v1133_v63 }
 0x1ca   :  { %v1422_v15 = vpop.f32.mrf.mxu2 }
 0x1cb   :  { %v3167_v11 = vmul.f32 %v3163_v13, %v3163_v13  ;;  %v3169_v18 = vmul.f32 2.0, %v1422_v15  ;;  %2727 = vrcp.f32 %v279_v16  ;;  %v3207_v15 = vmul.f32 2.0, %v528_v59 }
 0x1cc   :  { %v559_v16 = vsub.f32 0.0, %v2602_v58  ;;  %v1135_v32 = vsub.f32 %v3157_v55, %v1134_v3 }
 0x1cd   :  { %v1428_v20 = vmul.f32 0.31830987, %v3169_v18  ;;  %v1150_v22 = vmul.f32 2.0876756e-09, %v3167_v11  ;;  %v1139_v54 = vmul.f32 -2.5052108e-08, %v3167_v11 }
 0x1ce   :  { %v560_v30 = vmul.f32 1.442695, %v559_v16  ;;  %v3226_v43 = vmul.f32 2.0, %v1135_v32  ;;  %v2614_v57 = vclamps-f32 %v3169_v18, 50.0 }
 0x1cf   :  { %v1429_v25 = vadd.f32 0.5, %v1428_v20  ;;  %v1151_v28 = vadd.f32 -2.755732e-07, %v1150_v22  ;;  %v1140_v9 = vadd.f32 2.7557319e-06, %v1139_v54  ;;  %v536_v20 = vmul.f32 %v535_v0, %v3150_v23 }
 0x1d0   :  { %2729 = vpow2.f32 %v560_v30  ;;  %v1137_v58 = vsub.f32 1.0, %v3226_v43  ;;  %v1469_v16 = vsub.f32 0.0, %v2614_v57  ;;  %v1467_v32 = vmul.f32 1.442695, %v2614_v57 }
 0x1d1   :  { %v3177_v29 = vfloor.f32 %v1429_v25  ;;  %v2728_v31 = vpop.eup %2727  ;;  %v1152_v4 = vmul.f32 %v1151_v28, %v3167_v11  ;;  %v1141_v22 = vmul.f32 %v1140_v9, %v3167_v11  ;;  %v554_v25 = vadd.f32 1.0, %v553_v12 }
 0x1d2   :  { %v3181_v36 = vmul.f32 %v2728_v31, %v281_v33  ;;  %v285_v38 = vrot.slane %v2728_v31, 4  ;;  %v530_v28 = vsub.f32 1.0, %v3207_v15  ;;  %v2610_v31 = vclamps-f32 %v3153_v45, 50.0 }
 0x1d3   :  { %v1431_v34 = vmul.f32 3.140625, %v3177_v29  ;;  %v1153_v40 = vadd.f32 2.4801588e-05, %v1152_v4  ;;  %v1433_v42 = vmul.f32 0.0009676536, %v3177_v29  ;;  %v1435_v19 = vmul.f32 0.5, %v3177_v29 }
 0x1d4   :  { %v297_v46 = vrot.slane %v3181_v36, 4  ;;  %v3187_v47 = vmul.f32 %v285_v38, %v283_v37  ;;  %v537_v4 = vadd.f32 0.008333334, %v536_v20  ;;  %v1142_v37 = vadd.f32 -0.0001984127, %v1141_v22 }
 0x1d5   :  { %v1432_v41 = vsub.f32 %v3169_v18, %v1431_v34  ;;  %v1154_v48 = vmul.f32 %v1153_v40, %v3167_v11  ;;  %v1436_v33 = vfloor.f32 %v1435_v19  ;;  %v556_v40 = vmul.f32 %v554_v25, %v530_v28 }
 0x1d6   :  { %298 = vrot.lane.b32.xlu2 %v297_v46, %s2925_s14  ;;  %v288_v52 = vsub.f32 0.0, %v3187_v47  ;;  %v1166_v45 = vsub.f32 0.0, %v2610_v31  ;;  %v538_v44 = vmul.f32 %v537_v4, %v3150_v23  ;;  %2731 = vpow2.f32 %v557_v35  ;;  %v2730_v63 = vpop.eup %2729 }
 0x1d7   :  { %v3191_v50 = vsub.f32 %v1432_v41, %v1433_v42  ;;  %v1155_v53 = vadd.f32 -0.0013888889, %v1154_v48  ;;  %v1437_v55 = vmul.f32 2.0, %v1436_v33  ;;  %v1143_v48 = vmul.f32 %v1142_v37, %v3167_v11 }
 0x1d8   :  { %v290_v61 = vrot.slane %v288_v52, 4  ;;  %v563_v51 = vmul.f32 2.0, %v556_v40  ;;  %v1167_v54 = vmul.f32 1.442695, %v1166_v45  ;;  %v1164_v0 = vmul.f32 1.442695, %v2610_v31 }
 0x1d9   :  { %v3199_v56 = vmul.f32 %v3191_v50, %v3191_v50  ;;  %v1156_v62 = vmul.f32 %v1155_v53, %v3167_v11  ;;  %v1438_v59 = vsub.f32 %v3177_v29, %v1437_v55 }
 0x1da   :  { %291 = vrot.lane.b32.xlu1 %v290_v61, %s2925_s14  ;;  %v539_v61 = vadd.f32 -0.16666667, %v538_v44  ;;  %v565_v9 = vrot.slane %v563_v51, 4  ;;  %2733 = vpow2.f32 %v1167_v54 }
 0x1db   :  { %v1453_v1 = vmul.f32 2.0876756e-09, %v3199_v56  ;;  %v1157_v2 = vadd.f32 0.041666668, %v1156_v62  ;;  %v1442_v24 = vmul.f32 -2.5052108e-08, %v3199_v56  ;;  %2735 = vpow2.f32 %v1164_v0 }
 0x1dc   :  { %v2732_v18 = vpop.eup %2731  ;;  %v540_v3 = vmul.f32 %v539_v61, %v3150_v23 }
 0x1dd   :  { %v1454_v14 = vadd.f32 -2.755732e-07, %v1453_v1  ;;  %v1158_v60 = vmul.f32 %v1157_v2, %v3167_v11  ;;  %v1443_v38 = vadd.f32 2.7557319e-06, %v1442_v24  ;;  %v1144_v1 = vadd.f32 0.008333334, %v1143_v48 }
 0x1de   :  { %1969 = vrot.lane.b32.xlu2 %v3032_v7, %s2936_s13  ;;  %v562_v29 = vadd.f32 %v2732_v18, %v2730_v63  ;;  %v541_v30 = vadd.f32 1.0, %v540_v3 }
 0x1df   :  { %v1455_v21 = vmul.f32 %v1454_v14, %v3199_v56  ;;  %v1159_v26 = vadd.f32 -0.5, %v1158_v60  ;;  %v1444_v49 = vmul.f32 %v1443_v38, %v3199_v56  ;;  %v3242_v60 = vmul.f32 2.0, %v1438_v59 }
 0x1e0   :  { %v1145_v20 = vmul.f32 %v1144_v1, %v3167_v11  ;;  %v567_v22 = vadd.f32 %v565_v9, %v562_v29  ;;  %v2734_v31 = vpop.eup %2733  ;;  %v542_v38 = vmul.f32 %v541_v30, %v3146_v17 }
 0x1e1   :  { %v1456_v27 = vadd.f32 2.4801588e-05, %v1455_v21  ;;  %v1160_v41 = vmul.f32 %v1159_v26, %v3167_v11  ;;  %v1445_v2 = vadd.f32 -0.0001984127, %v1444_v49  ;;  %v1470_v26 = vmul.f32 1.442695, %v1469_v16  ;;  %v2736_v35 = vpop.eup %2735 }
 0x1e2   :  { %1966 = vrot.lane.b32.xlu1 %v3029_v6, %s2935_s12  ;;  %v1146_v23 = vadd.f32 -0.16666667, %v1145_v20  ;;  %2737 = vrcp.f32 %v567_v22  ;;  %v1169_v37 = vadd.f32 %v2736_v35, %v2734_v31  ;;  %v555_v44 = vmul.f32 %v542_v38, %v530_v28 }
 0x1e3   :  { %v1457_v34 = vmul.f32 %v1456_v27, %v3199_v56  ;;  %v1161_v52 = vadd.f32 1.0, %v1160_v41  ;;  %v1446_v21 = vmul.f32 %v1445_v2, %v3199_v56  ;;  %v1440_v27 = vsub.f32 1.0, %v3242_v60 }
 0x1e4   :  { %2739 = vpow2.f32 %v1470_v26  ;;  %v1147_v40 = vmul.f32 %v1146_v23, %v3167_v11  ;;  %v569_v11 = vsub.f32 %v2732_v18, %v2730_v63 }
 0x1e5   :  { %v1458_v42 = vadd.f32 -0.0013888889, %v1457_v34  ;;  %v1163_v12 = vmul.f32 %v1161_v52, %v1137_v58  ;;  %v1447_v33 = vadd.f32 0.008333334, %v1446_v21  ;;  %2741 = vpow2.f32 %v1467_v32  ;;  %v1955_v21 = vpop.permute.xlu0 %1954 }
 0x1e6   :  { %1961 = vrot.lane.b32.xlu2 %v3037_v8, %s2936_s13  ;;  %v571_v52 = vmul.f32 2.0, %v555_v44 }
 0x1e7   :  { %v1459_v46 = vmul.f32 %v1458_v42, %v3199_v56  ;;  %v1170_v24 = vmul.f32 2.0, %v1163_v12  ;;  %v1448_v41 = vmul.f32 %v1447_v33, %v3199_v56 }
 0x1e8   :  { %v2738_v45 = vpop.eup %2737 }
 0x1e9   :  { %v1460_v53 = vadd.f32 0.041666668, %v1459_v46  ;;  %v1172_v4 = vrot.slane %v1170_v24, 4  ;;  %v1148_v46 = vadd.f32 1.0, %v1147_v40  ;;  %v1449_v48 = vadd.f32 -0.16666667, %v1448_v41 }
 0x1ea   :  { %1957 = vrot.lane.b32.xlu1 %v3044_v10, %s2936_s13  ;;  %v2740_v55 = vpop.eup %2739  ;;  %v573_v17 = vrot.slane %v2738_v45, 4  ;;  %v3266_v57 = vmul.f32 %v2738_v45, %v569_v11  ;;  %v2938_v11 = vmov 7  }
 0x1eb   :  { %v1461_v62 = vmul.f32 %v1460_v53, %v3199_v56  ;;  %v1174_v42 = vadd.f32 %v1172_v4, %v1169_v37  ;;  %v2742_v49 = vpop.eup %2741  ;;  %v1149_v53 = vmul.f32 %v1148_v46, %v3163_v13  ;;  %v1450_v54 = vmul.f32 %v1449_v48, %v3199_v56  ;;  %2674 = vset.pattern.permute.xlu0 %v2938_v11 }
 0x1ec   :  { %v1472_v51 = vadd.f32 %v2742_v49, %v2740_v55  ;;  %v3268_v15 = vmul.f32 %v573_v17, %v571_v52  ;;  %v1479_v18 = vsub.f32 %v2742_v49, %v2740_v55 }
 0x1ed   :  { %v1462_v14 = vadd.f32 -0.5, %v1461_v62  ;;  %2743 = vrcp.f32 %v1174_v42  ;;  %v1162_v59 = vmul.f32 %v1149_v53, %v1137_v58  ;;  %v1451_v61 = vadd.f32 1.0, %v1450_v54  ;;  %v1680_v22 = vpop.permute.xlu0 %1679 }
 0x1ee   :  { %1667 = vrot.lane.b32.xlu2 %v3027_v5, %s2936_s13  ;;  %v576_v13 = vsub.f32 0.0, %v3268_v15 }
 0x1ef   :  { %v1463_v19 = vmul.f32 %v1462_v14, %v3199_v56  ;;  %v1176_v56 = vsub.f32 %v2736_v35, %v2734_v31  ;;  %v1178_v63 = vmul.f32 2.0, %v1162_v59  ;;  %v1452_v0 = vmul.f32 %v1451_v61, %v3191_v50 }
 0x1f0   :  { %v578_v1 = vrot.slane %v576_v13, 4 }
 0x1f1   :  { %v1464_v25 = vadd.f32 1.0, %v1463_v19  ;;  %v1465_v58 = vmul.f32 %v1452_v0, %v1440_v27 }
 0x1f2   :  { %1682 = vrot.lane.b32.xlu1 %v3032_v7, %s2933_s10 }
 0x1f3   :  { %v1466_v34 = vmul.f32 %v1464_v25, %v1440_v27  ;;  %v2744_v28 = vpop.eup %2743  ;;  %v1481_v16 = vmul.f32 2.0, %v1465_v58 }
 0x1f4   :  { %v1180_v62 = vrot.slane %v2744_v28, 4  ;;  %v3278_v2 = vmul.f32 %v2744_v28, %v1176_v56 }
 0x1f5   :  { %v1473_v7 = vmul.f32 2.0, %v1466_v34  ;;  %v1671_v24 = vpop.permute.xlu0 %1670 }
 0x1f6   :  { %2253 = vrot.lane.b32.xlu2 %v3029_v6, %s2937_s15  ;;  %v1191_v9 = vrot.slane %v3278_v2, 4 }
 0x1f7   :  { %v1475_v6 = vrot.slane %v1473_v7, 4 }
 0x1fa   :  { %1674 = vrot.lane.b32.xlu1 %v3037_v8, %s2933_s10  ;;  %v1477_v8 = vadd.f32 %v1475_v6, %v1472_v51 }
 0x1fc   :  { %2745 = vrcp.f32 %v1477_v8 }
 0x1fd   :  { %v2257_v26 = vpop.permute.xlu0 %2256 }
 0x1fe   :  { %2244 = vrot.lane.b32.xlu2 %v3044_v10, %s2935_s12  ;;  %v584_v10 = vrot.slane %v3266_v57, 4 }
 0x202   :  { %2241 = vrot.lane.b32.xlu1 %v3027_v5, %s2937_s15  ;;  %v3280_v5 = vmul.f32 %v1180_v62, %v1178_v63  ;;  %v2746_v43 = vpop.eup %2745 }
 0x203   :  { %v1483_v14 = vrot.slane %v2746_v43, 4  ;;  %v3286_v50 = vmul.f32 %v2746_v43, %v1479_v18 }
 0x204   :  { %v1183_v12 = vsub.f32 0.0, %v3280_v5 }
 0x205   :  { %v3288_v29 = vmul.f32 %v1483_v14, %v1481_v16  ;;  %v1494_v3 = vrot.slane %v3286_v50, 4  ;;  %v2249_v31 = vpop.permute.xlu0 %2248  ;;  %v2939_v14 = vmov 2  }
 0x206   :  { %585 = vrot.lane.b32.xlu2 %v584_v10, %s2925_s14  ;;  %v1185_v60 = vrot.slane %v1183_v12, 4 }
 0x207   :  { %v1486_v19 = vsub.f32 0.0, %v3288_v29 }
 0x209   :  { %v1488_v20 = vrot.slane %v1486_v19, 4 }
 0x20a   :  { %579 = vrot.lane.b32.xlu1 %v578_v1, %s2925_s14 }
 0x20d   :  { %v592_v37 = vpop.permute.xlu0 %591 }
 0x20e   :  { %1192 = vrot.lane.b32.xlu2 %v1191_v9, %s2925_s14  ;;  %612 = vmatpush.msrb.mxu1 %v592_v37 }
 0x212   :  { %1186 = vrot.lane.b32.xlu1 %v1185_v60, %s2925_s14 }
 0x215   :  { %v895_v41 = vpop.permute.xlu0 %894 }
 0x216   :  { %1495 = vrot.lane.b32.xlu2 %v1494_v3, %s2925_s14 }
 0x21a   :  { %1489 = vrot.lane.b32.xlu1 %v1488_v20, %s2925_s14 }
 0x21d   :  { %v1198_v44 = vpop.permute.xlu0 %1197 }
 0x21e   :  { %1218 = vmatpush.msra.mxu1 %v1198_v44 }
 0x225   :  { %v1501_v51 = vpop.permute.xlu0 %1500 }
 0x22d   :  { %v1788_v62 = vpop.permute.xlu0 %1787 }
 0x230   :  { %v299_v25 = vpop.permute.xlu2 %298 }
 0x231   :  { %v301_v32 = vsel %vm294_vm3, %v3187_v47, %v299_v25 }
 0x238   :  { %v1970_v27 = vpop.permute.xlu2 %1969 }
 0x240   :  { %v1962_v4 = vpop.permute.xlu2 %1961 }
 0x241   :  { %v1964_v40 = vsel %vm185_vm1, %v1955_v21, %v1962_v4 }
 0x248   :  { %v1668_v38 = vpop.permute.xlu2 %1667 }
 0x249   :  { %v1673_v48 = vsel %vm185_vm1, %v1668_v38, %v1671_v24 }
 0x24c   :  { %v292_v30 = vpop.permute.xlu1 %291 }
 0x24d   :  { %v295_v23 = vsel %vm294_vm3, %v3181_v36, %v292_v30 }
 0x24e   :  { %v302_v33 = vsel %vm193_vm2, %v295_v23, %v301_v32 }
 0x24f   :  { %2599 = vmatmul.msk.f32.vlgmr.msrb.gmra.mxu3 %vm185_vm1, %v302_v33 }
 0x250   :  { %915 = vmatpush.msrb.mxu3 %v895_v41  ;;  %v2254_v7 = vpop.permute.xlu2 %2253 }
 0x251   :  { %v2259_v46 = vsel %vm185_vm1, %v2254_v7, %v2257_v26 }
 0x254   :  { %v1967_v34 = vpop.permute.xlu1 %1966 }
 0x255   :  { %v1972_v35 = vsel %vm185_vm1, %v1967_v34, %v1970_v27 }
 0x256   :  { %2620 = vmatpush.xpose.msk.msra.mxu2 %vm116_vm0, %v1972_v35 }
 0x257   :  { %2605 = vmatmul.msk.f32.vlgmr.msra.gmra.mxu3 %vm116_vm0, %v3118_v39 }
 0x258   :  { %v2245_v49 = vpop.permute.xlu2 %2244  ;;  %1521 = vmatpush.msra.mxu3 %v1501_v51 }
 0x25c   :  { %v1958_v47 = vpop.permute.xlu1 %1957 }
 0x25d   :  { %v1960_v36 = vsel %vm185_vm1, %v1955_v21, %v1958_v47 }
 0x25e   :  { %v1965_v42 = vsel %vm193_vm2, %v1960_v36, %v1964_v40 }
 0x25f   :  { %2621 = vmatmul.msk.f32.vlgmr.msra.gmra.mxu2 %vm116_vm0, %v1965_v42 }
 0x260   :  { %v586_v28 = vpop.permute.xlu2 %585 }
 0x261   :  { %v588_v61 = vsel %vm294_vm3, %v3268_v15, %v586_v28  ;;  %v3334_v15 = vpop.permute.xlu0 %2074 }
 0x264   :  { %v1683_v45 = vpop.permute.xlu1 %1682 }
 0x265   :  { %v1685_v55 = vsel %vm185_vm1, %v1680_v22, %v1683_v45 }
 0x266   :  { %2616 = vmatpush.xpose.msk.msrb.mxu0 %vm116_vm0, %v1685_v55 }
 0x268   :  { %v1193_v56 = vpop.permute.xlu2 %1192 }
 0x269   :  { %v1195_v0 = vsel %vm294_vm3, %v3280_v5, %v1193_v56 }
 0x26a   :  { %2624 = vmatpush.xpose.msk.msra.mxu0 %vm116_vm0, %v2259_v46 }
 0x26c   :  { %v1675_v39 = vpop.permute.xlu1 %1674 }
 0x26d   :  { %v1677_v6 = vsel %vm185_vm1, %v1668_v38, %v1675_v39 }
 0x26e   :  { %v1678_v17 = vsel %vm193_vm2, %v1673_v48, %v1677_v6 }
 0x26f   :  { %2617 = vmatmul.msk.f32.vlgmr.msrb.gmra.mxu0 %vm116_vm0, %v1678_v17 }
 0x274   :  { %v2242_v52 = vpop.permute.xlu1 %2241 }
 0x275   :  { %v2247_v53 = vsel %vm185_vm1, %v2242_v52, %v2245_v49  ;;  %v2251_v54 = vsel %vm185_vm1, %v2242_v52, %v2249_v31 }
 0x276   :  { %v2252_v8 = vsel %vm193_vm2, %v2247_v53, %v2251_v54 }
 0x277   :  { %2625 = vmatmul.msk.f32.vlgmr.msra.gmra.mxu0 %vm116_vm0, %v2252_v8 }
 0x27c   :  { %v580_v59 = vpop.permute.xlu1 %579 }
 0x27d   :  { %v582_v10 = vsel %vm294_vm3, %v3266_v57, %v580_v59  ;;  %v2362_v57 = vpop.permute.xlu0 %2361 }
 0x27e   :  { %v589_v13 = vsel %vm193_vm2, %v582_v10, %v588_v61 }
 0x27f   :  { %2603 = vmatmul.msk.f32.vlgmr.msrb.gmra.mxu1 %vm185_vm1, %v589_v13 }
 0x280   :  { %1808 = vmatpush.msrb.mxu1 %v1788_v62 }
 0x284   :  { %v1187_v63 = vpop.permute.xlu1 %1186 }
 0x285   :  { %v1189_v1 = vsel %vm294_vm3, %v3278_v2, %v1187_v63 }
 0x286   :  { %v1196_v43 = vsel %vm193_vm2, %v1189_v1, %v1195_v0 }
 0x287   :  { %2611 = vmatmul.msk.f32.vlgmr.msra.gmra.mxu1 %vm185_vm1, %v1196_v43 }
 0x288   :  { %2382 = vmatpush.msra.mxu1 %v2362_v57 }
 0x2d2   :  { %v3336_v58 = vpop.f32.mrf.mxu3 }
 0x2d3   :  { %454 = vperm.xlu0 %2674, %v3336_v58  }
 0x2da   :  { %v816_v9 = vpop.f32.mrf.mxu3 }
 0x2db   :  { %v819_v12 = vmul.f32 2.0, %v816_v9  ;;  %2675 = vset.pattern.permute.xlu0 %v2939_v14 }
 0x2dc   :  { %364 = vperm.xlu0 %2675, %v3336_v58  }
 0x2dd   :  { %v822_v2 = vmul.f32 0.31830987, %v819_v12  ;;  %v2606_v22 = vclamps-f32 %v819_v12, 50.0 }
 0x2df   :  { %v823_v5 = vadd.f32 0.5, %v822_v2  ;;  %v863_v31 = vsub.f32 0.0, %v2606_v22  ;;  %v861_v41 = vmul.f32 1.442695, %v2606_v22 }
 0x2e1   :  { %v824_v18 = vfloor.f32 %v823_v5  ;;  %v864_v47 = vmul.f32 1.442695, %v863_v31 }
 0x2e2   :  { %v1996_v16 = vpop.f32.mrf.mxu2 }
 0x2e3   :  { %v825_v60 = vmul.f32 3.140625, %v824_v18  ;;  %v1999_v3 = vmul.f32 2.0, %v1996_v16  ;;  %v827_v20 = vmul.f32 0.0009676536, %v824_v18  ;;  %v829_v26 = vmul.f32 0.5, %v824_v18 }
 0x2e4   :  { %2747 = vpow2.f32 %v864_v47 }
 0x2e5   :  { %v826_v19 = vsub.f32 %v819_v12, %v825_v60  ;;  %v2002_v21 = vmul.f32 0.31830987, %v1999_v3  ;;  %v830_v4 = vfloor.f32 %v829_v26  ;;  %v2622_v45 = vclamps-f32 %v1999_v3, 50.0 }
 0x2e6   :  { %2749 = vpow2.f32 %v861_v41 }
 0x2e7   :  { %v3341_v24 = vsub.f32 %v826_v19, %v827_v20  ;;  %v2003_v25 = vadd.f32 0.5, %v2002_v21  ;;  %v831_v7 = vmul.f32 2.0, %v830_v4  ;;  %v2043_v51 = vsub.f32 0.0, %v2622_v45 }
 0x2e8   :  { %v3384_v5 = vmul.f32 1.442695, %v2622_v45 }
 0x2e9   :  { %v3345_v27 = vmul.f32 %v3341_v24, %v3341_v24  ;;  %v3347_v30 = vfloor.f32 %v2003_v25  ;;  %v832_v17 = vsub.f32 %v824_v18, %v831_v7  ;;  %v2044_v1 = vmul.f32 1.442695, %v2043_v51 }
 0x2ea   :  { %v3375_v56 = vpop.eup %2747 }
 0x2eb   :  { %v847_v32 = vmul.f32 2.0876756e-09, %v3345_v27  ;;  %v2005_v23 = vmul.f32 3.140625, %v3347_v30  ;;  %v2007_v38 = vmul.f32 0.0009676536, %v3347_v30  ;;  %v3377_v63 = vmul.f32 2.0, %v832_v17 }
 0x2ec   :  { %v1709_v33 = vpop.f32.mrf.mxu0  ;;  %v836_v53 = vmul.f32 -2.5052108e-08, %v3345_v27  ;;  %v2009_v0 = vmul.f32 0.5, %v3347_v30  ;;  %v3382_v57 = vpop.eup %2749  ;;  %2751 = vpow2.f32 %v2044_v1 }
 0x2ed   :  { %v3351_v34 = vmul.f32 2.0, %v1709_v33  ;;  %v848_v35 = vadd.f32 -2.755732e-07, %v847_v32  ;;  %v2006_v37 = vsub.f32 %v1999_v3, %v2005_v23  ;;  %v866_v19 = vadd.f32 %v3382_v57, %v3375_v56 }
 0x2ee   :  { %v837_v2 = vadd.f32 2.7557319e-06, %v836_v53  ;;  %v834_v21 = vsub.f32 1.0, %v3377_v63  ;;  %v2010_v22 = vfloor.f32 %v2009_v0 }
 0x2ef   :  { %v1715_v40 = vmul.f32 0.31830987, %v3351_v34  ;;  %v849_v36 = vmul.f32 %v848_v35, %v3345_v27  ;;  %v3356_v42 = vsub.f32 %v2006_v37, %v2007_v38  ;;  %v2618_v23 = vclamps-f32 %v3351_v34, 50.0 }
 0x2f0   :  { %v838_v32 = vmul.f32 %v837_v2, %v3345_v27 }
 0x2f1   :  { %v1716_v55 = vadd.f32 0.5, %v1715_v40  ;;  %v850_v44 = vadd.f32 2.4801588e-05, %v849_v36  ;;  %v3360_v46 = vmul.f32 %v3356_v42, %v3356_v42  ;;  %v2011_v36 = vmul.f32 2.0, %v2010_v22 }
 0x2f2   :  { %v1756_v53 = vsub.f32 0.0, %v2618_v23 }
 0x2f3   :  { %v3362_v39 = vfloor.f32 %v1716_v55  ;;  %v851_v48 = vmul.f32 %v850_v44, %v3345_v27  ;;  %v2027_v49 = vmul.f32 2.0876756e-09, %v3360_v46  ;;  %v2016_v40 = vmul.f32 -2.5052108e-08, %v3360_v46 }
 0x2f4   :  { %v2283_v6 = vpop.f32.mrf.mxu0 }
 0x2f5   :  { %v1718_v52 = vmul.f32 3.140625, %v3362_v39  ;;  %v3368_v54 = vmul.f32 2.0, %v2283_v6  ;;  %v852_v8 = vadd.f32 -0.0013888889, %v851_v48  ;;  %v2028_v28 = vadd.f32 -2.755732e-07, %v2027_v49  ;;  %v3412_v6 = vpop.eup %2751 }
 0x2f6   :  { %v1720_v61 = vmul.f32 0.0009676536, %v3362_v39  ;;  %v1722_v26 = vmul.f32 0.5, %v3362_v39  ;;  %v839_v48 = vadd.f32 -0.0001984127, %v838_v32 }
 0x2f7   :  { %v1719_v59 = vsub.f32 %v3351_v34, %v1718_v52  ;;  %v2289_v10 = vmul.f32 0.31830987, %v3368_v54  ;;  %v853_v13 = vmul.f32 %v852_v8, %v3345_v27  ;;  %v2029_v62 = vmul.f32 %v2028_v28, %v3360_v46 }
 0x2f8   :  { %v1723_v55 = vfloor.f32 %v1722_v26  ;;  %v1754_v49 = vmul.f32 1.442695, %v2618_v23  ;;  %v840_v2 = vmul.f32 %v839_v48, %v3345_v27 }
 0x2f9   :  { %v3380_v43 = vsub.f32 %v1719_v59, %v1720_v61  ;;  %v2290_v9 = vadd.f32 0.5, %v2289_v10  ;;  %v854_v12 = vadd.f32 0.041666668, %v853_v13  ;;  %v2030_v20 = vadd.f32 2.4801588e-05, %v2029_v62 }
 0x2fa   :  { %v2017_v61 = vadd.f32 2.7557319e-06, %v2016_v40  ;;  %v2012_v10 = vsub.f32 %v3347_v30, %v2011_v36  ;;  %v1724_v1 = vmul.f32 2.0, %v1723_v55  ;;  %v841_v40 = vadd.f32 0.008333334, %v840_v2 }
 0x2fb   :  { %v3388_v18 = vmul.f32 %v3380_v43, %v3380_v43  ;;  %v3390_v16 = vfloor.f32 %v2290_v9  ;;  %v855_v3 = vmul.f32 %v854_v12, %v3345_v27  ;;  %v2031_v47 = vmul.f32 %v2030_v20, %v3360_v46 }
 0x2fc   :  { %v3392_v60 = vpop.f32.mrf.mxu1  ;;  %v2018_v32 = vmul.f32 %v2017_v61, %v3360_v46 }
 0x2fd   :  { %v1740_v25 = vmul.f32 2.0876756e-09, %v3388_v18  ;;  %v2292_v31 = vmul.f32 3.140625, %v3390_v16  ;;  %v856_v33 = vadd.f32 -0.5, %v855_v3  ;;  %v1729_v35 = vmul.f32 -2.5052108e-08, %v3388_v18 }
 0x2fe   :  { %v2294_v38 = vmul.f32 0.0009676536, %v3390_v16  ;;  %v2032_v44 = vadd.f32 -0.0013888889, %v2031_v47  ;;  %v2296_v26 = vmul.f32 0.5, %v3390_v16 }
 0x2ff   :  { %v1741_v4 = vadd.f32 -2.755732e-07, %v1740_v25  ;;  %v2293_v37 = vsub.f32 %v3368_v54, %v2292_v31  ;;  %v857_v41 = vmul.f32 %v856_v33, %v3345_v27  ;;  %v1730_v45 = vadd.f32 2.7557319e-06, %v1729_v35 }
 0x300   :  { %v2033_v59 = vmul.f32 %v2032_v44, %v3360_v46  ;;  %v1757_v25 = vmul.f32 1.442695, %v1756_v53  ;;  %v2019_v48 = vadd.f32 -0.0001984127, %v2018_v32 }
 0x301   :  { %v1742_v7 = vmul.f32 %v1741_v4, %v3388_v18  ;;  %v3410_v34 = vsub.f32 %v2293_v37, %v2294_v38  ;;  %v858_v17 = vadd.f32 1.0, %v857_v41  ;;  %v1731_v52 = vmul.f32 %v1730_v45, %v3388_v18 }
 0x302   :  { %v2034_v12 = vadd.f32 0.041666668, %v2033_v59  ;;  %v3435_v37 = vmul.f32 2.0, %v2012_v10  ;;  %v1725_v38 = vsub.f32 %v3362_v39, %v1724_v1  ;;  %2753 = vpow2.f32 %v1757_v25 }
 0x303   :  { %v1743_v51 = vadd.f32 2.4801588e-05, %v1742_v7  ;;  %v3417_v8 = vmul.f32 %v3410_v34, %v3410_v34  ;;  %v860_v13 = vmul.f32 %v858_v17, %v834_v21  ;;  %v1732_v0 = vadd.f32 -0.0001984127, %v1731_v52 }
 0x304   :  { %v3419_v28 = vpop.f32.mrf.mxu1  ;;  %v2035_v31 = vmul.f32 %v2034_v12, %v3360_v46  ;;  %v2297_v17 = vfloor.f32 %v2296_v26  ;;  %v2014_v53 = vsub.f32 1.0, %v3435_v37  ;;  %v2626_v59 = vclamps-f32 %v3368_v54, 50.0 }
 0x305   :  { %1263 = vperm.xlu0 %2675, %v3419_v28   ;;  %v1744_v62 = vmul.f32 %v1743_v51, %v3388_v18  ;;  %v2303_v9 = vmul.f32 -2.5052108e-08, %v3417_v8  ;;  %v867_v3 = vmul.f32 2.0, %v860_v13  ;;  %v1733_v22 = vmul.f32 %v1732_v0, %v3388_v18 }
 0x306   :  { %v2314_v30 = vmul.f32 2.0876756e-09, %v3417_v8  ;;  %v2036_v47 = vadd.f32 -0.5, %v2035_v31  ;;  %v2940_v51 = vmov 3   ;;  %v2298_v12 = vmul.f32 2.0, %v2297_v17 }
 0x307   :  { %v1745_v20 = vadd.f32 -0.0013888889, %v1744_v62  ;;  %v869_v23 = vrot.slane %v867_v3, 4  ;;  %v1734_v4 = vadd.f32 0.008333334, %v1733_v22  ;;  %v842_v62 = vmul.f32 %v841_v40, %v3345_v27 }
 0x308   :  { %v2315_v35 = vadd.f32 -2.755732e-07, %v2314_v30  ;;  %v2304_v36 = vadd.f32 2.7557319e-06, %v2303_v9  ;;  %v2037_v44 = vmul.f32 %v2036_v47, %v3360_v46  ;;  %v2020_v9 = vmul.f32 %v2019_v48, %v3360_v46 }
 0x309   :  { %v1746_v33 = vmul.f32 %v1745_v20, %v3388_v18  ;;  %v871_v41 = vadd.f32 %v869_v23, %v866_v19  ;;  %v1735_v55 = vmul.f32 %v1734_v4, %v3388_v18  ;;  %v3444_v19 = vmul.f32 2.0, %v1725_v38  ;;  %v3455_v20 = vpop.eup %2753 }
 0x30a   :  { %v2316_v45 = vmul.f32 %v2315_v35, %v3417_v8  ;;  %v2038_v61 = vadd.f32 1.0, %v2037_v44  ;;  %v2305_v10 = vmul.f32 %v2304_v36, %v3417_v8  ;;  %v2330_v30 = vsub.f32 0.0, %v2626_v59 }
 0x30b   :  { %v1747_v7 = vadd.f32 0.041666668, %v1746_v33  ;;  %2755 = vrcp.f32 %v871_v41  ;;  %v1736_v1 = vadd.f32 -0.16666667, %v1735_v55  ;;  %v1727_v22 = vsub.f32 1.0, %v3444_v19 }
 0x30c   :  { %v2317_v52 = vadd.f32 2.4801588e-05, %v2316_v45  ;;  %2757 = vpow2.f32 %v1754_v49  ;;  %v2040_v54 = vmul.f32 %v2038_v61, %v2014_v53  ;;  %v873_v49 = vsub.f32 %v3382_v57, %v3375_v56 }
 0x30d   :  { %2684 = vset.pattern.permute.xlu0 %v2940_v51  ;;  %v1748_v39 = vmul.f32 %v1747_v7, %v3388_v18  ;;  %2759 = vpow2.f32 %v3384_v5  ;;  %v2306_v26 = vadd.f32 -0.0001984127, %v2305_v10  ;;  %v843_v32 = vadd.f32 -0.16666667, %v842_v62 }
 0x30e   :  { %675 = vperm.xlu0 %2684, %v3392_v60   ;;  %v2318_v0 = vmul.f32 %v2317_v52, %v3417_v8  ;;  %v1737_v4 = vmul.f32 %v1736_v1, %v3388_v18  ;;  %v2021_v35 = vadd.f32 0.008333334, %v2020_v9  ;;  %v2299_v5 = vsub.f32 %v3390_v16, %v2298_v12 }
 0x30f   :  { %v1749_v13 = vadd.f32 -0.5, %v1748_v39  ;;  %v2047_v47 = vmul.f32 2.0, %v2040_v54  ;;  %v2331_v56 = vmul.f32 1.442695, %v2330_v30  ;;  %v2307_v41 = vmul.f32 %v2306_v26, %v3417_v8 }
 0x310   :  { %v2319_v3 = vadd.f32 -0.0013888889, %v2318_v0  ;;  %v844_v45 = vmul.f32 %v843_v32, %v3345_v27  ;;  %v2328_v48 = vmul.f32 1.442695, %v2626_v59  ;;  %v1738_v16 = vadd.f32 1.0, %v1737_v4 }
 0x311   :  { %v1750_v2 = vmul.f32 %v1749_v13, %v3388_v18  ;;  %v3461_v25 = vpop.eup %2755  ;;  %v2022_v17 = vmul.f32 %v2021_v35, %v3360_v46  ;;  %v3476_v39 = vmul.f32 2.0, %v2299_v5  ;;  %v2049_v19 = vrot.slane %v2047_v47, 4 }
 0x312   :  { %v2320_v23 = vmul.f32 %v2319_v3, %v3417_v8  ;;  %v3465_v33 = vmul.f32 %v3461_v25, %v873_v49  ;;  %v2758_v36 = vpop.eup %2757  ;;  %2761 = vpow2.f32 %v2331_v56  ;;  %v2308_v27 = vadd.f32 0.008333334, %v2307_v41 }
 0x313   :  { %v1751_v31 = vadd.f32 1.0, %v1750_v2  ;;  %v2760_v44 = vpop.eup %2759  ;;  %v1759_v18 = vadd.f32 %v2758_v36, %v3455_v20  ;;  %v845_v62 = vadd.f32 1.0, %v844_v45  ;;  %2763 = vpow2.f32 %v2328_v48 }
 0x314   :  { %v2321_v40 = vadd.f32 0.041666668, %v2320_v23  ;;  %v888_v57 = vrot.slane %v3465_v33, 4  ;;  %v2046_v10 = vadd.f32 %v2760_v44, %v3412_v6  ;;  %v1739_v0 = vmul.f32 %v1738_v16, %v3380_v43 }
 0x315   :  { %v1753_v38 = vmul.f32 %v1751_v31, %v1727_v22  ;;  %v2023_v1 = vadd.f32 -0.16666667, %v2022_v17  ;;  %v2301_v9 = vsub.f32 1.0, %v3476_v39  ;;  %v2941_v54 = vmov 1  }
 0x316   :  { %v2322_v55 = vmul.f32 %v2321_v40, %v3417_v8  ;;  %889 = vrot.lane.b32.xlu2 %v888_v57, %s2925_s14  ;;  %v2051_v12 = vadd.f32 %v2049_v19, %v2046_v10  ;;  %v2309_v3 = vmul.f32 %v2308_v27, %v3417_v8  ;;  %v846_v30 = vmul.f32 %v845_v62, %v3341_v24 }
 0x317   :  { %v1760_v7 = vmul.f32 2.0, %v1753_v38  ;;  %2669 = vset.pattern.permute.xlu2 %v2941_v54  ;;  %v1752_v31 = vmul.f32 %v1739_v0, %v1727_v22  ;;  %v2024_v32 = vmul.f32 %v2023_v1, %v3360_v46  ;;  %v1766_v4 = vsub.f32 %v2758_v36, %v3455_v20 }
 0x318   :  { %v2323_v61 = vadd.f32 -0.5, %v2322_v55  ;;  %v2762_v26 = vpop.eup %2761  ;;  %v2310_v5 = vadd.f32 -0.16666667, %v2309_v3  ;;  %v859_v38 = vmul.f32 %v846_v30, %v834_v21  ;;  %v877_v45 = vrot.slane %v3461_v25, 4 }
 0x319   :  { %v1762_v52 = vrot.slane %v1760_v7, 4  ;;  %v2764_v23 = vpop.eup %2763  ;;  %v1768_v24 = vmul.f32 2.0, %v1752_v31  ;;  %v2025_v41 = vadd.f32 1.0, %v2024_v32  ;;  %v2053_v36 = vsub.f32 %v2760_v44, %v3412_v6  ;;  %v1490_v31 = vpop.permute.xlu1 %1489 }
 0x31a   :  { %v2324_v59 = vmul.f32 %v2323_v61, %v3417_v8  ;;  %v2333_v47 = vadd.f32 %v2764_v23, %v2762_v26  ;;  %v2311_v63 = vmul.f32 %v2310_v5, %v3417_v8  ;;  %v875_v55 = vmul.f32 2.0, %v859_v38 }
 0x31b   :  { %v1764_v13 = vadd.f32 %v1762_v52, %v1759_v18  ;;  %v2026_v48 = vmul.f32 %v2025_v41, %v3356_v42  ;;  %v2942_v39 = vmov 0   ;;  %v2340_v61 = vsub.f32 %v2764_v23, %v2762_v26 }
 0x31c   :  { %v2325_v2 = vadd.f32 1.0, %v2324_v59  ;;  %v3502_v17 = vmul.f32 %v877_v45, %v875_v55  ;;  %2668 = vset.pattern.permute.xlu1 %v2942_v39  ;;  %v2312_v25 = vadd.f32 1.0, %v2311_v63  ;;  %v2943_v30 = vmov 4   ;;  %v352_v63 = vld [vmem:[#allocation11 + $0x4] sm:$0xf] }
 0x31d   :  { %2765 = vrcp.f32 %v1764_v13  ;;  %v2039_v6 = vmul.f32 %v2026_v48, %v2014_v53  ;;  %v354_v55 = vrot.slane %v352_v63, 4  ;;  %v370_v48 = vld [vmem:[#allocation11 + $0x8] sm:$0xf] }
 0x31e   :  { %v2327_v49 = vmul.f32 %v2325_v2, %v2301_v9  ;;  %2767 = vrcp.f32 %v2051_v12  ;;  %v880_v44 = vsub.f32 0.0, %v3502_v17  ;;  %v2313_v19 = vmul.f32 %v2312_v25, %v3410_v34 }
 0x31f   :  { %v2055_v10 = vmul.f32 2.0, %v2039_v6  ;;  %v344_v6 = vld [vmem:[#allocation9 + $0x4] sm:$0xf] }
 0x320   :  { %v2334_v43 = vmul.f32 2.0, %v2327_v49  ;;  %v882_v27 = vrot.slane %v880_v44, 4  ;;  %v2326_v37 = vmul.f32 %v2313_v19, %v2301_v9  ;;  %v2944_v9 = vmov 6  }
 0x321   :  { %v2945_v49 = vmov 5  }
 0x322   :  { %v2336_v40 = vrot.slane %v2334_v43, 4  ;;  %v2342_v34 = vmul.f32 2.0, %v2326_v37 }
 0x323   :  { %v2766_v35 = vpop.eup %2765 }
 0x324   :  { %v3489_v56 = vmul.f32 %v2766_v35, %v1766_v4  ;;  %v1770_v57 = vrot.slane %v2766_v35, 4  ;;  %v2338_v22 = vadd.f32 %v2336_v40, %v2333_v47  ;;  %v2768_v20 = vpop.eup %2767 }
 0x325   :  { %v3500_v16 = vmul.f32 %v2768_v20, %v2053_v36  ;;  %v2057_v42 = vrot.slane %v2768_v20, 4  ;;  %v334_v36 = vld [vmem:[#allocation11] sm:$0xf] }
 0x326   :  { %v1781_v46 = vrot.slane %v3489_v56, 4  ;;  %v3492_v7 = vmul.f32 %v1770_v57, %v1768_v24  ;;  %2769 = vrcp.f32 %v2338_v22 }
 0x327   :  { %v2068_v8 = vrot.slane %v3500_v16, 4  ;;  %v3514_v62 = vmul.f32 %v2057_v42, %v2055_v10 }
 0x328   :  { %1782 = vrot.lane.b32.xlu2 %v1781_v46, %s2925_s14  ;;  %v1773_v21 = vsub.f32 0.0, %v3492_v7 }
 0x329   :  { %v2060_v59 = vsub.f32 0.0, %v3514_v62 }
 0x32a   :  { %v1775_v18 = vrot.slane %v1773_v21, 4  ;;  %v336_v21 = vrot.slane %v334_v36, 4  ;;  %v434_v36 = vld [vmem:[#allocation9 + $0x18] sm:$0xf] }
 0x32b   :  { %v2062_v1 = vrot.slane %v2060_v59, 4 }
 0x32c   :  { %1776 = vrot.lane.b32.xlu1 %v1775_v18, %s2925_s14  ;;  %v2770_v52 = vpop.eup %2769 }
 0x32d   :  { %v3512_v13 = vmul.f32 %v2770_v52, %v2340_v61  ;;  %v2344_v0 = vrot.slane %v2770_v52, 4  ;;  %v388_v61 = vld [vmem:[#allocation11 + $0xc] sm:$0xf] }
 0x32e   :  { %v390_v59 = vrot.slane %v388_v61, 4 }
 0x32f   :  { %v2355_v53 = vrot.slane %v3512_v13, 4  ;;  %v2346_v12 = vmul.f32 %v2344_v0, %v2342_v34  ;;  %v406_v0 = vld [vmem:[#allocation11 + $0x10] sm:$0xf] }
 0x330   :  { %2069 = vrot.lane.b32.xlu2 %v2068_v8, %s2925_s14  ;;  %v372_v8 = vrot.slane %v370_v48, 4 }
 0x331   :  { %v2347_v2 = vsub.f32 0.0, %v2346_v12 }
 0x333   :  { %v2349_v3 = vrot.slane %v2347_v2, 4 }
 0x334   :  { %883 = vrot.lane.b32.xlu1 %v882_v27, %s2925_s14 }
 0x338   :  { %2356 = vrot.lane.b32.xlu2 %v2355_v53, %s2925_s14 }
 0x33c   :  { %2063 = vrot.lane.b32.xlu1 %v2062_v1, %s2925_s14 }
 0x340   :  { %346 = vperm.xlu2 %2669, %v3336_v58  }
 0x344   :  { %2350 = vrot.lane.b32.xlu1 %v2349_v3, %s2925_s14  ;;  %v380_v3 = vld [vmem:[#allocation9 + $0xc] sm:$0xf]  ;;  %s2946_s14 = smov 24  }
 0x345   :  { %v3575_v45 = vpop.permute.xlu0 %454 }
 0x348   :  { %2671 = vset.pattern.permute.xlu2 %v2943_v30 }
 0x349   :  { %400 = vperm.xlu2 %2671, %v3336_v58  }
 0x34c   :  { %329 = vperm.xlu1 %2668, %v3336_v58  }
 0x34e   :  { %v365_v19 = vpop.permute.xlu0 %364 }
 0x351   :  { %2673 = vset.pattern.permute.xlu2 %v2944_v9 }
 0x352   :  { %436 = vperm.xlu2 %2673, %v3336_v58  }
 0x354   :  { %2670 = vset.pattern.permute.xlu1 %v2940_v51 }
 0x355   :  { %382 = vperm.xlu1 %2670, %v3336_v58  }
 0x35a   :  { %2676 = vset.pattern.permute.xlu2 %v2942_v39 }
 0x35b   :  { %621 = vperm.xlu2 %2676, %v3392_v60  }
 0x35d   :  { %2672 = vset.pattern.permute.xlu1 %v2945_v49 }
 0x35e   :  { %418 = vperm.xlu1 %2672, %v3336_v58   ;;  %v1496_v58 = vpop.permute.xlu2 %1495 }
 0x35f   :  { %v1498_v57 = vsel %vm294_vm3, %v3288_v29, %v1496_v58 }
 0x363   :  { %2678 = vset.pattern.permute.xlu2 %v2939_v14 }
 0x364   :  { %657 = vperm.xlu2 %2678, %v3392_v60  }
 0x366   :  { %2677 = vset.pattern.permute.xlu1 %v2941_v54 }
 0x367   :  { %639 = vperm.xlu1 %2677, %v3392_v60  }
 0x36c   :  { %2680 = vset.pattern.permute.xlu2 %v2945_v49 }
 0x36d   :  { %711 = vperm.xlu2 %2680, %v3392_v60  }
 0x36f   :  { %2679 = vset.pattern.permute.xlu1 %v2943_v30 }
 0x370   :  { %693 = vperm.xlu1 %2679, %v3392_v60   ;;  %v890_v26 = vpop.permute.xlu2 %889 }
 0x371   :  { %v892_v5 = vsel %vm294_vm3, %v3502_v17, %v890_v26  ;;  %v408_v26 = vrot.slane %v406_v0, 4  ;;  %v618_v0 = vld [vmem:[#allocation9 + $0x20] sm:$0xf] }
 0x375   :  { %2682 = vset.pattern.permute.xlu2 %v2938_v11 }
 0x376   :  { %747 = vperm.xlu2 %2682, %v3392_v60  }
 0x378   :  { %2681 = vset.pattern.permute.xlu1 %v2944_v9 }
 0x379   :  { %729 = vperm.xlu1 %2681, %v3392_v60  }
 0x37e   :  { %2688 = vset.pattern.permute.xlu2 %v2939_v14 }
 0x381   :  { %2683 = vset.pattern.permute.xlu1 %v2942_v39 }
 0x382   :  { %1227 = vperm.xlu1 %2683, %v3419_v28   ;;  %v1783_v32 = vpop.permute.xlu2 %1782 }
 0x383   :  { %v1785_v23 = vsel %vm294_vm3, %v3492_v7, %v1783_v32 }
 0x38a   :  { %v2070_v40 = vpop.permute.xlu2 %2069 }
 0x38b   :  { %v2072_v7 = vsel %vm294_vm3, %v3514_v62, %v2070_v40  ;;  %v374_v62 = vmul.f32 %v372_v8, %v365_v19  ;;  %v442_v40 = vld [vmem:[#allocation11 + $0x18] sm:$0xf] }
 0x38d   :  { %v376_v58 = vrot.slane %v374_v62, 4  ;;  %v645_v62 = vld [vmem:[#allocation11 + $0x24] sm:$0xf] }
 0x392   :  { %v2357_v22 = vpop.permute.xlu2 %2356 }
 0x39a   :  { %v347_v18 = vpop.permute.xlu2 %346 }
 0x39b   :  { %v356_v44 = vmul.f32 %v354_v55, %v347_v18  ;;  %v349_v10 = vmul.f32 %v347_v18, %v344_v6 }
 0x39d   :  { %v358_v37 = vrot.slane %v356_v44, 4 }
 0x39e   :  { %v1777_v43 = vpop.permute.xlu1 %1776 }
 0x39f   :  { %v1779_v4 = vsel %vm294_vm3, %v3489_v56, %v1777_v43  ;;  %v1492_v56 = vsel %vm294_vm3, %v3286_v50, %v1490_v31  ;;  %v424_v43 = vld [vmem:[#allocation11 + $0x14] sm:$0xf] }
 0x3a0   :  { %v1786_v35 = vsel %vm193_vm2, %v1779_v4, %v1785_v23  ;;  %v1499_v41 = vsel %vm193_vm2, %v1492_v56, %v1498_v57  ;;  %v416_v57 = vld [vmem:[#allocation9 + $0x14] sm:$0xf] }
 0x3a1   :  { %2619 = vmatmul.msk.f32.vlgmr.msrb.gmra.mxu1 %vm185_vm1, %v1786_v35  ;;  %v398_v35 = vld [vmem:[#allocation9 + $0x10] sm:$0xf] }
 0x3a3   :  { %v401_v2 = vpop.permute.xlu2 %400 }
 0x3a4   :  { %v403_v56 = vmul.f32 %v401_v2, %v398_v35 }
 0x3a6   :  { %v884_v60 = vpop.permute.xlu1 %883 }
 0x3a7   :  { %v886_v38 = vsel %vm294_vm3, %v3465_v33, %v884_v60  ;;  %v410_v60 = vmul.f32 %v408_v26, %v401_v2  ;;  %v663_v26 = vld [vmem:[#allocation11 + $0x28] sm:$0xf] }
 0x3a8   :  { %v893_v47 = vsel %vm193_vm2, %v886_v38, %v892_v5 }
 0x3a9   :  { %2607 = vmatmul.msk.f32.vlgmr.msrb.gmra.mxu3 %vm185_vm1, %v893_v47  ;;  %v426_v47 = vrot.slane %v424_v43, 4  ;;  %v3588_v43 = vpop.permute.xlu0 %1263 }
 0x3aa   :  { %2095 = vmatpush.msrb.mxu3 %v3334_v15  ;;  %v2359_v15 = vsel %vm294_vm3, %v2346_v12, %v2357_v22  ;;  %v412_v22 = vrot.slane %v410_v60, 4 }
 0x3ae   :  { %v2064_v24 = vpop.permute.xlu1 %2063 }
 0x3af   :  { %v2066_v33 = vsel %vm294_vm3, %v3500_v16, %v2064_v24  ;;  %v326_v16 = vld [vmem:[#allocation9] sm:$0xf] }
 0x3b0   :  { %v2073_v29 = vsel %vm193_vm2, %v2066_v33, %v2072_v7  ;;  %v444_v33 = vrot.slane %v442_v40, 4 }
 0x3b1   :  { %2615 = vmatmul.msk.f32.vlgmr.msra.gmra.mxu3 %vm185_vm1, %v1499_v41 }
 0x3b6   :  { %v2351_v46 = vpop.permute.xlu1 %2350 }
 0x3b7   :  { %v2353_v50 = vsel %vm294_vm3, %v3512_v13, %v2351_v46  ;;  %v362_v13 = vld [vmem:[#allocation9 + $0x8] sm:$0xf] }
 0x3b8   :  { %v2360_v20 = vsel %vm193_vm2, %v2353_v50, %v2359_v15  ;;  %v367_v34 = vmul.f32 %v365_v19, %v362_v13  ;;  %v460_v15 = vld [vmem:[#allocation11 + $0x1c] sm:$0xf]  ;;  %v437_v50 = vpop.permute.xlu2 %436 }
 0x3b9   :  { %2623 = vmatmul.msk.f32.vlgmr.msrb.gmra.mxu3 %vm185_vm1, %v2073_v29  ;;  %2627 = vmatmul.msk.f32.vlgmr.msra.gmra.mxu1 %vm185_vm1, %v2360_v20  ;;  %v462_v63 = vrot.slane %v460_v15, 4  ;;  %v439_v18 = vmul.f32 %v437_v50, %v434_v36  ;;  %v699_v15 = vld [vmem:[#allocation11 + $0x30] sm:$0xf] }
 0x3ba   :  { %v691_v36 = vld [vmem:[#allocation9 + $0x30] sm:$0xf] }
 0x3be   :  { %v330_v17 = vpop.permute.xlu1 %329 }
 0x3bf   :  { %v338_v25 = vmul.f32 %v336_v21, %v330_v17  ;;  %v332_v42 = vmul.f32 %v330_v17, %v326_v16  ;;  %v446_v21 = vmul.f32 %v444_v33, %v437_v50  ;;  %v452_v17 = vld [vmem:[#allocation9 + $0x1c] sm:$0xf] }
 0x3c0   :  { %v457_v44 = vmul.f32 %v3575_v45, %v452_v17  ;;  %v622_v13 = vpop.permute.xlu2 %621 }
 0x3c1   :  { %v340_v52 = vrot.slane %v338_v25, 4  ;;  %v464_v25 = vmul.f32 %v462_v63, %v3575_v45  ;;  %v448_v6 = vrot.slane %v446_v21, 4  ;;  %v624_v45 = vmul.f32 %v622_v13, %v618_v0 }
 0x3c3   :  { %v342_v27 = vadd.f32 %v340_v52, %v332_v42  ;;  %v466_v52 = vrot.slane %v464_v25, 4 }
 0x3c5   :  { %v350_v53 = vadd.f32 %v349_v10, %v342_v27  ;;  %v627_v10 = vld [vmem:[#allocation11 + $0x20] sm:$0xf] }
 0x3c6   :  { %v629_v27 = vrot.slane %v627_v10, 4 }
 0x3c7   :  { %v360_v1 = vadd.f32 %v358_v37, %v350_v53  ;;  %v383_v12 = vpop.permute.xlu1 %382 }
 0x3c8   :  { %v392_v32 = vmul.f32 %v390_v59, %v383_v12  ;;  %v385_v4 = vmul.f32 %v383_v12, %v380_v3  ;;  %v631_v53 = vmul.f32 %v629_v27, %v622_v13  ;;  %v647_v59 = vrot.slane %v645_v62, 4  ;;  %v658_v35 = vpop.permute.xlu2 %657  ;;  %v727_v62 = vld [vmem:[#allocation9 + $0x38] sm:$0xf] }
 0x3c9   :  { %v368_v31 = vadd.f32 %v367_v34, %v360_v1  ;;  %v637_v34 = vld [vmem:[#allocation9 + $0x24] sm:$0xf] }
 0x3ca   :  { %v394_v38 = vrot.slane %v392_v32, 4  ;;  %v633_v12 = vrot.slane %v631_v53, 4 }
 0x3cb   :  { %v378_v23 = vadd.f32 %v376_v58, %v368_v31 }
 0x3cc   :  { %v635_v58 = vadd.f32 %v633_v12, %v624_v45 }
 0x3cd   :  { %v386_v5 = vadd.f32 %v385_v4, %v378_v23  ;;  %v665_v23 = vrot.slane %v663_v26, 4  ;;  %v655_v4 = vld [vmem:[#allocation9 + $0x28] sm:$0xf] }
 0x3cf   :  { %v396_v24 = vadd.f32 %v394_v38, %v386_v5  ;;  %v660_v5 = vmul.f32 %v658_v35, %v655_v4  ;;  %v667_v38 = vmul.f32 %v665_v23, %v658_v35 }
 0x3d0   :  { %v419_v41 = vpop.permute.xlu1 %418 }
 0x3d1   :  { %v404_v46 = vadd.f32 %v403_v56, %v396_v24  ;;  %v428_v7 = vmul.f32 %v426_v47, %v419_v41  ;;  %v421_v20 = vmul.f32 %v419_v41, %v416_v57  ;;  %v681_v47 = vld [vmem:[#allocation11 + $0x2c] sm:$0xf]  ;;  %v669_v24 = vrot.slane %v667_v38, 4  ;;  %v676_v41 = vpop.permute.xlu0 %675 }
 0x3d2   :  { %v683_v56 = vrot.slane %v681_v47, 4  ;;  %v673_v57 = vld [vmem:[#allocation9 + $0x2c] sm:$0xf] }
 0x3d3   :  { %v414_v29 = vadd.f32 %v412_v22, %v404_v46  ;;  %v430_v48 = vrot.slane %v428_v7, 4  ;;  %v678_v46 = vmul.f32 %v676_v41, %v673_v57 }
 0x3d4   :  { %v685_v7 = vmul.f32 %v683_v56, %v676_v41 }
 0x3d5   :  { %v422_v55 = vadd.f32 %v421_v20, %v414_v29  ;;  %v701_v20 = vrot.slane %v699_v15, 4  ;;  %v2387_v15 = vld [vmem:[#allocation9 + $0x60] sm:$0xf] }
 0x3d6   :  { %v687_v29 = vrot.slane %v685_v7, 4  ;;  %v2427_v7 = vld [vmem:[#allocation11 + $0x68] sm:$0xf] }
 0x3d7   :  { %v432_v16 = vadd.f32 %v430_v48, %v422_v55 }
 0x3d9   :  { %v440_v8 = vadd.f32 %v439_v18, %v432_v16  ;;  %v640_v1 = vpop.permute.xlu1 %639  ;;  %v717_v18 = vld [vmem:[#allocation11 + $0x34] sm:$0xf] }
 0x3da   :  { %v642_v2 = vmul.f32 %v640_v1, %v637_v34  ;;  %v649_v3 = vmul.f32 %v647_v59, %v640_v1  ;;  %v719_v17 = vrot.slane %v717_v18, 4  ;;  %v753_v1 = vld [vmem:[#allocation11 + $0x3c] sm:$0xf] }
 0x3db   :  { %v450_v42 = vadd.f32 %v448_v6, %v440_v8  ;;  %v709_v6 = vld [vmem:[#allocation9 + $0x34] sm:$0xf]  ;;  %v712_v8 = vpop.permute.xlu2 %711  ;;  %v755_v45 = vrot.slane %v753_v1, 4 }
 0x3dc   :  { %v643_v31 = vadd.f32 %v642_v2, %v635_v58  ;;  %v651_v32 = vrot.slane %v649_v3, 4  ;;  %v745_v3 = vld [vmem:[#allocation9 + $0x3c] sm:$0xf] }
 0x3dd   :  { %v458_v19 = vadd.f32 %v457_v44, %v450_v42  ;;  %v714_v42 = vmul.f32 %v712_v8, %v709_v6 }
 0x3de   :  { %v653_v60 = vadd.f32 %v651_v32, %v643_v31 }
 0x3df   :  { %v3583_v61 = vadd.f32 %v466_v52, %v458_v19  ;;  %v721_v52 = vmul.f32 %v719_v17, %v712_v8  ;;  %v735_v19 = vld [vmem:[#allocation11 + $0x38] sm:$0xf] }
 0x3e0   :  { %v661_v40 = vadd.f32 %v660_v5, %v653_v60  ;;  %v737_v13 = vrot.slane %v735_v19, 4 }
 0x3e1   :  { %v723_v27 = vrot.slane %v721_v52, 4  ;;  %v1233_v52 = vld [vmem:[#allocation11 + $0x60] sm:$0xf] }
 0x3e2   :  { %v671_v22 = vadd.f32 %v669_v24, %v661_v40  ;;  %v694_v63 = vpop.permute.xlu1 %693  ;;  %v470_v40 = vrot.slane %v3583_v61, 4  ;;  %v2395_v24 = vld [vmem:[#allocation11 + $0x60] sm:$0xf] }
 0x3e3   :  { %v696_v55 = vmul.f32 %v694_v63, %v691_v36  ;;  %v703_v48 = vmul.f32 %v701_v20, %v694_v63  ;;  %v748_v58 = vpop.permute.xlu2 %747  ;;  %v2397_v57 = vrot.slane %v2395_v24, 4  ;;  %v2404_v20 = vld [vmem:[#allocation9 + $0x64] sm:$0xf]  ;;  %v2429_v36 = vrot.slane %v2427_v7, 4 }
 0x3e4   :  { %v679_v50 = vadd.f32 %v678_v46, %v671_v22  ;;  %v750_v31 = vmul.f32 %v748_v58, %v745_v3  ;;  %v757_v32 = vmul.f32 %v755_v45, %v748_v58  ;;  %v2411_v46 = vld [vmem:[#allocation11 + $0x64] sm:$0xf]  ;;  %v1821_v3 = vld [vmem:[#allocation11 + $0x20] sm:$0xf] }
 0x3e5   :  { %v705_v25 = vrot.slane %v703_v48, 4  ;;  %v2443_v48 = vld [vmem:[#allocation11 + $0x6c] sm:$0xf]  ;;  %v1251_v58 = vld [vmem:[#allocation11 + $0x64] sm:$0xf] }
 0x3e6   :  { %v689_v21 = vadd.f32 %v687_v29, %v679_v50  ;;  %v759_v35 = vrot.slane %v757_v32, 4  ;;  %v2413_v29 = vrot.slane %v2411_v46, 4  ;;  %v2445_v8 = vrot.slane %v2443_v48, 4 }
 0x3e8   :  { %v697_v16 = vadd.f32 %v696_v55, %v689_v21 }
 0x3ea   :  { %v707_v44 = vadd.f32 %v705_v25, %v697_v16 }
 0x3eb   :  { %v730_v53 = vpop.permute.xlu1 %729 }
 0x3ec   :  { %v715_v10 = vadd.f32 %v714_v42, %v707_v44  ;;  %v732_v0 = vmul.f32 %v730_v53, %v727_v62  ;;  %v739_v34 = vmul.f32 %v737_v13, %v730_v53  ;;  %v1235_v13 = vrot.slane %v1233_v52, 4  ;;  %v1287_v52 = vld [vmem:[#allocation11 + $0x6c] sm:$0xf] }
 0x3ee   :  { %v725_v59 = vadd.f32 %v723_v27, %v715_v10  ;;  %v741_v2 = vrot.slane %v739_v34, 4  ;;  %v2436_v27 = vld [vmem:[#allocation9 + $0x6c] sm:$0xf] }
 0x3f0   :  { %v733_v12 = vadd.f32 %v732_v0, %v725_v59 }
 0x3f2   :  { %v743_v26 = vadd.f32 %v741_v2, %v733_v12 }
 0x3f4   :  { %v751_v23 = vadd.f32 %v750_v31, %v743_v26  ;;  %v1224_v31 = vld [vmem:[#allocation9 + $0x60] sm:$0xf] }
 0x3f6   :  { %v3618_v60 = vadd.f32 %v759_v35, %v751_v23  ;;  %v1823_v23 = vrot.slane %v1821_v3, 4  ;;  %v1253_v35 = vrot.slane %v1251_v58, 4  ;;  %v1279_v3 = vld [vmem:[#allocation9 + $0x6c] sm:$0xf] }
 0x3f8   :  { %v763_v5 = vrot.slane %v3618_v60, 4 }
 0x41e   :  { %v3585_v37 = vpop.f32.mrf.mxu1 }
 0x41f   :  { %1816 = vperm.xlu1 %2683, %v3585_v37  }
 0x42c   :  { %v3612_v4 = vpop.f32.mrf.mxu3 }
 0x434   :  { %v3637_v38 = vpop.f32.mrf.mxu3 }
 0x436   :  { %v3590_v33 = vpop.f32.mrf.mxu1 }
 0x437   :  { %2438 = vperm.xlu0 %2684, %v3590_v33   ;;  %2422 = vperm.xlu2 %2688, %v3590_v33  }
 0x438   :  { %2390 = vperm.xlu1 %2683, %v3590_v33  }
 0x43c   :  { %v3645_v47 = vpop.f32.mrf.mxu3 }
 0x43f   :  { %2692 = vset.pattern.permute.xlu0 %v2945_v49  ;;  %2689 = vset.pattern.permute.xlu2 %v2943_v30 }
 0x440   :  { %2685 = vset.pattern.permute.xlu1 %v2941_v54  ;;  %1896 = vperm.xlu0 %2692, %v3585_v37  }
 0x441   :  { %1299 = vperm.xlu2 %2689, %v3419_v28   ;;  %2406 = vperm.xlu1 %2685, %v3590_v33  }
 0x448   :  { %2693 = vset.pattern.permute.xlu0 %v2944_v9 }
 0x449   :  { %1880 = vperm.xlu2 %2689, %v3585_v37   ;;  %2686 = vset.pattern.permute.xlu1 %v2939_v14 }
 0x44a   :  { %1335 = vperm.xlu0 %2693, %v3419_v28   ;;  %1848 = vperm.xlu1 %2686, %v3585_v37  }
 0x451   :  { %2690 = vset.pattern.permute.xlu2 %v2945_v49 }
 0x452   :  { %2694 = vset.pattern.permute.xlu0 %v2941_v54  ;;  %1317 = vperm.xlu2 %2690, %v3419_v28  }
 0x453   :  { %2687 = vset.pattern.permute.xlu1 %v2940_v51  ;;  %1245 = vperm.xlu0 %2694, %v3419_v28  }
 0x454   :  { %1281 = vperm.xlu1 %2687, %v3419_v28  }
 0x45a   :  { %2698 = vset.pattern.permute.xlu2 %v2942_v39 }
 0x45b   :  { %1832 = vperm.xlu0 %2694, %v3585_v37   ;;  %924 = vperm.xlu2 %2698, %v3612_v4  }
 0x45c   :  { %1864 = vperm.xlu1 %2687, %v3585_v37  }
 0x463   :  { %764 = vrot.lane.b32.xlu0 %v763_v5, %s2932_s9  ;;  %2700 = vset.pattern.permute.xlu2 %v2940_v51  ;;  %v1243_v5 = vld [vmem:[#allocation9 + $0x64] sm:$0xf] }
 0x464   :  { %2691 = vset.pattern.permute.xlu1 %v2943_v30  ;;  %978 = vperm.xlu2 %2700, %v3612_v4  }
 0x465   :  { %2454 = vperm.xlu1 %2691, %v3590_v33  }
 0x46b   :  { %942 = vperm.xlu0 %2694, %v3612_v4  }
 0x46c   :  { %2701 = vset.pattern.permute.xlu2 %v2943_v30 }
 0x46d   :  { %2695 = vset.pattern.permute.xlu1 %v2945_v49  ;;  %996 = vperm.xlu2 %2701, %v3612_v4  }
 0x46e   :  { %2470 = vperm.xlu1 %2695, %v3590_v33  }
 0x473   :  { %2702 = vset.pattern.permute.xlu0 %v2945_v49 }
 0x474   :  { %1014 = vperm.xlu0 %2702, %v3612_v4  }
 0x475   :  { %2704 = vset.pattern.permute.xlu2 %v2938_v11 }
 0x476   :  { %2696 = vset.pattern.permute.xlu1 %v2944_v9  ;;  %1050 = vperm.xlu2 %2704, %v3612_v4  }
 0x477   :  { %1912 = vperm.xlu1 %2696, %v3585_v37  }
 0x47c   :  { %2708 = vset.pattern.permute.xlu0 %v2940_v51 }
 0x47d   :  { %1577 = vperm.xlu0 %2708, %v3637_v38  }
 0x47e   :  { %2705 = vset.pattern.permute.xlu2 %v2942_v39 }
 0x47f   :  { %2697 = vset.pattern.permute.xlu1 %v2938_v11  ;;  %1529 = vperm.xlu2 %2705, %v3637_v38  }
 0x480   :  { %1353 = vperm.xlu1 %2697, %v3419_v28   ;;  %v1228_v28 = vpop.permute.xlu1 %1227 }
 0x481   :  { %v1237_v12 = vmul.f32 %v1235_v13, %v1228_v28  ;;  %v1846_v13 = vld [vmem:[#allocation9 + $0x28] sm:$0xf] }
 0x483   :  { %v1239_v32 = vrot.slane %v1237_v12, 4 }
 0x485   :  { %2715 = vset.pattern.permute.xlu0 %v2939_v14 }
 0x486   :  { %2135 = vperm.xlu0 %2715, %v3645_v47  }
 0x487   :  { %2706 = vset.pattern.permute.xlu2 %v2941_v54 }
 0x488   :  { %471 = vrot.lane.b32.xlu1 %v470_v40, %s2932_s9  ;;  %1545 = vperm.xlu2 %2706, %v3637_v38   ;;  %v1230_v40 = vmul.f32 %v1228_v28, %v1224_v31 }
 0x489   :  { %2699 = vset.pattern.permute.xlu1 %v2939_v14 }
 0x48e   :  { %2719 = vset.pattern.permute.xlu0 %v2944_v9 }
 0x48f   :  { %2199 = vperm.xlu0 %2719, %v3645_v47  }
 0x490   :  { %2707 = vset.pattern.permute.xlu2 %v2939_v14 }
 0x491   :  { %1561 = vperm.xlu2 %2707, %v3637_v38   ;;  %v3662_v56 = vpop.permute.xlu1 %1816  ;;  %v2423_v55 = vpop.permute.xlu2 %2422 }
 0x492   :  { %v2431_v6 = vmul.f32 %v2429_v36, %v2423_v55  ;;  %v1813_v36 = vld [vmem:[#allocation9 + $0x20] sm:$0xf] }
 0x494   :  { %v2433_v62 = vrot.slane %v2431_v6, 4 }
 0x497   :  { %2720 = vset.pattern.permute.xlu0 %v2938_v11 }
 0x498   :  { %1641 = vperm.xlu0 %2720, %v3637_v38  }
 0x499   :  { %2710 = vset.pattern.permute.xlu2 %v2945_v49 }
 0x49a   :  { %1609 = vperm.xlu2 %2710, %v3637_v38  }
 0x49b   :  { %v3681_v48 = vpop.permute.xlu2 %1299 }
 0x4a2   :  { %2711 = vset.pattern.permute.xlu2 %v2944_v9 }
 0x4a3   :  { %1625 = vperm.xlu2 %2711, %v3637_v38  }
 0x4a9   :  { %v2439_v14 = vpop.permute.xlu0 %2438 }
 0x4aa   :  { %v2391_v41 = vpop.permute.xlu1 %2390  ;;  %v2447_v53 = vmul.f32 %v2445_v8, %v2439_v14  ;;  %v2441_v0 = vmul.f32 %v2439_v14, %v2436_v27  ;;  %v1241_v14 = vadd.f32 %v1239_v32, %v1230_v40 }
 0x4ab   :  { %2712 = vset.pattern.permute.xlu2 %v2942_v39  ;;  %v2399_v22 = vmul.f32 %v2397_v57, %v2391_v41  ;;  %v2393_v63 = vmul.f32 %v2391_v41, %v2387_v15  ;;  %v2420_v39 = vld [vmem:[#allocation9 + $0x68] sm:$0xf]  ;;  %v1825_v41 = vmul.f32 %v1823_v23, %v3662_v56  ;;  %v1837_v15 = vld [vmem:[#allocation11 + $0x24] sm:$0xf]  ;;  %v1862_v23 = vld [vmem:[#allocation9 + $0x2c] sm:$0xf] }
 0x4ac   :  { %2103 = vperm.xlu2 %2712, %v3645_v47   ;;  %v2425_v19 = vmul.f32 %v2423_v55, %v2420_v39  ;;  %v2449_v45 = vrot.slane %v2447_v53, 4  ;;  %v1269_v57 = vld [vmem:[#allocation11 + $0x68] sm:$0xf]  ;;  %v1885_v53 = vld [vmem:[#allocation11 + $0x30] sm:$0xf] }
 0x4ad   :  { %v2401_v50 = vrot.slane %v2399_v22, 4  ;;  %v1261_v55 = vld [vmem:[#allocation9 + $0x68] sm:$0xf]  ;;  %v1827_v28 = vrot.slane %v1825_v41, 4  ;;  %v1887_v31 = vrot.slane %v1885_v53, 4 }
 0x4af   :  { %v2403_v16 = vadd.f32 %v2401_v50, %v2393_v63  ;;  %v1853_v63 = vld [vmem:[#allocation11 + $0x28] sm:$0xf] }
 0x4b0   :  { %v1855_v39 = vrot.slane %v1853_v63, 4 }
 0x4b2   :  { %v3668_v21 = vpop.permute.xlu0 %1896 }
 0x4b3   :  { %v2407_v18 = vpop.permute.xlu1 %2406 }
 0x4b4   :  { %v2409_v17 = vmul.f32 %v2407_v18, %v2404_v20  ;;  %v2415_v25 = vmul.f32 %v2413_v29, %v2407_v18  ;;  %2713 = vset.pattern.permute.xlu2 %v2941_v54  ;;  %v1271_v20 = vrot.slane %v1269_v57, 4  ;;  %v1839_v18 = vrot.slane %v1837_v15, 4  ;;  %v2452_v15 = vld [vmem:[#allocation9 + $0x70] sm:$0xf] }
 0x4b5   :  { %2119 = vperm.xlu2 %2713, %v3645_v47  }
 0x4b6   :  { %v2410_v44 = vadd.f32 %v2409_v17, %v2403_v16  ;;  %v2417_v42 = vrot.slane %v2415_v25, 4  ;;  %v1830_v17 = vld [vmem:[#allocation9 + $0x24] sm:$0xf]  ;;  %v1819_v25 = vmul.f32 %v3662_v56, %v1813_v36  ;;  %v1273_v6 = vmul.f32 %v1271_v20, %v3588_v43  ;;  %v1878_v36 = vld [vmem:[#allocation9 + $0x30] sm:$0xf] }
 0x4b8   :  { %v2419_v10 = vadd.f32 %v2417_v42, %v2410_v44  ;;  %v1869_v44 = vld [vmem:[#allocation11 + $0x2c] sm:$0xf]  ;;  %v1829_v42 = vadd.f32 %v1827_v28, %v1819_v25  ;;  %v1275_v12 = vrot.slane %v1273_v6, 4  ;;  %v1297_v6 = vld [vmem:[#allocation9 + $0x70] sm:$0xf] }
 0x4ba   :  { %v2426_v59 = vadd.f32 %v2425_v19, %v2419_v10 }
 0x4bc   :  { %v2435_v34 = vadd.f32 %v2433_v62, %v2426_v59  ;;  %v3672_v1 = vpop.permute.xlu0 %1335  ;;  %v1849_v54 = vpop.permute.xlu1 %1848 }
 0x4bd   :  { %2714 = vset.pattern.permute.xlu2 %v2944_v9  ;;  %v1857_v59 = vmul.f32 %v1855_v39, %v1849_v54 }
 0x4be   :  { %2486 = vperm.xlu2 %2714, %v3590_v33   ;;  %v2442_v2 = vadd.f32 %v2441_v0, %v2435_v34  ;;  %v1871_v34 = vrot.slane %v1869_v44, 4 }
 0x4bf   :  { %v1859_v40 = vrot.slane %v1857_v59, 4  ;;  %v1302_v59 = vmul.f32 %v3681_v48, %v1297_v6 }
 0x4c0   :  { %v3676_v26 = vadd.f32 %v2449_v45, %v2442_v2  ;;  %v2459_v45 = vld [vmem:[#allocation11 + $0x70] sm:$0xf]  ;;  %v1851_v2 = vmul.f32 %v1849_v54, %v1846_v13 }
 0x4c5   :  { %v1246_v24 = vpop.permute.xlu0 %1245 }
 0x4c6   :  { %v1248_v22 = vmul.f32 %v1246_v24, %v1243_v5  ;;  %v1255_v46 = vmul.f32 %v1253_v35, %v1246_v24  ;;  %v1282_v7 = vpop.permute.xlu1 %1281  ;;  %2718 = vset.pattern.permute.xlu2 %v2945_v49  ;;  %v1266_v49 = vmul.f32 %v3588_v43, %v1261_v55  ;;  %v1289_v43 = vrot.slane %v1287_v52, 4  ;;  %v1881_v35 = vpop.permute.xlu2 %1880  ;;  %v1901_v5 = vld [vmem:[#allocation11 + $0x34] sm:$0xf] }
 0x4c7   :  { %2183 = vperm.xlu2 %2718, %v3645_v47   ;;  %v1284_v41 = vmul.f32 %v1282_v7, %v1279_v3  ;;  %v1889_v63 = vmul.f32 %v1887_v31, %v1881_v35  ;;  %v1903_v55 = vrot.slane %v1901_v5, 4  ;;  %v1315_v5 = vld [vmem:[#allocation9 + $0x74] sm:$0xf] }
 0x4c8   :  { %v1249_v50 = vadd.f32 %v1248_v22, %v1241_v14  ;;  %v1257_v29 = vrot.slane %v1255_v46, 4  ;;  %v2461_v14 = vrot.slane %v2459_v45, 4  ;;  %v1291_v22 = vmul.f32 %v1289_v43, %v1282_v7  ;;  %v2468_v45 = vld [vmem:[#allocation9 + $0x74] sm:$0xf] }
 0x4c9   :  { %v1905_v13 = vmul.f32 %v1903_v55, %v3668_v21  ;;  %v1333_v55 = vld [vmem:[#allocation9 + $0x78] sm:$0xf] }
 0x4ca   :  { %v1259_v16 = vadd.f32 %v1257_v29, %v1249_v50  ;;  %v1305_v50 = vld [vmem:[#allocation11 + $0x70] sm:$0xf] }
 0x4cb   :  { %v1307_v7 = vrot.slane %v1305_v50, 4 }
 0x4cc   :  { %v1267_v62 = vadd.f32 %v1266_v49, %v1259_v16  ;;  %v1293_v49 = vrot.slane %v1291_v22, 4 }
 0x4cd   :  { %v1833_v8 = vpop.permute.xlu0 %1832 }
 0x4ce   :  { %v1835_v19 = vmul.f32 %v1833_v8, %v1830_v17  ;;  %v1841_v10 = vmul.f32 %v1839_v18, %v1833_v8  ;;  %v1865_v27 = vpop.permute.xlu1 %1864  ;;  %v1277_v32 = vadd.f32 %v1275_v12, %v1267_v62  ;;  %v1883_v8 = vmul.f32 %v1881_v35, %v1878_v36 }
 0x4cf   :  { %2722 = vset.pattern.permute.xlu2 %v2938_v11  ;;  %v1873_v57 = vmul.f32 %v1871_v34, %v1865_v27  ;;  %v1867_v20 = vmul.f32 %v1865_v27, %v1862_v23  ;;  %v1891_v27 = vrot.slane %v1889_v63, 4  ;;  %v1323_v34 = vld [vmem:[#allocation11 + $0x74] sm:$0xf] }
 0x4d0   :  { %v1836_v0 = vadd.f32 %v1835_v19, %v1829_v42  ;;  %v1843_v56 = vrot.slane %v1841_v10, 4  ;;  %2215 = vperm.xlu2 %2722, %v3645_v47   ;;  %v1285_v28 = vadd.f32 %v1284_v41, %v1277_v32  ;;  %v1894_v19 = vld [vmem:[#allocation9 + $0x34] sm:$0xf]  ;;  %v1325_v32 = vrot.slane %v1323_v34, 4  ;;  %v1917_v41 = vld [vmem:[#allocation11 + $0x38] sm:$0xf] }
 0x4d1   :  { %v1875_v17 = vrot.slane %v1873_v57, 4  ;;  %v1899_v12 = vmul.f32 %v3668_v21, %v1894_v19  ;;  %v1919_v50 = vrot.slane %v1917_v41, 4 }
 0x4d2   :  { %v1845_v58 = vadd.f32 %v1843_v56, %v1836_v0  ;;  %v1295_v10 = vadd.f32 %v1293_v49, %v1285_v28  ;;  %v1309_v0 = vmul.f32 %v1307_v7, %v3681_v48  ;;  %v1338_v7 = vmul.f32 %v3672_v1, %v1333_v55 }
 0x4d4   :  { %v1852_v24 = vadd.f32 %v1851_v2, %v1845_v58  ;;  %v1907_v2 = vrot.slane %v1905_v13, 4  ;;  %v1311_v31 = vrot.slane %v1309_v0, 4 }
 0x4d5   :  { %v765_v46 = vpop.permute.xlu0 %764 }
 0x4d6   :  { %v1861_v29 = vadd.f32 %v1859_v40, %v1852_v24  ;;  %v767_v54 = vsel %vm193_vm2, %v3618_v60, %v765_v46  ;;  %v2475_v60 = vld [vmem:[#allocation11 + $0x74] sm:$0xf]  ;;  %v1318_v40 = vpop.permute.xlu2 %1317 }
 0x4d7   :  { %v2455_v18 = vpop.permute.xlu1 %2454  ;;  %769 = vrot.lane.b32.xlu1 %v767_v54, %s2931_s3  ;;  %v2477_v56 = vrot.slane %v2475_v60, 4  ;;  %v1320_v21 = vmul.f32 %v1318_v40, %v1315_v5  ;;  %v1327_v22 = vmul.f32 %v1325_v32, %v1318_v40  ;;  %v940_v32 = vld [vmem:[#allocation9 + $0x44] sm:$0xf] }
 0x4d8   :  { %v1868_v16 = vadd.f32 %v1867_v20, %v1861_v29  ;;  %v2457_v25 = vmul.f32 %v2455_v18, %v2452_v15  ;;  %v2463_v39 = vmul.f32 %v2461_v14, %v2455_v18  ;;  %v1341_v15 = vld [vmem:[#allocation11 + $0x78] sm:$0xf] }
 0x4d9   :  { %v1910_v20 = vld [vmem:[#allocation9 + $0x38] sm:$0xf]  ;;  %v1329_v54 = vrot.slane %v1327_v22, 4  ;;  %v1343_v36 = vrot.slane %v1341_v15, 4  ;;  %v1566_v15 = vld [vmem:[#allocation11 + $0x8] sm:$0xf] }
 0x4da   :  { %v1877_v44 = vadd.f32 %v1875_v17, %v1868_v16  ;;  %v2458_v42 = vadd.f32 %v2457_v25, %v3676_v26  ;;  %v2465_v52 = vrot.slane %v2463_v39, 4  ;;  %v1303_v26 = vadd.f32 %v1302_v59, %v1295_v10  ;;  %v1359_v39 = vld [vmem:[#allocation11 + $0x7c] sm:$0xf] }
 0x4db   :  { %v1345_v49 = vmul.f32 %v1343_v36, %v3672_v1 }
 0x4dc   :  { %v1884_v62 = vadd.f32 %v1883_v8, %v1877_v44  ;;  %v2467_v53 = vadd.f32 %v2465_v52, %v2458_v42  ;;  %v1313_v48 = vadd.f32 %v1311_v31, %v1303_v26  ;;  %v1361_v8 = vrot.slane %v1359_v39, 4  ;;  %v1534_v26 = vld [vmem:[#allocation11] sm:$0xf]  ;;  %v958_v39 = vld [vmem:[#allocation9 + $0x48] sm:$0xf] }
 0x4dd   :  { %v1347_v44 = vrot.slane %v1345_v49, 4  ;;  %v921_v31 = vld [vmem:[#allocation9 + $0x40] sm:$0xf]  ;;  %v1002_v49 = vld [vmem:[#allocation11 + $0x50] sm:$0xf] }
 0x4de   :  { %v1893_v43 = vadd.f32 %v1891_v27, %v1884_v62  ;;  %v1321_v29 = vadd.f32 %v1320_v21, %v1313_v48  ;;  %v925_v62 = vpop.permute.xlu2 %924 }
 0x4df   :  { %960 = vperm.xlu1 %2699, %v3612_v4   ;;  %v927_v40 = vmul.f32 %v925_v62, %v921_v31 }
 0x4e0   :  { %v2471_v3 = vpop.permute.xlu1 %2470  ;;  %v1900_v58 = vadd.f32 %v1899_v12, %v1893_v43  ;;  %v1331_v16 = vadd.f32 %v1329_v54, %v1321_v29  ;;  %v943_v12 = vpop.permute.xlu0 %942  ;;  %v930_v43 = vld [vmem:[#allocation11 + $0x40] sm:$0xf] }
 0x4e1   :  { %v2473_v23 = vmul.f32 %v2471_v3, %v2468_v45  ;;  %v2479_v35 = vmul.f32 %v2477_v56, %v2471_v3  ;;  %v945_v48 = vmul.f32 %v943_v12, %v940_v32 }
 0x4e2   :  { %v1909_v24 = vadd.f32 %v1907_v2, %v1900_v58  ;;  %v948_v2 = vld [vmem:[#allocation11 + $0x44] sm:$0xf] }
 0x4e3   :  { %v2474_v57 = vadd.f32 %v2473_v23, %v2467_v53  ;;  %v2481_v14 = vrot.slane %v2479_v35, 4  ;;  %v950_v58 = vrot.slane %v948_v2, 4 }
 0x4e5   :  { %v3697_v46 = vadd.f32 %v2481_v14, %v2474_v57  ;;  %v952_v57 = vmul.f32 %v950_v58, %v943_v12  ;;  %v1543_v14 = vld [vmem:[#allocation9 + $0x4] sm:$0xf]  ;;  %v994_v58 = vld [vmem:[#allocation9 + $0x50] sm:$0xf] }
 0x4e7   :  { %2703 = vset.pattern.permute.xlu1 %v2944_v9  ;;  %v1339_v9 = vadd.f32 %v1338_v7, %v1331_v16  ;;  %v1568_v16 = vrot.slane %v1566_v15, 4  ;;  %v1012_v15 = vld [vmem:[#allocation9 + $0x54] sm:$0xf] }
 0x4e8   :  { %1032 = vperm.xlu1 %2703, %v3612_v4   ;;  %v1351_v4 = vld [vmem:[#allocation9 + $0x7c] sm:$0xf] }
 0x4e9   :  { %v1913_v63 = vpop.permute.xlu1 %1912  ;;  %v1349_v52 = vadd.f32 %v1347_v44, %v1339_v9 }
 0x4ea   :  { %v1915_v28 = vmul.f32 %v1913_v63, %v1910_v20  ;;  %v1921_v18 = vmul.f32 %v1919_v50, %v1913_v63  ;;  %v966_v50 = vld [vmem:[#allocation11 + $0x48] sm:$0xf]  ;;  %v984_v63 = vld [vmem:[#allocation11 + $0x4c] sm:$0xf] }
 0x4eb   :  { %v986_v7 = vrot.slane %v984_v63, 4  ;;  %v2100_v63 = vld [vmem:[#allocation9 + $0x40] sm:$0xf] }
 0x4ec   :  { %v1916_v17 = vadd.f32 %v1915_v28, %v1909_v24  ;;  %v1923_v25 = vrot.slane %v1921_v18, 4  ;;  %v1526_v24 = vld [vmem:[#allocation9] sm:$0xf]  ;;  %v954_v28 = vrot.slane %v952_v57, 4 }
 0x4ee   :  { %v3703_v6 = vadd.f32 %v1923_v25, %v1916_v17  ;;  %v968_v17 = vrot.slane %v966_v50, 4  ;;  %v1559_v25 = vld [vmem:[#allocation9 + $0x8] sm:$0xf] }
 0x4f0   :  { %2709 = vset.pattern.permute.xlu1 %v2943_v30 }
 0x4f1   :  { %1593 = vperm.xlu1 %2709, %v3637_v38   ;;  %v3716_v38 = vpop.permute.xlu2 %978 }
 0x4f2   :  { %v1354_v42 = vpop.permute.xlu1 %1353 }
 0x4f3   :  { %v1356_v60 = vmul.f32 %v1354_v42, %v1351_v4  ;;  %v1363_v19 = vmul.f32 %v1361_v8, %v1354_v42 }
 0x4f5   :  { %v1357_v10 = vadd.f32 %v1356_v60, %v1349_v52  ;;  %v1365_v27 = vrot.slane %v1363_v19, 4  ;;  %v2108_v60 = vld [vmem:[#allocation11 + $0x40] sm:$0xf] }
 0x4f7   :  { %v3707_v13 = vadd.f32 %v1365_v27, %v1357_v10 }
 0x4f9   :  { %2716 = vset.pattern.permute.xlu1 %v2940_v51  ;;  %v1369_v1 = vrot.slane %v3707_v13, 4  ;;  %v3721_v51 = vpop.permute.xlu2 %996 }
 0x4fa   :  { %v472_v53 = vpop.permute.xlu1 %471  ;;  %2151 = vperm.xlu1 %2716, %v3645_v47   ;;  %v999_v57 = vmul.f32 %v3721_v51, %v994_v58 }
 0x4fb   :  { %v474_v59 = vsel %vm193_vm2, %v3583_v61, %v472_v53  ;;  %1370 = vrot.lane.b32.xlu0 %v1369_v1, %s2932_s9  ;;  %v1004_v1 = vrot.slane %v1002_v49, 4  ;;  %v988_v53 = vmul.f32 %v986_v7, %v3716_v38  ;;  %v1614_v49 = vld [vmem:[#allocation11 + $0x14] sm:$0xf] }
 0x4fc   :  { %475 = vst.msk [vmem:[#allocation2] sm:$0xff] %vm185_vm1, %v474_v59 }
 0x4fd   :  { %v1006_v32 = vmul.f32 %v1004_v1, %v3721_v51  ;;  %v1616_v1 = vrot.slane %v1614_v49, 4 }
 0x501   :  { %v3725_v0 = vpop.permute.xlu2 %1050 }
 0x502   :  { %2717 = vset.pattern.permute.xlu1 %v2943_v30  ;;  %v932_v30 = vrot.slane %v930_v43, 4  ;;  %v1020_v43 = vld [vmem:[#allocation11 + $0x54] sm:$0xf] }
 0x503   :  { %2167 = vperm.xlu1 %2717, %v3645_v47   ;;  %v1536_v47 = vrot.slane %v1534_v26, 4 }
 0x504   :  { %v934_v3 = vmul.f32 %v932_v30, %v925_v62  ;;  %v976_v62 = vld [vmem:[#allocation9 + $0x4c] sm:$0xf]  ;;  %v2110_v30 = vrot.slane %v2108_v60, 4 }
 0x505   :  { %v981_v26 = vmul.f32 %v3716_v38, %v976_v62 }
 0x506   :  { %v936_v23 = vrot.slane %v934_v3, 4 }
 0x508   :  { %v938_v22 = vadd.f32 %v936_v23, %v927_v40  ;;  %v1022_v23 = vrot.slane %v1020_v43, 4 }
 0x509   :  { %v1530_v61 = vpop.permute.xlu2 %1529 }
 0x50a   :  { %v1532_v29 = vmul.f32 %v1530_v61, %v1526_v24  ;;  %v946_v55 = vadd.f32 %v945_v48, %v938_v22  ;;  %v1038_v48 = vld [vmem:[#allocation11 + $0x58] sm:$0xf]  ;;  %v1056_v22 = vld [vmem:[#allocation11 + $0x5c] sm:$0xf] }
 0x50b   :  { %2721 = vset.pattern.permute.xlu1 %v2938_v11  ;;  %v3729_v11 = vpop.permute.xlu0 %1014 }
 0x50c   :  { %1928 = vperm.xlu1 %2721, %v3585_v37   ;;  %v1550_v37 = vld [vmem:[#allocation11 + $0x4] sm:$0xf]  ;;  %v956_v4 = vadd.f32 %v954_v28, %v946_v55  ;;  %v1017_v51 = vmul.f32 %v3729_v11, %v1012_v15 }
 0x50d   :  { %v1552_v35 = vrot.slane %v1550_v37, 4  ;;  %v1575_v37 = vld [vmem:[#allocation9 + $0xc] sm:$0xf]  ;;  %v2117_v55 = vld [vmem:[#allocation9 + $0x44] sm:$0xf] }
 0x511   :  { %v1546_v56 = vpop.permute.xlu2 %1545 }
 0x512   :  { %v1548_v20 = vmul.f32 %v1546_v56, %v1543_v14  ;;  %v1554_v54 = vmul.f32 %v1552_v35, %v1546_v56  ;;  %v2124_v35 = vld [vmem:[#allocation11 + $0x44] sm:$0xf] }
 0x513   :  { %v1578_v36 = vpop.permute.xlu0 %1577 }
 0x514   :  { %2502 = vperm.xlu1 %2721, %v3590_v33   ;;  %v1538_v33 = vmul.f32 %v1536_v47, %v1530_v61  ;;  %v1556_v8 = vrot.slane %v1554_v54, 4  ;;  %v1582_v61 = vld [vmem:[#allocation11 + $0xc] sm:$0xf]  ;;  %v1580_v38 = vmul.f32 %v1578_v36, %v1575_v37  ;;  %v1024_v54 = vmul.f32 %v1022_v23, %v3729_v11 }
 0x515   :  { %v1584_v31 = vrot.slane %v1582_v61, 4  ;;  %v1048_v61 = vld [vmem:[#allocation9 + $0x5c] sm:$0xf] }
 0x516   :  { %v1540_v21 = vrot.slane %v1538_v33, 4  ;;  %v990_v33 = vrot.slane %v988_v53, 4 }
 0x517   :  { %v1586_v50 = vmul.f32 %v1584_v31, %v1578_v36 }
 0x518   :  { %v1542_v18 = vadd.f32 %v1540_v21, %v1532_v29  ;;  %v2126_v29 = vrot.slane %v2124_v35, 4 }
 0x519   :  { %v1562_v34 = vpop.permute.xlu2 %1561 }
 0x51a   :  { %v1549_v9 = vadd.f32 %v1548_v20, %v1542_v18  ;;  %v1564_v42 = vmul.f32 %v1562_v34, %v1559_v25  ;;  %v1570_v52 = vmul.f32 %v1568_v16, %v1562_v34  ;;  %v1008_v20 = vrot.slane %v1006_v32, 4  ;;  %v1598_v25 = vld [vmem:[#allocation11 + $0x10] sm:$0xf]  ;;  %v1607_v32 = vld [vmem:[#allocation9 + $0x14] sm:$0xf] }
 0x51b   :  { %v3735_v3 = vpop.permute.xlu0 %2135  ;;  %v1040_v16 = vrot.slane %v1038_v48, 4  ;;  %v1600_v62 = vrot.slane %v1598_v25, 4  ;;  %v1646_v48 = vld [vmem:[#allocation11 + $0x1c] sm:$0xf] }
 0x51c   :  { %v1558_v59 = vadd.f32 %v1556_v8, %v1549_v9  ;;  %v1572_v2 = vrot.slane %v1570_v52, 4  ;;  %v1588_v8 = vrot.slane %v1586_v50, 4  ;;  %v1026_v52 = vrot.slane %v1024_v54, 4 }
 0x51e   :  { %v1565_v47 = vadd.f32 %v1564_v42, %v1558_v59  ;;  %v1030_v42 = vld [vmem:[#allocation9 + $0x58] sm:$0xf]  ;;  %v1591_v59 = vld [vmem:[#allocation9 + $0x10] sm:$0xf] }
 0x520   :  { %v1574_v14 = vadd.f32 %v1572_v2, %v1565_v47 }
 0x521   :  { %v3727_v45 = vpop.permute.xlu2 %1609 }
 0x522   :  { %v1581_v7 = vadd.f32 %v1580_v38, %v1574_v14  ;;  %v1618_v23 = vmul.f32 %v1616_v1, %v3727_v45 }
 0x523   :  { %v3741_v60 = vpop.permute.xlu0 %2199 }
 0x529   :  { %v3731_v5 = vpop.permute.xlu2 %1625 }
 0x531   :  { %v2104_v19 = vpop.permute.xlu2 %2103 }
 0x532   :  { %v2112_v24 = vmul.f32 %v2110_v30, %v2104_v19  ;;  %v1590_v30 = vadd.f32 %v1588_v8, %v1581_v7 }
 0x539   :  { %v2120_v28 = vpop.permute.xlu2 %2119 }
 0x53a   :  { %v2122_v36 = vmul.f32 %v2120_v28, %v2117_v55  ;;  %v1648_v55 = vrot.slane %v1646_v48, 4  ;;  %v1933_v48 = vld [vmem:[#allocation11 + $0x3c] sm:$0xf] }
 0x549   :  { %v770_v41 = vpop.permute.xlu1 %769 }
 0x54a   :  { %773 = vst.msk [vmem:[#allocation2] sm:$0xff] %vm772_vm4, %v770_v41 }
 0x551   :  { %v961_v44 = vpop.permute.xlu1 %960 }
 0x552   :  { %v963_v10 = vmul.f32 %v961_v44, %v958_v39  ;;  %v970_v27 = vmul.f32 %v968_v17, %v961_v44  ;;  %v2114_v17 = vrot.slane %v2112_v24, 4  ;;  %v1058_v39 = vrot.slane %v1056_v22, 4 }
 0x553   :  { %v2128_v44 = vmul.f32 %v2126_v29, %v2120_v28  ;;  %v1612_v22 = vmul.f32 %v3727_v45, %v1607_v32  ;;  %v3749_v28 = vpop.permute.xlu2 %2486  ;;  %v2149_v45 = vld [vmem:[#allocation9 + $0x4c] sm:$0xf] }
 0x554   :  { %v964_v56 = vadd.f32 %v963_v10, %v956_v4  ;;  %v972_v12 = vrot.slane %v970_v27, 4  ;;  %v2106_v4 = vmul.f32 %v2104_v19, %v2100_v63  ;;  %v1060_v43 = vmul.f32 %v1058_v39, %v3725_v0  ;;  %v1630_v19 = vld [vmem:[#allocation11 + $0x18] sm:$0xf] }
 0x555   :  { %v2130_v47 = vrot.slane %v2128_v44, 4  ;;  %v1632_v24 = vrot.slane %v1630_v19, 4  ;;  %v1623_v63 = vld [vmem:[#allocation9 + $0x18] sm:$0xf] }
 0x556   :  { %v974_v34 = vadd.f32 %v972_v12, %v964_v56  ;;  %v2116_v53 = vadd.f32 %v2114_v17, %v2106_v4  ;;  %v2140_v56 = vld [vmem:[#allocation11 + $0x48] sm:$0xf]  ;;  %v1639_v4 = vld [vmem:[#allocation9 + $0x1c] sm:$0xf] }
 0x557   :  { %v2142_v35 = vrot.slane %v2140_v56, 4 }
 0x558   :  { %v982_v40 = vadd.f32 %v981_v26, %v974_v34  ;;  %v2123_v26 = vadd.f32 %v2122_v36, %v2116_v53 }
 0x559   :  { %v2144_v54 = vmul.f32 %v2142_v35, %v3735_v3 }
 0x55a   :  { %v992_v41 = vadd.f32 %v990_v33, %v982_v40  ;;  %v1033_v21 = vpop.permute.xlu1 %1032  ;;  %v1053_v33 = vmul.f32 %v3725_v0, %v1048_v61  ;;  %v2133_v40 = vld [vmem:[#allocation9 + $0x48] sm:$0xf]  ;;  %v2132_v15 = vadd.f32 %v2130_v47, %v2123_v26  ;;  %v2204_v47 = vld [vmem:[#allocation11 + $0x58] sm:$0xf] }
 0x55b   :  { %v1042_v27 = vmul.f32 %v1040_v16, %v1033_v21  ;;  %v1035_v12 = vmul.f32 %v1033_v21, %v1030_v42  ;;  %v2156_v21 = vld [vmem:[#allocation11 + $0x4c] sm:$0xf]  ;;  %v2138_v0 = vmul.f32 %v3735_v3, %v2133_v40  ;;  %v1642_v16 = vpop.permute.xlu0 %1641  ;;  %v2146_v3 = vrot.slane %v2144_v54, 4  ;;  %v1926_v54 = vld [vmem:[#allocation9 + $0x3c] sm:$0xf] }
 0x55c   :  { %v1000_v18 = vadd.f32 %v999_v57, %v992_v41  ;;  %v1062_v41 = vrot.slane %v1060_v43, 4  ;;  %v2158_v25 = vrot.slane %v2156_v21, 4  ;;  %v1650_v36 = vmul.f32 %v1648_v55, %v1642_v16  ;;  %v2184_v43 = vpop.permute.xlu2 %2183 }
 0x55d   :  { %v1044_v58 = vrot.slane %v1042_v27, 4  ;;  %v2139_v7 = vadd.f32 %v2138_v0, %v2132_v15  ;;  %v2172_v27 = vld [vmem:[#allocation11 + $0x50] sm:$0xf]  ;;  %v2206_v32 = vrot.slane %v2204_v47, 4 }
 0x55e   :  { %v1010_v9 = vadd.f32 %v1008_v20, %v1000_v18  ;;  %v1620_v20 = vrot.slane %v1618_v23, 4  ;;  %v1634_v18 = vmul.f32 %v1632_v24, %v3731_v5  ;;  %v2491_v23 = vld [vmem:[#allocation11 + $0x78] sm:$0xf] }
 0x55f   :  { %v2148_v1 = vadd.f32 %v2146_v3, %v2139_v7  ;;  %v2493_v21 = vrot.slane %v2491_v23, 4  ;;  %v2208_v15 = vmul.f32 %v2206_v32, %v3741_v60  ;;  %v2507_v3 = vld [vmem:[#allocation11 + $0x7c] sm:$0xf] }
 0x560   :  { %v1018_v10 = vadd.f32 %v1017_v51, %v1010_v9  ;;  %v1628_v51 = vmul.f32 %v3731_v5, %v1623_v63  ;;  %v1636_v44 = vrot.slane %v1634_v18, 4  ;;  %v2188_v5 = vld [vmem:[#allocation11 + $0x54] sm:$0xf] }
 0x561   :  { %v2190_v19 = vrot.slane %v2188_v5, 4 }
 0x562   :  { %v1028_v11 = vadd.f32 %v1026_v52, %v1018_v10 }
 0x563   :  { %v1594_v2 = vpop.permute.xlu1 %1593  ;;  %v2192_v35 = vmul.f32 %v2190_v19, %v2184_v43 }
 0x564   :  { %v1036_v34 = vadd.f32 %v1035_v12, %v1028_v11  ;;  %v1596_v37 = vmul.f32 %v1594_v2, %v1591_v59  ;;  %v1602_v31 = vmul.f32 %v1600_v62, %v1594_v2  ;;  %v1644_v62 = vmul.f32 %v1642_v16, %v1639_v4  ;;  %v2216_v63 = vpop.permute.xlu2 %2215 }
 0x565   :  { %v1652_v59 = vrot.slane %v1650_v36, 4  ;;  %v2174_v11 = vrot.slane %v2172_v27, 4  ;;  %v2509_v27 = vrot.slane %v2507_v3, 4 }
 0x566   :  { %v1046_v57 = vadd.f32 %v1044_v58, %v1036_v34  ;;  %v1597_v14 = vadd.f32 %v1596_v37, %v1590_v30  ;;  %v1604_v38 = vrot.slane %v1602_v31, 4  ;;  %v2165_v30 = vld [vmem:[#allocation9 + $0x50] sm:$0xf] }
 0x568   :  { %v1054_v50 = vadd.f32 %v1053_v33, %v1046_v57  ;;  %v1606_v29 = vadd.f32 %v1604_v38, %v1597_v14  ;;  %v2181_v33 = vld [vmem:[#allocation9 + $0x54] sm:$0xf]  ;;  %v2220_v57 = vld [vmem:[#allocation11 + $0x5c] sm:$0xf] }
 0x569   :  { %v2186_v14 = vmul.f32 %v2184_v43, %v2181_v33 }
 0x56a   :  { %v1613_v17 = vadd.f32 %v1612_v22, %v1606_v29  ;;  %v3752_v39 = vadd.f32 %v1062_v41, %v1054_v50  ;;  %v2197_v41 = vld [vmem:[#allocation9 + $0x58] sm:$0xf]  ;;  %v1935_v22 = vrot.slane %v1933_v48, 4  ;;  %v2194_v29 = vrot.slane %v2192_v35, 4 }
 0x56b   :  { %v2484_v50 = vld [vmem:[#allocation9 + $0x78] sm:$0xf]  ;;  %v2202_v55 = vmul.f32 %v3741_v60, %v2197_v41 }
 0x56c   :  { %v1622_v49 = vadd.f32 %v1620_v20, %v1613_v17  ;;  %v2152_v9 = vpop.permute.xlu1 %2151  ;;  %v1066_v8 = vrot.slane %v3752_v39, 4  ;;  %v2222_v20 = vrot.slane %v2220_v57, 4  ;;  %v2489_v17 = vmul.f32 %v3749_v28, %v2484_v50 }
 0x56d   :  { %v2154_v52 = vmul.f32 %v2152_v9, %v2149_v45  ;;  %v2160_v10 = vmul.f32 %v2158_v25, %v2152_v9  ;;  %v2495_v25 = vmul.f32 %v2493_v21, %v3749_v28  ;;  %v2213_v45 = vld [vmem:[#allocation9 + $0x5c] sm:$0xf]  ;;  %v1371_v19 = vpop.permute.xlu0 %1370  ;;  %v2636_v21 = vld [vmem:[%s3793_s5] sm:$0xff] }
 0x56e   :  { %v1629_v42 = vadd.f32 %v1628_v51, %v1622_v49  ;;  %1067 = vrot.lane.b32.xlu2 %v1066_v8, %s2932_s9  ;;  %v2210_v49 = vrot.slane %v2208_v15, 4  ;;  %v2224_v9 = vmul.f32 %v2222_v20, %v2216_v63  ;;  %v2490_v60 = vadd.f32 %v2489_v17, %v3697_v46 }
 0x56f   :  { %v2155_v61 = vadd.f32 %v2154_v52, %v2148_v1  ;;  %v2162_v56 = vrot.slane %v2160_v10, 4  ;;  %v2497_v52 = vrot.slane %v2495_v25, 4  ;;  %v2500_v1 = vld [vmem:[#allocation9 + $0x7c] sm:$0xf]  ;;  %v1373_v47 = vsel %vm193_vm2, %v3707_v13, %v1371_v19 }
 0x570   :  { %v1638_v53 = vadd.f32 %v1636_v44, %v1629_v42  ;;  %v2218_v44 = vmul.f32 %v2216_v63, %v2213_v45 }
 0x571   :  { %v2164_v34 = vadd.f32 %v2162_v56, %v2155_v61  ;;  %v2499_v61 = vadd.f32 %v2497_v52, %v2490_v60 }
 0x572   :  { %v1645_v12 = vadd.f32 %v1644_v62, %v1638_v53  ;;  %v2226_v62 = vrot.slane %v2224_v9, 4 }
 0x574   :  { %v3757_v26 = vadd.f32 %v1652_v59, %v1645_v12 }
 0x575   :  { %v2168_v2 = vpop.permute.xlu1 %2167 }
 0x576   :  { %v2170_v58 = vmul.f32 %v2168_v2, %v2165_v30  ;;  %v2176_v37 = vmul.f32 %v2174_v11, %v2168_v2  ;;  %v1656_v31 = vrot.slane %v3757_v26, 4 }
 0x578   :  { %v2171_v40 = vadd.f32 %v2170_v58, %v2164_v34  ;;  %v2178_v24 = vrot.slane %v2176_v37, 4  ;;  %1657 = vrot.lane.b32.xlu1 %v1656_v31, %s2932_s9 }
 0x57a   :  { %v2180_v38 = vadd.f32 %v2178_v24, %v2171_v40 }
 0x57c   :  { %v2187_v0 = vadd.f32 %v2186_v14, %v2180_v38 }
 0x57e   :  { %v2196_v18 = vadd.f32 %v2194_v29, %v2187_v0  ;;  %v1929_v16 = vpop.permute.xlu1 %1928 }
 0x57f   :  { %v1931_v51 = vmul.f32 %v1929_v16, %v1926_v54  ;;  %v1937_v7 = vmul.f32 %v1935_v22, %v1929_v16 }
 0x580   :  { %v2203_v8 = vadd.f32 %v2202_v55, %v2196_v18 }
 0x581   :  { %v1932_v4 = vadd.f32 %v1931_v51, %v3703_v6  ;;  %v1939_v36 = vrot.slane %v1937_v7, 4 }
 0x582   :  { %v2212_v42 = vadd.f32 %v2210_v49, %v2203_v8 }
 0x583   :  { %v1941_v10 = vadd.f32 %v1939_v36, %v1932_v4 }
 0x584   :  { %v2219_v28 = vadd.f32 %v2218_v44, %v2212_v42 }
 0x585   :  { %v1943_v53 = vrot.slane %v1941_v10, 4 }
 0x586   :  { %v2503_v59 = vpop.permute.xlu1 %2502  ;;  %v2228_v5 = vadd.f32 %v2226_v62, %v2219_v28 }
 0x587   :  { %v2505_v56 = vmul.f32 %v2503_v59, %v2500_v1  ;;  %v2511_v11 = vmul.f32 %v2509_v27, %v2503_v59  ;;  %1944 = vrot.lane.b32.xlu2 %v1943_v53, %s2932_s9 }
 0x588   :  { %v2230_v6 = vrot.slane %v2228_v5, 4 }
 0x589   :  { %v2506_v12 = vadd.f32 %v2505_v56, %v2499_v61  ;;  %v2513_v43 = vrot.slane %v2511_v11, 4 }
 0x58a   :  { %2231 = vrot.lane.b32.xlu0 %v2230_v6, %s2932_s9 }
 0x58b   :  { %v2515_v46 = vadd.f32 %v2513_v43, %v2506_v12 }
 0x58d   :  { %v2517_v30 = vrot.slane %v2515_v46, 4 }
 0x58f   :  { %2518 = vrot.lane.b32.xlu1 %v2517_v30, %s2932_s9 }
 0x592   :  { %1375 = vrot.lane.b32.xlu0 %v1373_v47, %s2946_s14 }
 0x5c8   :  { %v1068_v2 = vpop.permute.xlu2 %1067 }
 0x5c9   :  { %v1070_v34 = vsel %vm193_vm2, %v3752_v39, %v1068_v2 }
 0x5ca   :  { %1072 = vrot.lane.b32.xlu2 %v1070_v34, %s2947_s16 }
 0x5e1   :  { %v1945_v58 = vpop.permute.xlu2 %1944 }
 0x5e2   :  { %v1947_v37 = vsel %vm193_vm2, %v1941_v10, %v1945_v58 }
 0x5e3   :  { %1949 = vrot.lane.b32.xlu2 %v1947_v37, %s2948_s17 }
 0x5ea   :  { %v1658_v31 = vpop.permute.xlu1 %1657 }
 0x5eb   :  { %v1660_v33 = vsel %vm193_vm2, %v3757_v26, %v1658_v31 }
 0x5ec   :  { %1662 = vrot.lane.b32.xlu1 %v1660_v33, %s2949_s18 }
 0x5fc   :  { %v2232_v13 = vpop.permute.xlu0 %2231 }
 0x5fd   :  { %v2234_v32 = vsel %vm193_vm2, %v2228_v5, %v2232_v13 }
 0x5fe   :  { %2236 = vrot.lane.b32.xlu0 %v2234_v32, %s2950_s19 }
 0x601   :  { %v2519_v23 = vpop.permute.xlu1 %2518 }
 0x602   :  { %v2521_v39 = vsel %vm193_vm2, %v2515_v46, %v2519_v23 }
 0x603   :  { %2523 = vrot.lane.b32.xlu1 %v2521_v39, %s2951_s2 }
 0x604   :  { %v1376_v40 = vpop.permute.xlu0 %1375 }
 0x624   :  { %v1073_v35 = vpop.permute.xlu2 %1072 }
 0x625   :  { %1076 = vst.msk [vmem:[#allocation2] sm:$0xff] %vm1075_vm5, %v1073_v35 }
 0x626   :  { %1379 = vst.msk [vmem:[#allocation2] sm:$0xff] %vm1378_vm6, %v1376_v40 }
 0x63d   :  { %v1950_v24 = vpop.permute.xlu2 %1949 }
 0x65e   :  { %v1663_v26 = vpop.permute.xlu1 %1662 }
 0x65f   :  { %1666 = vst.msk [vmem:[#allocation2] sm:$0xff] %vm1665_vm7, %v1663_v26 }
 0x660   :  { %1953 = vst.msk [vmem:[#allocation2] sm:$0xff] %vm1952_vm8, %v1950_v24 }
 0x670   :  { %v2237_v48 = vpop.permute.xlu0 %2236 }
 0x671   :  { %2240 = vst.msk [vmem:[#allocation2] sm:$0xff] %vm2239_vm9, %v2237_v48 }
 0x675   :  { %v2524_v57 = vpop.permute.xlu1 %2523 }
 0x676   :  { %2527 = vst.msk [vmem:[#allocation2] sm:$0xff] %vm2526_vm10, %v2524_v57 }
 0x67d   :  { %v2530_v14 = vld [vmem:[#allocation2] sm:$0xff] }
 0x67e   :  { %v2531_v38 = vpack.c.bf16 %v2530_v14, %v2530_v14 }
 0x680   :  { %v2541_v41 = vsel %vm193_vm2, %v2531_v38, 0 }
 0x681   :  { %2550 = vmatpush.bf16.msrb.mxu2 %v2541_v41 }
 0x684   :  { %2632 = vmatmul.msk.bf16.vlgmr.msrb.gmra.mxu2 %vm185_vm1, %v2636_v21 }
 0x707   :  { %v2552_v22 = vpop.f32.mrf.mxu2 }
 0x708   :  { %2558 = vst.msk [vmem:[#allocation12] sm:$0xff] %vm2557_vm11, %v2552_v22 }
 0x70f   :  { %v2554_v15 = vpop.f32.mrf.mxu2 }
 0x710   :  { %2559 = vst.msk [vmem:[#allocation12 + $0x8] sm:$0xff] %vm2557_vm11, %v2554_v15 }
 0x711   :  { %2572 = dma.vmem_to_hbm [thread:$0]  %s2565_s25, 256, %s2567_s23, [#allocation5], %s2953_s26, %s2953_s26, %s2931_s3  }
 0x712   :  { %2921 = dma.done.wait [#allocation5], 256  }
 0x713   :  { %2922 = vsyncadd [#allocation5], 4294967040 }
 0x714   :  { %2577 = vsyncpa [#allocation4], 1 }
 0x715   :  { %2578 = vsyncpa [#allocation7], 1 }
 0x716   :  { %2579 = vsyncpa [#allocation10], 1 }
 0x717   :  { %2580 = vsyncpa [#allocation5], 1 }

</bundles_post_ra>
